<compile_context>
chip_gen: v5e
topology: v5e:2x2
jax: 0.10.0
libtpu: 0.0.40
codegen_flags: <defaults>
</compile_context>

<pallas_src>
import math
import jax
import jax.numpy as jnp
from jax import lax
from jax.experimental import pallas as pl
from jax.experimental.pallas import tpu as pltpu


def _gelu_exact(x):
    # PyTorch nn.GELU() default: exact erf-based GELU (kept for parity;
    # tanh-approx would move work to the EUP but changes numerics).
    return 0.5 * x * (1.0 + lax.erf(x * (1.0 / math.sqrt(2.0))))


def bert_mlp_kernel(x_ref, w1_ref, b1_ref, w2_ref, b2_ref, o_ref, h_ref):
    # One M-tile per grid step. Weights/biases are grid-invariant (index_map
    # pinned to (0,0)) so Pallas keeps them resident; x/out tiles stream.
    #   x_ref : (TM, H)  f32   -> cast to bf16 for the MXU
    #   w1_ref: (H, 4H)  bf16     b1_ref: (1, 4H) f32
    #   w2_ref: (4H, H)  bf16     b2_ref: (1, H)  f32
    #   o_ref : (TM, H)  f32
    #   h_ref : (TM, 4H) bf16 VMEM scratch for the intermediate activation
    x = x_ref[...].astype(jnp.bfloat16)

    # Linear1: bf16 operands, f32 accumulate on the MXU.
    h = jnp.dot(x, w1_ref[...], preferred_element_type=jnp.float32)
    h = h + b1_ref[...]          # bias + GELU in f32 (broadcast (1,4H))
    h = _gelu_exact(h)

    # Single cast into explicit bf16 VMEM scratch (controlled footprint).
    h_ref[...] = h.astype(jnp.bfloat16)

    # Linear2: bf16 operands, f32 accumulate on the MXU.
    y = jnp.dot(h_ref[...], w2_ref[...], preferred_element_type=jnp.float32)
    y = y + b2_ref[...]          # broadcast (1, H)

    # TODO(synk): nn.Dropout is identity in eval mode; training would need a
    # pltpu.prng_seed/prng_random_bits mask.
    o_ref[...] = y.astype(o_ref.dtype)


def bert_mlp(x, w1, b1, w2, b2, *, tm=128, vmem_limit_bytes=48 * 1024 * 1024):
    """BertMLP forward. x: [B,S,H] f32. w1: [H,4H], b1: [4H], w2: [4H,H], b2: [H].

    Generation notes: tm<=256 keeps the bf16 intermediate scratch small enough
    for v7x's 64 MiB VMEM; on v6e/v5e tm can be raised (512+) together with
    vmem_limit_bytes for deeper overlap.
    """
    B, S, H = x.shape
    H4 = 4 * H
    M = B * S
    x2d = x.reshape(M, H)

    # Tile M; pad rows so the grid tiles evenly (padded rows sliced off after).
    tm = min(tm, max(8, ((M + 7) // 8) * 8))
    m_pad = pl.cdiv(M, tm) * tm
    if m_pad != M:
        x2d = jnp.pad(x2d, ((0, m_pad - M), (0, 0)))

    # bf16 weights: halves weight DMA bytes / resident VMEM, feeds MXU at
    # bf16 peak. Biases stay f32 (added post-accumulation in f32).
    w1_bf16 = w1.astype(jnp.bfloat16)
    w2_bf16 = w2.astype(jnp.bfloat16)
    b1_2d = b1.reshape(1, H4).astype(jnp.float32)
    b2_2d = b2.reshape(1, H).astype(jnp.float32)

    grid = (m_pad // tm,)

    itemsize = x.dtype.itemsize
    cost = pl.CostEstimate(
        flops=2 * m_pad * H * H4 * 2,            # two matmuls
        transcendentals=m_pad * H4,              # erf on the intermediate
        bytes_accessed=(m_pad * H * itemsize     # x read
                        + m_pad * H * itemsize   # out write
                        + w1_bf16.size * 2 + w2_bf16.size * 2
                        + b1_2d.size * 4 + b2_2d.size * 4),
    )

    out2d = pl.pallas_call(
        bert_mlp_kernel,
        out_shape=jax.ShapeDtypeStruct((m_pad, H), x.dtype),
        grid_spec=pltpu.PrefetchScalarGridSpec(
            num_scalar_prefetch=0,
            grid=grid,
            in_specs=[
                pl.BlockSpec((tm, H), lambda i: (i, 0)),    # x tile: streams
                pl.BlockSpec((H, H4), lambda i: (0, 0)),    # w1: resident
                pl.BlockSpec((1, H4), lambda i: (0, 0)),    # b1: resident
                pl.BlockSpec((H4, H), lambda i: (0, 0)),    # w2: resident
                pl.BlockSpec((1, H), lambda i: (0, 0)),     # b2: resident
            ],
            out_specs=pl.BlockSpec((tm, H), lambda i: (i, 0)),
            scratch_shapes=[pltpu.VMEM((tm, H4), jnp.bfloat16)],
        ),
        compiler_params=pltpu.CompilerParams(
            # M tiles are independent: 'parallel' lets v7x shard across its
            # two TensorCores; near-zero effect (harmless) on v5e/v6e.
            dimension_semantics=("parallel",),
            vmem_limit_bytes=vmem_limit_bytes,
        ),
        cost_estimate=cost,
    )(x2d, w1_bf16, b1_2d, w2_bf16, b2_2d)

    return out2d[:M].reshape(B, S, H)


if __name__ == "__main__":
    # Small but lane-dense config: hidden=128 -> intermediate=512.
    # batch=2, seq=128 => M=256 rows => grid of 2 M-tiles (TM=128).
    B, S, H = 2, 128, 128
    key = jax.random.PRNGKey(0)
    kx, kw1, kb1, kw2, kb2 = jax.random.split(key, 5)

    x = jax.random.normal(kx, (B, S, H), dtype=jnp.float32)

    # Deterministic param init (PyTorch Linear-like uniform bounds).
    bound1 = 1.0 / math.sqrt(H)
    w1 = jax.random.uniform(kw1, (H, 4 * H), jnp.float32, -bound1, bound1)
    b1 = jax.random.uniform(kb1, (4 * H,), jnp.float32, -bound1, bound1)
    bound2 = 1.0 / math.sqrt(4 * H)
    w2 = jax.random.uniform(kw2, (4 * H, H), jnp.float32, -bound2, bound2)
    b2 = jax.random.uniform(kb2, (H,), jnp.float32, -bound2, bound2)

    out = bert_mlp(x, w1, b1, w2, b2)
    out = jax.block_until_ready(out)

    # Pure-JAX reference mirroring the kernel's bf16-operand / f32-accumulate
    # numerics (f32 tolerances would not hold for bf16 matmul inputs).
    xb = x.reshape(-1, H).astype(jnp.bfloat16)
    h = jnp.dot(xb, w1.astype(jnp.bfloat16),
                preferred_element_type=jnp.float32) + b1
    h = 0.5 * h * (1.0 + lax.erf(h / math.sqrt(2.0)))
    ref = jnp.dot(h.astype(jnp.bfloat16), w2.astype(jnp.bfloat16),
                  preferred_element_type=jnp.float32) + b2
    ref = ref.reshape(B, S, H)
    assert jnp.allclose(out, ref, atol=2e-2, rtol=2e-2), "mismatch vs reference"

    print("KERNEL_OK")
</pallas_src>

<mosaic_0001>
module attributes {stable_mosaic.version = 11 : i64} {
  func.func @bert_mlp_kernel(%arg0: i32, %arg1: memref<128x128xf32, #tpu.memory_space<vmem>>, %arg2: memref<128x512xbf16, #tpu.memory_space<vmem>>, %arg3: memref<1x512xf32, #tpu.memory_space<vmem>>, %arg4: memref<512x128xbf16, #tpu.memory_space<vmem>>, %arg5: memref<1x128xf32, #tpu.memory_space<vmem>>, %arg6: memref<128x128xf32, #tpu.memory_space<vmem>>, %arg7: memref<128x512xbf16, #tpu.memory_space<vmem>>) attributes {dimension_semantics = [#tpu.dimension_semantics<parallel>], iteration_bounds = array<i64: 2>, scalar_prefetch = 0 : i64, scratch_operands = 1 : i64, tpu.core_type = #tpu.core_type<tc>, window_params = [{transform_indices = @transform_0, window_bounds = array<i64: 128, 128>}, {pipeline_mode = #tpu.pipeline_mode<synchronous>, transform_indices = @transform_1, window_bounds = array<i64: 128, 512>}, {pipeline_mode = #tpu.pipeline_mode<synchronous>, transform_indices = @transform_2, window_bounds = array<i64: 1, 512>}, {pipeline_mode = #tpu.pipeline_mode<synchronous>, transform_indices = @transform_3, window_bounds = array<i64: 512, 128>}, {pipeline_mode = #tpu.pipeline_mode<synchronous>, transform_indices = @transform_4, window_bounds = array<i64: 1, 128>}, {transform_indices = @transform_5, window_bounds = array<i64: 128, 128>}]} {
    %c0 = arith.constant 0 : index
    %c0_0 = arith.constant 0 : index
    %0 = vector.load %arg1[%c0, %c0_0] : memref<128x128xf32, #tpu.memory_space<vmem>>, vector<128x128xf32>
    %1 = arith.truncf %0 : vector<128x128xf32> to vector<128x128xbf16>
    %c0_1 = arith.constant 0 : index
    %c0_2 = arith.constant 0 : index
    %2 = vector.load %arg2[%c0_1, %c0_2] : memref<128x512xbf16, #tpu.memory_space<vmem>>, vector<128x512xbf16>
    %cst = arith.constant dense<0.000000e+00> : vector<128x512xf32>
    %3 = tpu.matmul %1, %2, %cst {dimension_numbers = #tpu.dot_dimension_numbers<[1], [0], [0], [1], [0, 0, 1, 1], [], []>} : vector<128x128xbf16>, vector<128x512xbf16>, vector<128x512xf32> -> vector<128x512xf32>
    %c0_3 = arith.constant 0 : index
    %c0_4 = arith.constant 0 : index
    %4 = vector.load %arg3[%c0_3, %c0_4] : memref<1x512xf32, #tpu.memory_space<vmem>>, vector<1x512xf32>
    %5 = vector.broadcast %4 : vector<1x512xf32> to vector<128x512xf32>
    %6 = arith.addf %3, %5 : vector<128x512xf32>
    %cst_5 = arith.constant 5.000000e-01 : f32
    %7 = vector.broadcast %cst_5 : f32 to vector<128x512xf32>
    %8 = arith.mulf %7, %6 : vector<128x512xf32>
    %cst_6 = arith.constant 0.707106769 : f32
    %9 = vector.broadcast %cst_6 : f32 to vector<128x512xf32>
    %10 = arith.mulf %6, %9 : vector<128x512xf32>
    %11 = math.erf %10 : vector<128x512xf32>
    %cst_7 = arith.constant 1.000000e+00 : f32
    %12 = vector.broadcast %cst_7 : f32 to vector<128x512xf32>
    %13 = arith.addf %12, %11 : vector<128x512xf32>
    %14 = arith.mulf %8, %13 : vector<128x512xf32>
    %15 = arith.truncf %14 : vector<128x512xf32> to vector<128x512xbf16>
    %c0_8 = arith.constant 0 : index
    %c0_9 = arith.constant 0 : index
    %16 = vector.load %arg7[%c0_8, %c0_9] : memref<128x512xbf16, #tpu.memory_space<vmem>>, vector<128x512xbf16>
    tpu.vector_store %arg7[%c0_8, %c0_9], %15 {strides = array<i32>} : memref<128x512xbf16, #tpu.memory_space<vmem>>, vector<128x512xbf16>,
    %c0_10 = arith.constant 0 : index
    %c0_11 = arith.constant 0 : index
    %17 = vector.load %arg7[%c0_10, %c0_11] : memref<128x512xbf16, #tpu.memory_space<vmem>>, vector<128x512xbf16>
    %c0_12 = arith.constant 0 : index
    %c0_13 = arith.constant 0 : index
    %18 = vector.load %arg4[%c0_12, %c0_13] : memref<512x128xbf16, #tpu.memory_space<vmem>>, vector<512x128xbf16>
    %cst_14 = arith.constant dense<0.000000e+00> : vector<128x128xf32>
    %19 = tpu.matmul %17, %18, %cst_14 {dimension_numbers = #tpu.dot_dimension_numbers<[1], [0], [0], [1], [0, 0, 1, 1], [], []>} : vector<128x512xbf16>, vector<512x128xbf16>, vector<128x128xf32> -> vector<128x128xf32>
    %c0_15 = arith.constant 0 : index
    %c0_16 = arith.constant 0 : index
    %20 = vector.load %arg5[%c0_15, %c0_16] : memref<1x128xf32, #tpu.memory_space<vmem>>, vector<1x128xf32>
    %21 = vector.broadcast %20 : vector<1x128xf32> to vector<128x128xf32>
    %22 = arith.addf %19, %21 : vector<128x128xf32>
    %c0_17 = arith.constant 0 : index
    %c0_18 = arith.constant 0 : index
    %23 = vector.load %arg6[%c0_17, %c0_18] : memref<128x128xf32, #tpu.memory_space<vmem>>, vector<128x128xf32>
    tpu.vector_store %arg6[%c0_17, %c0_18], %22 {strides = array<i32>} : memref<128x128xf32, #tpu.memory_space<vmem>>, vector<128x128xf32>,
    return
  }
  func.func @transform_0(%arg0: i32) -> (i32, i32) {
    %c0_i32 = arith.constant 0 : i32
    %c0_i32_0 = arith.constant 0 : i32
    return %arg0, %c0_i32 : i32, i32
  }
  func.func @transform_1(%arg0: i32) -> (i32, i32) {
    %c0_i32 = arith.constant 0 : i32
    %c0_i32_0 = arith.constant 0 : i32
    %c0_i32_1 = arith.constant 0 : i32
    return %c0_i32, %c0_i32_0 : i32, i32
  }
  func.func @transform_2(%arg0: i32) -> (i32, i32) {
    %c0_i32 = arith.constant 0 : i32
    %c0_i32_0 = arith.constant 0 : i32
    %c0_i32_1 = arith.constant 0 : i32
    return %c0_i32, %c0_i32_0 : i32, i32
  }
  func.func @transform_3(%arg0: i32) -> (i32, i32) {
    %c0_i32 = arith.constant 0 : i32
    %c0_i32_0 = arith.constant 0 : i32
    %c0_i32_1 = arith.constant 0 : i32
    return %c0_i32, %c0_i32_0 : i32, i32
  }
  func.func @transform_4(%arg0: i32) -> (i32, i32) {
    %c0_i32 = arith.constant 0 : i32
    %c0_i32_0 = arith.constant 0 : i32
    %c0_i32_1 = arith.constant 0 : i32
    return %c0_i32, %c0_i32_0 : i32, i32
  }
  func.func @transform_5(%arg0: i32) -> (i32, i32) {
    %c0_i32 = arith.constant 0 : i32
    %c0_i32_0 = arith.constant 0 : i32
    return %arg0, %c0_i32 : i32, i32
  }
}

</mosaic_0001>

<bundles_post_ra>
// kernel: tpu_custom_call.1
= control target key start
LH: loop header
LB: loop body
LE: loop exit
PB: predicated region body
PF: predicated region fallthrough
CT: control target
= control target key end

     0   :  { %10 = vsyncpa [#allocation4], 0  ;;  %s7979_s0 = inlined_call_operand.hbm [shape: f32[256,128], index: 0, kind: input, shape index: {}]   ;;  %s7980_s1 = inlined_call_operand.hbm [shape: bf16[128,512], index: 1, kind: input, shape index: {}]   ;;  %s7981_s2 = inlined_call_operand.hbm [shape: f32[1,512], index: 2, kind: input, shape index: {}]   ;;  %s7982_s3 = inlined_call_operand.hbm [shape: bf16[512,128], index: 3, kind: input, shape index: {}]   ;;  %s7983_s4 = inlined_call_operand.vmem [shape: f32[1,128], index: 4, kind: input, shape index: {}]   ;;  %s7984_s5 = inlined_call_operand.hbm [shape: f32[256,128], index: 5, kind: output, shape index: {}]  }
   0x1   :  { %12 = vsyncpa [#allocation4 + $0x1], 0 }
   0x2   :  { %13 = vsyncpa [#allocation7], 0 }
   0x3   :  { %14 = vsyncpa [#allocation10], 0 }
   0x4   :  { %15 = vsyncpa [#allocation5], 0 }
   0x5   :  { %17 = vsyncpa [#allocation5 + $0x1], 0  ;;  %s5396_s18 = smov 0   ;;  %s5398_s19 = smov 0  }
   0x6   :  { %s5400_s20 = smov 0   ;;  %s5402_s21 = smov 0  }
   0x7 LB: > { %s5417_s22 = sadd.s32 4294967295, %s5353_s21   ;;  %s4379_s23 = sadd.s32 4294967294, %s5353_s21   ;;  %s5353_s21 = sphi %s5402_s21, %s8079_s21   ;;  %s5349_s20 = sphi %s5400_s20, %s8078_s20   ;;  %s5345_s19 = sphi %s5398_s19, %s8077_s19   ;;  %s5341_s18 = sphi %s5396_s18, %s8076_s18  }
   0x8   : > { %p43_p0 = scmp.ne.s32.totalorder %s5345_s19, %s5341_s18  ;;  %p44_p1 = scmp.eq.s32.totalorder %s5417_s22, 0 }
   0x9   : > { %p151_p2 = scmp.eq.s32.totalorder %s5417_s22, 1  ;;  %p157_p3 = scmp.eq.s32.totalorder %s4379_s23, 1 }
   0xa   : > { %p5426_p4 = por %p44_p1, %p43_p0  ;;  %p4380_p5 = scmp.ge.s32.totalorder %s5353_s21, 1 }
   0xb   : > { %p5431_p6 = por %p157_p3, %p43_p0  ;;  %p164_p7 = scmp.lt.s32.totalorder %s5353_s21, 3 }
   0xc   : > { %s175_s28 = sshll.u32 %s7980_s1, 4  ;;  %s5355_s30 = smov [#allocation6]   ;;  %s176_s28 = int_to_ptr.hbm [resolvable:$true] %s175_s28 }
   0xd   : > { %p5439_p8 = pnand %p4380_p5, %p164_p7  ;;  %s177_s6 = sshll.u32 %s5355_s30, 4  ;;  %s178_s6 = int_to_ptr.vmem [resolvable:$true] %s177_s6 }
   0xe   : > { %s190_s10 = sshll.u32 %s7981_s2, 4  ;;  %s5356_s11 = smov 256   ;;  %s191_s10 = int_to_ptr.hbm [resolvable:$true] %s190_s10 }
   0xf   : > { %p4961_p9 = pneg %p5439_p8  ;;  %s5357_s12 = smov 16  }
  0x10   : > { %s5358_s13 = smov [#allocation8]   ;;  %s201_s17 = sshll.u32 %s7982_s3, 4  ;;  %s202_s17 = int_to_ptr.hbm [resolvable:$true] %s201_s17 }
  0x11   : > { %p5447_p10 = pnand %p4961_p9, %p44_p1  ;;  %s192_s14 = sshll.u32 %s5358_s13, 4  ;;  %s193_s14 = int_to_ptr.vmem [resolvable:$true] %s192_s14 }
  0x12   : > { %s5359_s23 = smov [#allocation9]   ;;  %s5360_s27 = smov 64  }
  0x13   : > { %4964 = dma.hbm_to_vmem [thread:$0]  (!%p5447_p10), %s176_s28, 4096, %s178_s6, [#allocation7], %s5356_s11, %s5356_s11, %s5357_s12  }
  0x14   : > { %4967 = dma.hbm_to_vmem [thread:$0]  (!%p5447_p10), %s191_s10, 64, %s193_s14, [#allocation7]  }
  0x15   : > { %s203_s26 = sshll.u32 %s5359_s23, 4  ;;  %s5361_s28 = smov 4   ;;  %s204_s26 = int_to_ptr.vmem [resolvable:$true] %s203_s26 }
  0x16   : > { %4970 = dma.hbm_to_vmem [thread:$0]  (!%p5447_p10), %s202_s17, 4096, %s204_s26, [#allocation10], %s5360_s27, %s5360_s27, %s5361_s28  }
  0x17   : > { %s5465_s30 = sadd.s32 1, %s5353_s21   ;;  %s30_s8 = sadd.s32 1, %s5349_s20 }
  0x18   : > { %s27_s6 = ssub.s32 %s5353_s21, %s5465_s30  ;;  %p37_p13 = scmp.ne.s32.totalorder %s5349_s20, %s5345_s19 }
  0x19   : > { %p28_p12 = scmp.eq.s32.totalorder %s27_s6, 0  ;;  %p38_p0 = scmp.eq.s32.totalorder %s5353_s21, 0 }
  0x1a   : > { %p4982_p3 = scmp.lt.s32.totalorder %s5353_s21, 2  ;;  %p5479_p7 = por %p151_p2, %p37_p13 }
  0x1b   : > { %s5475_s9 = scalar_select %p28_p12, %s5349_s20, %s30_s8  }
  0x1c   : > { %p39_p5 = por %p38_p0, %p37_p13  ;;  %s220_s7 = sand.u32 1, %s5349_s20  }
  0x1d   : > { %s4847_s11 = sshll.u32 %s5353_s21, 7  ;;  %s4385_s12 = sshll.u32 %s220_s7, 7 }
  0x1e   : > { %s229_s15 = scalar_lea.hbm %s7979_s0, %s4847_s11  ;;  %s224_s17 = scalar_lea.vmem [#allocation3], %s4385_s12 }
  0x1f   : > { %s230_s16 = sshll.u32 %s229_s15, 4  ;;  %s232_s23 = sshll.u32 %s224_s17, 4  ;;  %s231_s16 = int_to_ptr.hbm [resolvable:$true] %s230_s16  ;;  %s233_s23 = int_to_ptr.vmem [resolvable:$true] %s232_s23 }
  0x20   : > { %p5490_p9 = pnand %p4982_p3, %p39_p5  ;;  %s221_s27 = scalar_lea.sflag [#allocation4], %s220_s7 }
  0x21   : > { %s5249_s28 = sshra.s32 %s231_s16, 4  ;;  %s5256_s12 = scalar_lea.hbm %s7979_s0, 256  ;;  %s5250_s28 = int_to_ptr.hbm [resolvable:$true] %s5249_s28 }
  0x22   : > { %s5251_s6 = scalar_lea.hbm %s5250_s28, 128  ;;  %p5253_p10 = pneg %p5490_p9 }
  0x23   : > { %p5252_p2 = scmp.ne.s32.totalorder %s5250_s28, %s5251_s6  ;;  %p5257_p0 = scmp.lt.s32.totalorder %s5250_s28, %s7979_s0 }
  0x24   : > { %p5258_p3 = scmp.lt.s32.totalorder %s5256_s12, %s5251_s6 }
  0x25   : > { %p5254_p12 = pnand %p5253_p10, %p5252_p2 }
  0x26   : > { %p5259_p5 = por %p5258_p3, %p5257_p0 }
  0x27   : > { %p5255_p13 = pneg %p5254_p12 }
  0x29   : > { %p5260_p11 = pnand %p5259_p5, %p5255_p13 }
  0x2b   : > { %5263 = shalt.err (!%p5260_p11)
}
  0x2c   : > { %s5362_s7 = smov 128   ;;  %s5363_s15 = smov 8  }
  0x2d   : > { %4974 = dma.hbm_to_vmem [thread:$0]  (!%p5490_p9), %s231_s16, 2048, %s233_s23, %s221_s27, %s5362_s7, %s5362_s7, %s5363_s15  }
  0x2e   : > { %244 = sbr.rel (%p5439_p8) target bundleno = 1104 (0x450), region = 40  ;;  %s5507_s17 = sand.u32 (!%p5439_p8), 1, %s5345_s19  }
  0x2f   : > { %s4389_s28 = sshll.u32 (!%p5439_p8), %s5507_s17, 7  ;;  %s247_s6 = scalar_lea.sflag (!%p5439_p8), [#allocation4], %s5507_s17 }
  0x30   : > { %s5513_s8 = scalar_lea.vmem (!%p5439_p8), [#allocation3], %s4389_s28 }
  0x33   : > { %5324 = dma.done.wait (%p5426_p4), %s247_s6, 2048  }
  0x34   : > { %5326 = vsyncadd (%p5426_p4), %s247_s6, 4294965248 }
  0x35   : > { %5328 = dma.done.wait (%p44_p1), [#allocation7], 4160  }
  0x36   : > { %5330 = vsyncadd (%p44_p1), [#allocation7], 4294963136 }
  0x37   : > { %5332 = dma.done.wait (%p44_p1), [#allocation10], 4096  }
  0x38   : > { %5334 = vsyncadd (%p44_p1), [#allocation10], 4294963200  ;;  %v4508_v0 = vld [vmem:[#allocation6 + $0xe0] sm:$0xf]  ;;  %v4878_v1 = vld [vmem:[#allocation6 + $0xec] sm:$0xf0] }
  0x39   : > { %v4876_v2 = vld [vmem:[#allocation6 + $0xe4] sm:$0xf]  ;;  %v4509_v3 = vor.u32 %v4878_v1, %v4508_v0  ;;  %v4510_v4 = vld [vmem:[#allocation6 + $0xf0] sm:$0xf0]  ;;  %v4516_v5 = vld [vmem:[#allocation6 + $0xe8] sm:$0xf] }
  0x3a   : > { %v4879_v6 = vld [vmem:[#allocation6 + $0xf4] sm:$0xf0]  ;;  %v4513_v7 = vor.u32 %v4876_v2, %v4510_v4  ;;  %v4877_v9 = vld [vmem:[#allocation6 + $0xec] sm:$0xf]  ;;  %v4518_v10 = vld [vmem:[#allocation6 + $0xf8] sm:$0xf0] }
  0x3b   : > { %v4517_v8 = vor.u32 %v4879_v6, %v4516_v5  ;;  %v4492_v11 = vld [vmem:[#allocation6 + $0xc0] sm:$0xf]  ;;  %521 = vmatpush.bf16.msra.mxu0 %v4509_v3  ;;  %v4521_v12 = vor.u32 %v4877_v9, %v4518_v10  ;;  %v4874_v13 = vld [vmem:[#allocation6 + $0xcc] sm:$0xf0]  ;;  %v4872_v14 = vld [vmem:[#allocation6 + $0xc4] sm:$0xf] }
  0x3c   : > { %v4494_v15 = vld [vmem:[#allocation6 + $0xd0] sm:$0xf0]  ;;  %570 = vmatpush.bf16.msra.mxu1 %v4513_v7  ;;  %v4493_v16 = vor.u32 %v4874_v13, %v4492_v11  ;;  %v4500_v18 = vld [vmem:[#allocation6 + $0xc8] sm:$0xf]  ;;  %v4875_v19 = vld [vmem:[#allocation6 + $0xd4] sm:$0xf0] }
  0x3d   : > { %619 = vmatpush.bf16.msra.mxu2 %v4517_v8  ;;  %v4497_v17 = vor.u32 %v4872_v14, %v4494_v15  ;;  %v4873_v20 = vld [vmem:[#allocation6 + $0xcc] sm:$0xf]  ;;  %668 = vmatpush.bf16.msra.mxu3 %v4521_v12  ;;  %v4501_v21 = vor.u32 %v4875_v19, %v4500_v18  ;;  %v4502_v22 = vld [vmem:[#allocation6 + $0xd8] sm:$0xf0]  ;;  %v4476_v23 = vld [vmem:[#allocation6 + $0xa0] sm:$0xf] }
  0x3e   : > { %v4870_v24 = vld [vmem:[#allocation6 + $0xac] sm:$0xf0]  ;;  %v4505_v25 = vor.u32 %v4873_v20, %v4502_v22  ;;  %v4868_v26 = vld [vmem:[#allocation6 + $0xa4] sm:$0xf]  ;;  %v4478_v27 = vld [vmem:[#allocation6 + $0xb0] sm:$0xf0] }
  0x3f   : > { %v4484_v28 = vld [vmem:[#allocation6 + $0xa8] sm:$0xf]  ;;  %522 = vmatpush.bf16.msra.mxu0 %v4493_v16  ;;  %v4477_v29 = vor.u32 %v4870_v24, %v4476_v23  ;;  %v4871_v30 = vld [vmem:[#allocation6 + $0xb4] sm:$0xf0]  ;;  %v4869_v31 = vld [vmem:[#allocation6 + $0xac] sm:$0xf]  ;;  %v4481_v33 = vor.u32 %v4868_v26, %v4478_v27 }
  0x40   : > { %v4486_v32 = vld [vmem:[#allocation6 + $0xb8] sm:$0xf0]  ;;  %571 = vmatpush.bf16.msra.mxu1 %v4497_v17  ;;  %v4485_v34 = vor.u32 %v4871_v30, %v4484_v28  ;;  %v4460_v35 = vld [vmem:[#allocation6 + $0x80] sm:$0xf]  ;;  %v4866_v36 = vld [vmem:[#allocation6 + $0x8c] sm:$0xf0] }
  0x41   : > { %620 = vmatpush.bf16.msra.mxu2 %v4501_v21  ;;  %v4864_v37 = vld [vmem:[#allocation6 + $0x84] sm:$0xf]  ;;  %669 = vmatpush.bf16.msra.mxu3 %v4505_v25  ;;  %v4489_v38 = vor.u32 %v4869_v31, %v4486_v32  ;;  %v4462_v39 = vld [vmem:[#allocation6 + $0x90] sm:$0xf0]  ;;  %v4468_v40 = vld [vmem:[#allocation6 + $0x88] sm:$0xf]  ;;  %v4461_v44 = vor.u32 %v4866_v36, %v4460_v35 }
  0x42   : > { %v4867_v41 = vld [vmem:[#allocation6 + $0x94] sm:$0xf0]  ;;  %v4865_v42 = vld [vmem:[#allocation6 + $0x8c] sm:$0xf]  ;;  %v4470_v43 = vld [vmem:[#allocation6 + $0x98] sm:$0xf0]  ;;  %v4465_v45 = vor.u32 %v4864_v37, %v4462_v39 }
  0x43   : > { %523 = vmatpush.bf16.msra.mxu0 %v4477_v29  ;;  %v4469_v46 = vor.u32 %v4867_v41, %v4468_v40  ;;  %v4444_v47 = vld [vmem:[#allocation6 + $0x60] sm:$0xf]  ;;  %v4862_v48 = vld [vmem:[#allocation6 + $0x6c] sm:$0xf0]  ;;  %v4860_v49 = vld [vmem:[#allocation6 + $0x64] sm:$0xf]  ;;  %v4473_v50 = vor.u32 %v4865_v42, %v4470_v43 }
  0x44   : > { %572 = vmatpush.bf16.msra.mxu1 %v4481_v33  ;;  %v4446_v51 = vld [vmem:[#allocation6 + $0x70] sm:$0xf0]  ;;  %v4452_v52 = vld [vmem:[#allocation6 + $0x68] sm:$0xf]  ;;  %v4863_v53 = vld [vmem:[#allocation6 + $0x74] sm:$0xf0]  ;;  %v4445_v56 = vor.u32 %v4862_v48, %v4444_v47 }
  0x45   : > { %621 = vmatpush.bf16.msra.mxu2 %v4485_v34  ;;  %670 = vmatpush.bf16.msra.mxu3 %v4489_v38  ;;  %v4861_v54 = vld [vmem:[#allocation6 + $0x6c] sm:$0xf]  ;;  %v4454_v55 = vld [vmem:[#allocation6 + $0x78] sm:$0xf0]  ;;  %v4449_v57 = vor.u32 %v4860_v49, %v4446_v51  ;;  %v4453_v58 = vor.u32 %v4863_v53, %v4452_v52  ;;  %v4428_v59 = vld [vmem:[#allocation6 + $0x40] sm:$0xf] }
  0x46   : > { %v4858_v60 = vld [vmem:[#allocation6 + $0x4c] sm:$0xf0]  ;;  %v4856_v61 = vld [vmem:[#allocation6 + $0x44] sm:$0xf]  ;;  %v4457_v62 = vor.u32 %v4861_v54, %v4454_v55  ;;  %v4430_v63 = vld [vmem:[#allocation6 + $0x50] sm:$0xf0] }
  0x47   : > { %524 = vmatpush.bf16.msra.mxu0 %v4461_v44  ;;  %v4436_v0 = vld [vmem:[#allocation6 + $0x48] sm:$0xf]  ;;  %v4859_v1 = vld [vmem:[#allocation6 + $0x54] sm:$0xf0]  ;;  %v4857_v2 = vld [vmem:[#allocation6 + $0x4c] sm:$0xf]  ;;  %v4429_v4 = vor.u32 %v4858_v60, %v4428_v59  ;;  %v4433_v5 = vor.u32 %v4856_v61, %v4430_v63 }
  0x48   : > { %573 = vmatpush.bf16.msra.mxu1 %v4465_v45  ;;  %v4438_v3 = vld [vmem:[#allocation6 + $0x58] sm:$0xf0]  ;;  %v4437_v6 = vor.u32 %v4859_v1, %v4436_v0  ;;  %v4412_v7 = vld [vmem:[#allocation6 + $0x20] sm:$0xf]  ;;  %v4854_v8 = vld [vmem:[#allocation6 + $0x2c] sm:$0xf0] }
  0x49   : > { %622 = vmatpush.bf16.msra.mxu2 %v4469_v46  ;;  %671 = vmatpush.bf16.msra.mxu3 %v4473_v50  ;;  %v4852_v9 = vld [vmem:[#allocation6 + $0x24] sm:$0xf]  ;;  %v4441_v10 = vor.u32 %v4857_v2, %v4438_v3  ;;  %v4414_v11 = vld [vmem:[#allocation6 + $0x30] sm:$0xf0]  ;;  %v4420_v12 = vld [vmem:[#allocation6 + $0x28] sm:$0xf]  ;;  %v4413_v16 = vor.u32 %v4854_v8, %v4412_v7 }
  0x4a   : > { %v4855_v13 = vld [vmem:[#allocation6 + $0x34] sm:$0xf0]  ;;  %v4853_v14 = vld [vmem:[#allocation6 + $0x2c] sm:$0xf]  ;;  %v4422_v15 = vld [vmem:[#allocation6 + $0x38] sm:$0xf0]  ;;  %v4417_v17 = vor.u32 %v4852_v9, %v4414_v11 }
  0x4b   : > { %525 = vmatpush.bf16.msra.mxu0 %v4445_v56  ;;  %v4421_v18 = vor.u32 %v4855_v13, %v4420_v12  ;;  %v4396_v19 = vld [vmem:[#allocation6] sm:$0xf]  ;;  %v4850_v20 = vld [vmem:[#allocation6 + $0xc] sm:$0xf0]  ;;  %v4848_v21 = vld [vmem:[#allocation6 + $0x4] sm:$0xf]  ;;  %v4425_v22 = vor.u32 %v4853_v14, %v4422_v15 }
  0x4c   : > { %574 = vmatpush.bf16.msra.mxu1 %v4449_v57  ;;  %v4398_v23 = vld [vmem:[#allocation6 + $0x10] sm:$0xf0]  ;;  %v4404_v24 = vld [vmem:[#allocation6 + $0x8] sm:$0xf]  ;;  %v4851_v25 = vld [vmem:[#allocation6 + $0x14] sm:$0xf0]  ;;  %v4397_v28 = vor.u32 %v4850_v20, %v4396_v19 }
  0x4d   : > { %623 = vmatpush.bf16.msra.mxu2 %v4453_v58  ;;  %672 = vmatpush.bf16.msra.mxu3 %v4457_v62  ;;  %v4849_v26 = vld [vmem:[#allocation6 + $0xc] sm:$0xf]  ;;  %v4406_v27 = vld [vmem:[#allocation6 + $0x18] sm:$0xf0]  ;;  %v295_v29 = vld [vmem:[%s5513_s8] sm:$0xff]  ;;  %v4401_v31 = vor.u32 %v4848_v21, %v4398_v23  ;;  %v4405_v32 = vor.u32 %v4851_v25, %v4404_v24  ;;  %s7911_s16 = scalar_lea.vmem [#allocation11], %s4389_s28 }
  0x4e   : > { %v296_v30 = vld [vmem:[%s5513_s8 + $0x8] sm:$0xff]  ;;  %v4409_v33 = vor.u32 %v4849_v26, %v4406_v27  ;;  %v297_v35 = vld [vmem:[%s5513_s8 + $0x10] sm:$0xff]  ;;  %v298_v36 = vld [vmem:[%s5513_s8 + $0x18] sm:$0xff]  ;;  %s4944_s23 = sshll.u32 %s5417_s22, 7  ;;  %s4274_s12 = sshll.u32 %s7911_s16, 4  ;;  %s4275_s12 = int_to_ptr.vmem [resolvable:$true] %s4274_s12 }
  0x4f   : > { %526 = vmatpush.bf16.msra.mxu0 %v4429_v4  ;;  %v311_v34 = vpack.c.bf16 %v296_v30, %v295_v29  ;;  %v312_v37 = vpack.c.bf16 %v298_v36, %v297_v35  ;;  %v299_v38 = vld [vmem:[%s5513_s8 + $0x20] sm:$0xff]  ;;  %v300_v39 = vld [vmem:[%s5513_s8 + $0x28] sm:$0xff]  ;;  %v301_v44 = vld [vmem:[%s5513_s8 + $0x30] sm:$0xff]  ;;  %s4273_s11 = scalar_lea.hbm %s7984_s5, %s4944_s23  ;;  %s4262_s22 = scalar_lea.sflag [#allocation5], %s5507_s17 }
  0x50   : > { %575 = vmatpush.bf16.msra.mxu1 %v4433_v5  ;;  %v313_v40 = vpack.c.bf16 %v300_v39, %v299_v38  ;;  %v4935_v41 = vld [vmem:[#allocation9 + $0xb8] sm:$0xff]  ;;  %v4934_v48 = vld [vmem:[#allocation9 + $0xb0] sm:$0xff]  ;;  %v304_v52 = vld [vmem:[%s5513_s8 + $0x48] sm:$0xff]  ;;  %s4276_s13 = sshll.u32 %s4273_s11, 4  ;;  %s5299_s6 = scalar_lea.hbm %s7984_s5, 256  ;;  %s4277_s13 = int_to_ptr.hbm [resolvable:$true] %s4276_s13 }
  0x51   : > { %624 = vmatpush.bf16.msra.mxu2 %v4437_v6  ;;  %673 = vmatpush.bf16.msra.mxu3 %v4441_v10  ;;  %v4919_v42 = vld [vmem:[#allocation9 + $0x38] sm:$0xff]  ;;  %v4918_v49 = vld [vmem:[#allocation9 + $0x30] sm:$0xff]  ;;  %v4933_v55 = vld [vmem:[#allocation9 + $0xa8] sm:$0xff]  ;;  %s5293_s14 = sshra.s32 %s4277_s13, 4  ;;  %s5294_s14 = int_to_ptr.hbm [resolvable:$true] %s5293_s14 }
  0x52   : > { %v4943_v43 = vld [vmem:[#allocation9 + $0xf8] sm:$0xff]  ;;  %v4942_v50 = vld [vmem:[#allocation9 + $0xf0] sm:$0xff]  ;;  %v4917_v56 = vld [vmem:[#allocation9 + $0x28] sm:$0xff]  ;;  %s5295_s7 = scalar_lea.hbm %s5294_s14, 128  ;;  %p5300_p11 = scmp.lt.s32.totalorder %s5294_s14, %s7984_s5 }
  0x53   : > { %527 = vmatpush.bf16.msra.mxu0 %v4413_v16  ;;  %v302_v45 = vld [vmem:[%s5513_s8 + $0x38] sm:$0xff]  ;;  %v303_v51 = vld [vmem:[%s5513_s8 + $0x40] sm:$0xff]  ;;  %v4941_v57 = vld [vmem:[#allocation9 + $0xe8] sm:$0xff]  ;;  %p5296_p1 = scmp.ne.s32.totalorder %s5294_s14, %s5295_s7  ;;  %p5301_p9 = scmp.lt.s32.totalorder %s5299_s6, %s5295_s7 }
  0x54   : > { %576 = vmatpush.bf16.msra.mxu1 %v4417_v17  ;;  %v314_v46 = vpack.c.bf16 %v302_v45, %v301_v44  ;;  %v4927_v47 = vld [vmem:[#allocation9 + $0x78] sm:$0xff]  ;;  %v315_v53 = vpack.c.bf16 %v304_v52, %v303_v51  ;;  %v4926_v54 = vld [vmem:[#allocation9 + $0x70] sm:$0xff]  ;;  %v4925_v61 = vld [vmem:[#allocation9 + $0x68] sm:$0xff] }
  0x55   : > { %625 = vmatpush.bf16.msra.mxu2 %v4421_v18  ;;  %674 = vmatpush.bf16.msra.mxu3 %v4425_v22  ;;  %v305_v58 = vld [vmem:[%s5513_s8 + $0x50] sm:$0xff]  ;;  %v306_v59 = vld [vmem:[%s5513_s8 + $0x58] sm:$0xff]  ;;  %v307_v62 = vld [vmem:[%s5513_s8 + $0x60] sm:$0xff]  ;;  %p5297_p4 = pnand %p5296_p1, %p5479_p7  ;;  %p5302_p2 = por %p5301_p9, %p5300_p11 }
  0x56   : > { %v316_v60 = vpack.c.bf16 %v306_v59, %v305_v58  ;;  %v308_v63 = vld [vmem:[%s5513_s8 + $0x68] sm:$0xff]  ;;  %v309_v1 = vld [vmem:[%s5513_s8 + $0x70] sm:$0xff]  ;;  %v310_v2 = vld [vmem:[%s5513_s8 + $0x78] sm:$0xff] }
  0x57   : > { %528 = vmatpush.bf16.msra.mxu0 %v4397_v28  ;;  %v317_v0 = vpack.c.bf16 %v308_v63, %v307_v62  ;;  %v318_v3 = vpack.c.bf16 %v310_v2, %v309_v1  ;;  %v351_v4 = vld [vmem:[#allocation8] sm:$0xf]  ;;  %p5298_p8 = pneg %p5297_p4 }
  0x58   : > { %577 = vmatpush.bf16.msra.mxu1 %v4401_v31  ;;  %v5543_v5 = vperm.slane %v351_v4, 0  ;;  %v5545_v6 = vperm.slane %v351_v4, 1  ;;  %v5559_v13 = vperm.slane %v351_v4, 2  ;;  %v5563_v15 = vperm.slane %v351_v4, 3 }
  0x59   : > { %626 = vmatpush.bf16.msra.mxu2 %v4405_v32  ;;  %675 = vmatpush.bf16.msra.mxu3 %v4409_v33  ;;  %p5303_p10 = pnand %p5302_p2, %p5298_p8 }
  0x5a   : > { %529 = vmatmul.bf16.vlgmr.msra.gmra.mxu0 %v311_v34 }
  0x5b   : > { %578 = vmatmul.bf16.vlgmr.msra.gmra.mxu1 %v311_v34  ;;  %4049 = vmatpush.bf16.msrb.mxu0 %v4919_v42 }
  0x5c   : > { %627 = vmatmul.bf16.vlgmr.msra.gmra.mxu2 %v311_v34  ;;  %676 = vmatmul.bf16.vlgmr.msra.gmra.mxu3 %v311_v34 }
  0x5d   : > { %4147 = vmatpush.bf16.msrb.mxu2 %v4935_v41  ;;  %4196 = vmatpush.bf16.msrb.mxu3 %v4943_v43 }
  0x5e   : > { %4098 = vmatpush.bf16.msrb.mxu1 %v4927_v47 }
  0x5f   : > { %4050 = vmatpush.bf16.msrb.mxu0 %v4918_v49 }
  0x61   : > { %4148 = vmatpush.bf16.msrb.mxu2 %v4934_v48  ;;  %4197 = vmatpush.bf16.msrb.mxu3 %v4942_v50 }
  0x62   : > { %4099 = vmatpush.bf16.msrb.mxu1 %v4926_v54 }
  0x63   : > { %4051 = vmatpush.bf16.msrb.mxu0 %v4917_v56 }
  0x65   : > { %4149 = vmatpush.bf16.msrb.mxu2 %v4933_v55  ;;  %4198 = vmatpush.bf16.msrb.mxu3 %v4941_v57 }
  0x66   : > { %4100 = vmatpush.bf16.msrb.mxu1 %v4925_v61 }
  0x6a   : > { %534 = vmatmul.bf16.gmra.mxu0 %v312_v37 }
  0x6b   : > { %583 = vmatmul.bf16.gmra.mxu1 %v312_v37 }
  0x6c   : > { %632 = vmatmul.bf16.gmra.mxu2 %v312_v37  ;;  %681 = vmatmul.bf16.gmra.mxu3 %v312_v37 }
  0x7a   : > { %539 = vmatmul.bf16.gmra.mxu0 %v313_v40 }
  0x7b   : > { %588 = vmatmul.bf16.gmra.mxu1 %v313_v40 }
  0x7c   : > { %637 = vmatmul.bf16.gmra.mxu2 %v313_v40  ;;  %686 = vmatmul.bf16.gmra.mxu3 %v313_v40 }
  0x8a   : > { %544 = vmatmul.bf16.gmra.mxu0 %v314_v46 }
  0x8b   : > { %593 = vmatmul.bf16.gmra.mxu1 %v314_v46 }
  0x8c   : > { %642 = vmatmul.bf16.gmra.mxu2 %v314_v46  ;;  %691 = vmatmul.bf16.gmra.mxu3 %v314_v46 }
  0x9a   : > { %549 = vmatmul.bf16.gmra.mxu0 %v315_v53 }
  0x9b   : > { %598 = vmatmul.bf16.gmra.mxu1 %v315_v53 }
  0x9c   : > { %647 = vmatmul.bf16.gmra.mxu2 %v315_v53  ;;  %696 = vmatmul.bf16.gmra.mxu3 %v315_v53 }
  0xaa   : > { %554 = vmatmul.bf16.gmra.mxu0 %v316_v60 }
  0xab   : > { %603 = vmatmul.bf16.gmra.mxu1 %v316_v60 }
  0xac   : > { %652 = vmatmul.bf16.gmra.mxu2 %v316_v60  ;;  %701 = vmatmul.bf16.gmra.mxu3 %v316_v60 }
  0xba   : > { %559 = vmatmul.bf16.gmra.mxu0 %v317_v0 }
  0xbb   : > { %608 = vmatmul.bf16.gmra.mxu1 %v317_v0 }
  0xbc   : > { %657 = vmatmul.bf16.gmra.mxu2 %v317_v0  ;;  %706 = vmatmul.bf16.gmra.mxu3 %v317_v0 }
  0xca   : > { %564 = vmatmul.bf16.gmra.mxu0 %v318_v3 }
  0xcb   : > { %613 = vmatmul.bf16.gmra.mxu1 %v318_v3 }
  0xcc   : > { %662 = vmatmul.bf16.gmra.mxu2 %v318_v3  ;;  %711 = vmatmul.bf16.gmra.mxu3 %v318_v3 }
  0xd7   : > { %v530_v7 = vpop.f32.mrf.mxu0 }
  0xd8   : > { %v5548_v8 = vadd.f32 %v530_v7, %v5543_v5  ;;  %v579_v9 = vpop.f32.mrf.mxu1 }
  0xd9   : > { %v5551_v10 = vadd.f32 %v579_v9, %v5545_v6 }
  0xda   : > { %v5554_v11 = vmul.f32 0.70710677, %v5548_v8 }
  0xdb   : > { %v5557_v12 = vmul.f32 0.70710677, %v5551_v10 }
  0xdc   : > { %v845_v14 = vmul.f32 %v5554_v11, %v5554_v11 }
  0xdd   : > { %v885_v16 = vmul.f32 %v5557_v12, %v5557_v12 }
  0xde   : > { %v5567_v17 = vmin.f32 %v845_v14, 16.0 }
  0xdf   : > { %v628_v18 = vpop.f32.mrf.mxu2  ;;  %v5569_v19 = vmin.f32 %v885_v16, 16.0  ;;  %v677_v21 = vpop.f32.mrf.mxu3 }
  0xe0   : > { %v5572_v20 = vadd.f32 %v628_v18, %v5559_v13  ;;  %v847_v22 = vmul.f32 2.1237322e-06, %v5567_v17  ;;  %v858_v23 = vmul.f32 3.8918573e-05, %v5567_v17  ;;  %v5577_v24 = vadd.f32 %v677_v21, %v5563_v15  ;;  %v532_v25 = vpop.f32.mrf.mxu0  ;;  %v581_v31 = vpop.f32.mrf.mxu1  ;;  %v4916_v18 = vld [vmem:[#allocation9 + $0x20] sm:$0xff] }
  0xe1   : > { %v887_v26 = vmul.f32 2.1237322e-06, %v5569_v19  ;;  %v898_v27 = vmul.f32 3.8918573e-05, %v5569_v19  ;;  %v5585_v34 = vadd.f32 %v532_v25, %v5543_v5  ;;  %v5597_v41 = vadd.f32 %v581_v31, %v5545_v6  ;;  %v4924_v21 = vld [vmem:[#allocation9 + $0x60] sm:$0xff]  ;;  %4052 = vmatpush.bf16.msrb.mxu0 %v4916_v18 }
  0xe2   : > { %v848_v28 = vadd.f32 0.00028619796, %v847_v22  ;;  %v859_v29 = vadd.f32 0.001143296, %v858_v23  ;;  %v5582_v30 = vmul.f32 0.70710677, %v5572_v20  ;;  %4101 = vmatpush.bf16.msrb.mxu1 %v4924_v21 }
  0xe3   : > { %v888_v32 = vadd.f32 0.00028619796, %v887_v26  ;;  %v899_v33 = vadd.f32 0.001143296, %v898_v27  ;;  %v5592_v38 = vmul.f32 0.70710677, %v5577_v24 }
  0xe4   : > { %v849_v35 = vmul.f32 %v848_v28, %v5567_v17  ;;  %v860_v36 = vmul.f32 %v859_v29, %v5567_v17  ;;  %v925_v37 = vmul.f32 %v5582_v30, %v5582_v30  ;;  %v5604_v48 = vmul.f32 0.70710677, %v5585_v34  ;;  %v4932_v29 = vld [vmem:[#allocation9 + $0xa0] sm:$0xff] }
  0xe5   : > { %v889_v39 = vmul.f32 %v888_v32, %v5569_v19  ;;  %v900_v40 = vmul.f32 %v899_v33, %v5569_v19  ;;  %v965_v45 = vmul.f32 %v5592_v38, %v5592_v38  ;;  %v5615_v56 = vmul.f32 0.70710677, %v5597_v41  ;;  %v4940_v31 = vld [vmem:[#allocation9 + $0xe0] sm:$0xff]  ;;  %4150 = vmatpush.bf16.msrb.mxu2 %v4932_v29 }
  0xe6   : > { %v850_v42 = vadd.f32 0.0036580483, %v849_v35  ;;  %v861_v43 = vadd.f32 0.014752088, %v860_v36  ;;  %v5599_v44 = vmin.f32 %v925_v37, 16.0  ;;  %v1005_v26 = vmul.f32 %v5604_v48, %v5604_v48  ;;  %4199 = vmatpush.bf16.msrb.mxu3 %v4940_v31 }
  0xe7   : > { %v890_v46 = vadd.f32 0.0036580483, %v889_v39  ;;  %v901_v47 = vadd.f32 0.014752088, %v900_v40  ;;  %v5612_v55 = vmin.f32 %v965_v45, 16.0 }
  0xe8   : > { %v851_v49 = vmul.f32 %v850_v42, %v5567_v17  ;;  %v862_v50 = vmul.f32 %v861_v43, %v5567_v17  ;;  %v927_v51 = vmul.f32 2.1237322e-06, %v5599_v44  ;;  %v938_v52 = vmul.f32 3.8918573e-05, %v5599_v44 }
  0xe9   : > { %v891_v53 = vmul.f32 %v890_v46, %v5569_v19  ;;  %v902_v54 = vmul.f32 %v901_v47, %v5569_v19  ;;  %v967_v2 = vmul.f32 2.1237322e-06, %v5612_v55  ;;  %v978_v9 = vmul.f32 3.8918573e-05, %v5612_v55  ;;  %v630_v47 = vpop.f32.mrf.mxu2 }
  0xea   : > { %v852_v57 = vadd.f32 0.05243302, %v851_v49  ;;  %v863_v58 = vadd.f32 0.112945676, %v862_v50  ;;  %v928_v59 = vadd.f32 0.00028619796, %v927_v51 }
  0xeb   : > { %v892_v60 = vadd.f32 0.05243302, %v891_v53  ;;  %v903_v61 = vadd.f32 0.112945676, %v902_v54  ;;  %v939_v62 = vadd.f32 0.001143296, %v938_v52  ;;  %v1045_v52 = vmul.f32 %v5615_v56, %v5615_v56 }
  0xec   : > { %v853_v63 = vmul.f32 %v852_v57, %v5567_v17  ;;  %v864_v0 = vmul.f32 %v863_v58, %v5567_v17  ;;  %v929_v1 = vmul.f32 %v928_v59, %v5599_v44  ;;  %v968_v33 = vadd.f32 0.00028619796, %v967_v2 }
  0xed   : > { %v893_v3 = vmul.f32 %v892_v60, %v5569_v19  ;;  %v904_v4 = vmul.f32 %v903_v61, %v5569_v19  ;;  %v940_v7 = vmul.f32 %v939_v62, %v5599_v44  ;;  %v979_v39 = vadd.f32 0.001143296, %v978_v9 }
  0xee   : > { %v854_v14 = vadd.f32 0.18741608, %v853_v63  ;;  %v865_v16 = vadd.f32 0.4994258, %v864_v0  ;;  %v930_v25 = vadd.f32 0.0036580483, %v929_v1  ;;  %v969_v46 = vmul.f32 %v968_v33, %v5612_v55 }
  0xef   : > { %v894_v22 = vadd.f32 0.18741608, %v893_v3  ;;  %v905_v23 = vadd.f32 0.4994258, %v904_v4  ;;  %v941_v32 = vadd.f32 0.014752088, %v940_v7  ;;  %v5656_v58 = vadd.f32 %v630_v47, %v5559_v13 }
  0xf0   : > { %v855_v27 = vmul.f32 %v854_v14, %v5567_v17  ;;  %v866_v28 = vmul.f32 %v865_v16, %v5567_v17  ;;  %v931_v37 = vmul.f32 %v930_v25, %v5599_v44  ;;  %v5641_v50 = vmul.f32 0.5, %v5548_v8 }
  0xf1   : > { %v895_v35 = vmul.f32 %v894_v22, %v5569_v19  ;;  %v906_v36 = vmul.f32 %v905_v23, %v5569_v19  ;;  %v942_v45 = vmul.f32 %v941_v32, %v5599_v44  ;;  %v980_v19 = vmul.f32 %v979_v39, %v5612_v55 }
  0xf2   : > { %v856_v40 = vadd.f32 1.1283791, %v855_v27  ;;  %v5632_v42 = vadd.f32 1.0, %v866_v28  ;;  %v932_v17 = vadd.f32 0.05243302, %v931_v37  ;;  %v5644_v51 = vmin.f32 %v1005_v26, 16.0 }
  0xf3   : > { %v5634_v43 = vadd.f32 1.0, %v906_v36  ;;  %v896_v49 = vadd.f32 1.1283791, %v895_v35  ;;  %v5649_v53 = vmul.f32 0.5, %v5551_v10  ;;  %v5652_v54 = vmul.f32 0.5, %v5572_v20 }
  0xf4   : > { %5031 = vrcp.f32 %v5632_v42  ;;  %v933_v57 = vmul.f32 %v932_v17, %v5599_v44  ;;  %v857_v8 = vmul.f32 %v856_v40, %v5554_v11  ;;  %v877_v59 = vand.u32 2147483647, %v5632_v42 }
  0xf5   : > { %5033 = vrcp.f32 %v5634_v43  ;;  %v943_v60 = vadd.f32 0.112945676, %v942_v45  ;;  %v970_v61 = vadd.f32 0.0036580483, %v969_v46  ;;  %v879_v62 = vand.u32 2147483648, %v5632_v42 }
  0xf6   : > { %v897_v63 = vmul.f32 %v896_v49, %v5557_v12  ;;  %v934_v10 = vadd.f32 0.18741608, %v933_v57  ;;  %v981_v0 = vadd.f32 0.014752088, %v980_v19  ;;  %vm873_vm0 = vweird.f32 %v5632_v42 }
  0xf7   : > { %v944_v20 = vmul.f32 %v943_v60, %v5599_v44  ;;  %v971_v1 = vmul.f32 %v970_v61, %v5612_v55  ;;  %v1007_v2 = vmul.f32 2.1237322e-06, %v5644_v51  ;;  %v5666_v3 = vmin.f32 %v1045_v52, 16.0 }
  0xf8   : > { %vm913_vm1 = vweird.f32 %v5634_v43  ;;  %v917_v4 = vand.u32 2147483647, %v5634_v43  ;;  %v982_v7 = vmul.f32 %v981_v0, %v5612_v55  ;;  %v1018_v12 = vmul.f32 3.8918573e-05, %v5644_v51 }
  0xf9   : > { %vm5673_vm2 = vcmp.eq.f32.partialorder %v877_v59, 8.507059e+37  ;;  %v919_v18 = vand.u32 2147483648, %v5634_v43  ;;  %v945_v21 = vadd.f32 0.4994258, %v944_v20  ;;  %v972_v22 = vadd.f32 0.05243302, %v971_v1 }
  0xfa   : > { %v5032_v11 = vpop.eup %5031  ;;  %v880_v23 = vor.u32 1.1754944e-38, %v879_v62  ;;  %v935_v26 = vmul.f32 %v934_v10, %v5599_v44  ;;  %v983_v27 = vadd.f32 0.112945676, %v982_v7  ;;  %v1008_v31 = vadd.f32 0.00028619796, %v1007_v2 }
  0xfb   : > { %v5034_v9 = vpop.eup %5033  ;;  %v869_v14 = vmul.f32 %v5032_v11, %v5632_v42  ;;  %v946_v29 = vmul.f32 %v945_v21, %v5599_v44  ;;  %v1047_v32 = vmul.f32 2.1237322e-06, %v5666_v3  ;;  %v973_v35 = vmul.f32 %v972_v22, %v5612_v55 }
  0xfc   : > { %v909_v25 = vmul.f32 %v5034_v9, %v5634_v43  ;;  %v984_v36 = vmul.f32 %v983_v27, %v5612_v55  ;;  %v1019_v37 = vadd.f32 0.001143296, %v1018_v12  ;;  %vm874_vm3 = vweird.f32 %v5032_v11 }
  0xfd   : > { %v870_v28 = vsub.f32 1.0, %v869_v14  ;;  %v5684_v40 = vadd.f32 1.0, %v946_v29  ;;  %v1009_v17 = vmul.f32 %v1008_v31, %v5644_v51  ;;  %vm914_vm4 = vweird.f32 %v5034_v9  ;;  %vm875_vm6 = vmor %vm873_vm0, %vm874_vm3 }
  0xfe   : > { %v910_v33 = vsub.f32 1.0, %v909_v25  ;;  %v985_v46 = vadd.f32 0.4994258, %v984_v36  ;;  %v1020_v44 = vmul.f32 %v1019_v37, %v5644_v51  ;;  %vm5688_vm5 = vcmp.eq.f32.partialorder %v917_v4, 8.507059e+37  ;;  %vm915_vm7 = vmor %vm913_vm1, %vm914_vm4 }
  0xff   : > { %v871_v39 = vmul.f32 %v5032_v11, %v870_v28  ;;  %v920_v19 = vor.u32 1.1754944e-38, %v919_v18  ;;  %5035 = vrcp.f32 %v5684_v40  ;;  %v974_v57 = vadd.f32 0.18741608, %v973_v35 }
 0x100   : > { %v911_v45 = vmul.f32 %v5034_v9, %v910_v33  ;;  %v986_v59 = vmul.f32 %v985_v46, %v5612_v55  ;;  %v1048_v60 = vadd.f32 0.00028619796, %v1047_v32  ;;  %v936_v62 = vadd.f32 1.1283791, %v935_v26 }
 0x101   : > { %v872_v47 = vadd.f32 %v5032_v11, %v871_v39  ;;  %v1010_v10 = vadd.f32 0.0036580483, %v1009_v17  ;;  %v1021_v0 = vadd.f32 0.014752088, %v1020_v44  ;;  %v957_v2 = vand.u32 2147483647, %v5684_v40 }
 0x102   : > { %v912_v52 = vadd.f32 %v5034_v9, %v911_v45  ;;  %v959_v42 = vand.u32 2147483648, %v5684_v40  ;;  %v5704_v12 = vadd.f32 1.0, %v986_v59  ;;  %v975_v14 = vmul.f32 %v974_v57, %v5612_v55 }
 0x103   : > { %v876_v61 = vsel %vm875_vm6, %v5032_v11, %v872_v47  ;;  %v1011_v43 = vmul.f32 %v1010_v10, %v5644_v51  ;;  %v1022_v18 = vmul.f32 %v1021_v0, %v5644_v51  ;;  %v1049_v16 = vmul.f32 %v1048_v60, %v5666_v3 }
 0x104   : > { %v881_v20 = vsel %vm5673_vm2, %v880_v23, %v876_v61  ;;  %v916_v1 = vsel %vm915_vm7, %v5034_v9, %v912_v52  ;;  %v937_v22 = vmul.f32 %v936_v62, %v5582_v30  ;;  %5037 = vrcp.f32 %v5704_v12 }
 0x105   : > { %v882_v4 = vmul.f32 %v881_v20, %v857_v8  ;;  %v921_v7 = vsel %vm5688_vm5, %v920_v19, %v916_v1  ;;  %v5036_v9 = vpop.eup %5035  ;;  %v1058_v8 = vmul.f32 3.8918573e-05, %v5666_v3  ;;  %vm953_vm8 = vweird.f32 %v5684_v40 }
 0x106   : > { %v922_v11 = vmul.f32 %v921_v7, %v897_v63  ;;  %v949_v25 = vmul.f32 %v5036_v9, %v5684_v40  ;;  %vm5715_vm9 = vcmp.eq.f32.partialorder %v957_v2, 8.507059e+37  ;;  %v960_v26 = vor.u32 1.1754944e-38, %v959_v42 }
 0x107   : > { %v4522_v21 = vclamps-f32 %v882_v4, 1.0  ;;  %v1012_v27 = vadd.f32 0.05243302, %v1011_v43  ;;  %v1023_v28 = vadd.f32 0.112945676, %v1022_v18  ;;  %vm954_vm10 = vweird.f32 %v5036_v9  ;;  %v679_v4 = vpop.f32.mrf.mxu3 }
 0x108   : > { %v4523_v23 = vclamps-f32 %v922_v11, 1.0  ;;  %v950_v31 = vsub.f32 1.0, %v949_v25  ;;  %v976_v30 = vadd.f32 1.1283791, %v975_v14  ;;  %v1050_v32 = vadd.f32 0.0036580483, %v1049_v16  ;;  %vm955_vm11 = vmor %vm953_vm8, %vm954_vm10 }
 0x109   : > { %v3405_v55 = vadd.f32 1.0, %v4522_v21  ;;  %v1013_v35 = vmul.f32 %v1012_v27, %v5644_v51  ;;  %v1024_v36 = vmul.f32 %v1023_v28, %v5644_v51  ;;  %v1059_v37 = vadd.f32 0.001143296, %v1058_v8 }
 0x10a   : > { %v3406_v29 = vadd.f32 1.0, %v4523_v23  ;;  %v951_v17 = vmul.f32 %v5036_v9, %v950_v31  ;;  %v1051_v45 = vmul.f32 %v1050_v32, %v5666_v3  ;;  %v5038_v46 = vpop.eup %5037  ;;  %v5726_v19 = vmul.f32 0.70710677, %v5656_v58 }
 0x10b   : > { %v3469_v33 = vmul.f32 %v3405_v55, %v5641_v50  ;;  %v1014_v44 = vadd.f32 0.18741608, %v1013_v35  ;;  %v1025_v47 = vadd.f32 0.4994258, %v1024_v36  ;;  %v1060_v49 = vmul.f32 %v1059_v37, %v5666_v3  ;;  %v535_v55 = vpop.f32.mrf.mxu0 }
 0x10c   : > { %v3470_v39 = vmul.f32 %v3406_v29, %v5649_v53  ;;  %v952_v52 = vadd.f32 %v5036_v9, %v951_v17  ;;  %v989_v57 = vmul.f32 %v5038_v46, %v5704_v12  ;;  %v997_v59 = vand.u32 2147483647, %v5704_v12 }
 0x10d   : > { %v999_v53 = vand.u32 2147483648, %v5704_v12  ;;  %v1015_v60 = vmul.f32 %v1014_v44, %v5644_v51  ;;  %v1026_v61 = vmul.f32 %v1025_v47, %v5644_v51  ;;  %v1061_v62 = vadd.f32 0.014752088, %v1060_v49 }
 0x10e   : > { %v3533_v50 = vpack.c.bf16 %v3470_v39, %v3469_v33  ;;  %v956_v10 = vsel %vm955_vm11, %v5036_v9, %v952_v52  ;;  %v990_v0 = vsub.f32 1.0, %v989_v57  ;;  %vm994_vm12 = vweird.f32 %v5038_v46 }
 0x10f   : > { %v1085_v20 = vmul.f32 %v5726_v19, %v5726_v19  ;;  %v961_v1 = vsel %vm5715_vm9, %v960_v26, %v956_v10  ;;  %v1016_v2 = vadd.f32 1.1283791, %v1015_v60  ;;  %v5739_v40 = vadd.f32 1.0, %v1026_v61 }
 0x110   : > { %3565 = vst [vmem:[#allocation2] sm:$0xff] %v3533_v50  ;;  %v1052_v42 = vadd.f32 0.05243302, %v1051_v45  ;;  %v962_v7 = vmul.f32 %v961_v1, %v937_v22  ;;  %v991_v43 = vmul.f32 %v5038_v46, %v990_v0  ;;  %v1062_v51 = vmul.f32 %v1061_v62, %v5666_v3  ;;  %v584_v1 = vpop.f32.mrf.mxu1 }
 0x111   : > { %v5742_v11 = vmin.f32 %v1085_v20, 16.0  ;;  %v720_v14 = vmul.f32 0.5, %v5577_v24  ;;  %v5746_v18 = vmul.f32 0.5, %v5585_v34  ;;  %5039 = vrcp.f32 %v5739_v40 }
 0x112   : > { %v5750_v16 = vmul.f32 0.5, %v5597_v41  ;;  %v4524_v9 = vclamps-f32 %v962_v7, 1.0  ;;  %v992_v21 = vadd.f32 %v5038_v46, %v991_v43  ;;  %vm993_vm13 = vweird.f32 %v5704_v12 }
 0x113   : > { %v5754_v22 = vadd.f32 %v679_v4, %v5563_v15  ;;  %v977_v8 = vmul.f32 %v976_v30, %v5592_v38  ;;  %vm995_vm14 = vmor %vm993_vm13, %vm994_vm12  ;;  %v1000_v24 = vor.u32 1.1754944e-38, %v999_v53  ;;  %v1063_v23 = vadd.f32 0.112945676, %v1062_v51 }
 0x114   : > { %v1087_v34 = vmul.f32 2.1237322e-06, %v5742_v11  ;;  %v996_v25 = vsel %vm995_vm14, %v5038_v46, %v992_v21  ;;  %vm998_vm15 = vcmp.eq.f32.partialorder %v997_v59, 8.507059e+37  ;;  %v1017_v41 = vmul.f32 %v1016_v2, %v5604_v48 }
 0x115   : > { %v1053_v63 = vmul.f32 %v1052_v42, %v5666_v3  ;;  %v1001_v26 = vsel %vm998_vm15, %v1000_v24, %v996_v25  ;;  %v1064_v12 = vmul.f32 %v1063_v23, %v5666_v3  ;;  %v1098_v28 = vmul.f32 3.8918573e-05, %v5742_v11 }
 0x116   : > { %v1088_v27 = vadd.f32 0.00028619796, %v1087_v34  ;;  %v3407_v38 = vadd.f32 1.0, %v4524_v9  ;;  %v1002_v29 = vmul.f32 %v1001_v26, %v977_v8  ;;  %v1037_v31 = vand.u32 2147483647, %v5739_v40 }
 0x117   : > { %v5765_v30 = vmul.f32 0.70710677, %v5754_v22  ;;  %v5040_v32 = vpop.eup %5039  ;;  %v1065_v33 = vadd.f32 0.4994258, %v1064_v12  ;;  %v1099_v35 = vadd.f32 0.001143296, %v1098_v28  ;;  %v5769_v36 = vadd.f32 %v535_v55, %v5543_v5 }
 0x118   : > { %v1089_v48 = vmul.f32 %v1088_v27, %v5742_v11  ;;  %v4525_v37 = vclamps-f32 %v1002_v29, 1.0  ;;  %v1029_v39 = vmul.f32 %v5040_v32, %v5739_v40  ;;  %v1039_v17 = vand.u32 2147483648, %v5739_v40 }
 0x119   : > { %v1054_v45 = vadd.f32 0.18741608, %v1053_v63  ;;  %v1066_v46 = vmul.f32 %v1065_v33, %v5666_v3  ;;  %v1100_v47 = vmul.f32 %v1099_v35, %v5742_v11  ;;  %v1125_v49 = vmul.f32 %v5765_v30, %v5765_v30 }
 0x11a   : > { %v1090_v44 = vadd.f32 0.0036580483, %v1089_v48  ;;  %v3471_v50 = vmul.f32 %v3407_v38, %v5652_v54  ;;  %v3408_v52 = vadd.f32 1.0, %v4525_v37  ;;  %v1030_v57 = vsub.f32 1.0, %v1029_v39 }
 0x11b   : > { %v5779_v59 = vmul.f32 0.70710677, %v5769_v36  ;;  %v5781_v53 = vadd.f32 1.0, %v1066_v46  ;;  %v1101_v61 = vadd.f32 0.014752088, %v1100_v47  ;;  %v5784_v62 = vmin.f32 %v1125_v49, 16.0 }
 0x11c   : > { %v1091_v60 = vmul.f32 %v1090_v44, %v5742_v11  ;;  %v3472_v10 = vmul.f32 %v3408_v52, %v720_v14  ;;  %v1031_v0 = vmul.f32 %v5040_v32, %v1030_v57  ;;  %vm1034_vm0 = vweird.f32 %v5040_v32 }
 0x11d   : > { %v1165_v20 = vmul.f32 %v5779_v59, %v5779_v59  ;;  %vm1033_vm1 = vweird.f32 %v5739_v40  ;;  %vm5789_vm2 = vcmp.eq.f32.partialorder %v1037_v31, 8.507059e+37  ;;  %v1055_v2 = vmul.f32 %v1054_v45, %v5666_v3 }
 0x11e   : > { %5041 = vrcp.f32 %v5781_v53  ;;  %v3534_v42 = vpack.c.bf16 %v3472_v10, %v3471_v50  ;;  %v1032_v4 = vadd.f32 %v5040_v32, %v1031_v0  ;;  %v1092_v7 = vadd.f32 0.05243302, %v1091_v60  ;;  %vm1035_vm3 = vmor %vm1033_vm1, %vm1034_vm0 }
 0x11f   : > { %v1102_v43 = vmul.f32 %v1101_v61, %v5742_v11  ;;  %v1040_v51 = vor.u32 1.1754944e-38, %v1039_v17  ;;  %v1127_v14 = vmul.f32 2.1237322e-06, %v5784_v62  ;;  %v1138_v9 = vmul.f32 3.8918573e-05, %v5784_v62 }
 0x120   : > { %v5799_v40 = vadd.f32 %v584_v1, %v5545_v6  ;;  %3566 = vst [vmem:[#allocation2 + $0x8] sm:$0xff] %v3534_v42  ;;  %v1036_v21 = vsel %vm1035_vm3, %v5040_v32, %v1032_v4  ;;  %v1093_v3 = vmul.f32 %v1092_v7, %v5742_v11  ;;  %v5802_v24 = vmin.f32 %v1165_v20, 16.0 }
 0x121   : > { %v1103_v8 = vadd.f32 0.112945676, %v1102_v43  ;;  %v1041_v23 = vsel %vm5789_vm2, %v1040_v51, %v1036_v21  ;;  %v1056_v34 = vadd.f32 1.1283791, %v1055_v2  ;;  %v1128_v25 = vadd.f32 0.00028619796, %v1127_v14 }
 0x122   : > { %v1139_v63 = vadd.f32 0.001143296, %v1138_v9  ;;  %v1042_v55 = vmul.f32 %v1041_v23, %v1017_v41  ;;  %v1077_v26 = vand.u32 2147483647, %v5781_v53  ;;  %v1167_v27 = vmul.f32 2.1237322e-06, %v5802_v24 }
 0x123   : > { %v1104_v12 = vmul.f32 %v1103_v8, %v5742_v11  ;;  %v1129_v38 = vmul.f32 %v1128_v25, %v5784_v62  ;;  %v1178_v31 = vmul.f32 3.8918573e-05, %v5802_v24  ;;  %v5813_v32 = vmul.f32 0.70710677, %v5799_v40 }
 0x124   : > { %v5042_v28 = vpop.eup %5041  ;;  %v1140_v29 = vmul.f32 %v1139_v63, %v5784_v62  ;;  %v4526_v33 = vclamps-f32 %v1042_v55, 1.0  ;;  %v1079_v41 = vand.u32 2147483648, %v5781_v53  ;;  %v1094_v35 = vadd.f32 0.18741608, %v1093_v3 }
 0x125   : > { %v1069_v48 = vmul.f32 %v5042_v28, %v5781_v53  ;;  %v1105_v37 = vadd.f32 0.4994258, %v1104_v12  ;;  %v1130_v39 = vadd.f32 0.0036580483, %v1129_v38  ;;  %vm1074_vm4 = vweird.f32 %v5042_v28 }
 0x126   : > { %v1141_v17 = vadd.f32 0.014752088, %v1140_v29  ;;  %v1168_v46 = vadd.f32 0.00028619796, %v1167_v27  ;;  %v1205_v44 = vmul.f32 %v5813_v32, %v5813_v32  ;;  %v1179_v52 = vadd.f32 0.001143296, %v1178_v31  ;;  %v633_v27 = vpop.f32.mrf.mxu2 }
 0x127   : > { %v1070_v45 = vsub.f32 1.0, %v1069_v48  ;;  %v1106_v47 = vmul.f32 %v1105_v37, %v5742_v11  ;;  %v1131_v49 = vmul.f32 %v1130_v39, %v5784_v62  ;;  %v3409_v57 = vadd.f32 1.0, %v4526_v33 }
 0x128   : > { %v1142_v50 = vmul.f32 %v1141_v17, %v5784_v62  ;;  %v1095_v61 = vmul.f32 %v1094_v35, %v5742_v11  ;;  %v1169_v10 = vmul.f32 %v1168_v46, %v5802_v24  ;;  %v1180_v54 = vmul.f32 %v1179_v52, %v5802_v24  ;;  %v682_v46 = vpop.f32.mrf.mxu3  ;;  %v4923_v52 = vld [vmem:[#allocation9 + $0x58] sm:$0xff] }
 0x129   : > { %v1071_v60 = vmul.f32 %v5042_v28, %v1070_v45  ;;  %v5824_v0 = vadd.f32 1.0, %v1106_v47  ;;  %v1132_v20 = vadd.f32 0.05243302, %v1131_v49  ;;  %v1057_v2 = vmul.f32 %v1056_v34, %v5615_v56  ;;  %4102 = vmatpush.bf16.msrb.mxu1 %v4923_v52 }
 0x12a   : > { %v1143_v1 = vadd.f32 0.112945676, %v1142_v50  ;;  %vm1073_vm5 = vweird.f32 %v5781_v53  ;;  %v1170_v4 = vadd.f32 0.0036580483, %v1169_v10  ;;  %vm1078_vm7 = vcmp.eq.f32.partialorder %v1077_v26, 8.507059e+37 }
 0x12b   : > { %v1072_v42 = vadd.f32 %v5042_v28, %v1071_v60  ;;  %vm1075_vm6 = vmor %vm1073_vm5, %vm1074_vm4  ;;  %v1080_v7 = vor.u32 1.1754944e-38, %v1079_v41  ;;  %5043 = vrcp.f32 %v5824_v0  ;;  %v5831_v11 = vmin.f32 %v1205_v44, 16.0 }
 0x12c   : > { %v1133_v51 = vmul.f32 %v1132_v20, %v5784_v62  ;;  %v1144_v14 = vmul.f32 %v1143_v1, %v5784_v62  ;;  %v1171_v9 = vmul.f32 %v1170_v4, %v5802_v24  ;;  %v3473_v56 = vmul.f32 %v3409_v57, %v5746_v18 }
 0x12d   : > { %v1076_v43 = vsel %vm1075_vm6, %v5042_v28, %v1072_v42  ;;  %v1096_v53 = vadd.f32 1.1283791, %v1095_v61  ;;  %v1181_v3 = vadd.f32 0.014752088, %v1180_v54  ;;  %v1117_v63 = vand.u32 2147483647, %v5824_v0 }
 0x12e   : > { %v1081_v21 = vsel %vm1078_vm7, %v1080_v7, %v1076_v43  ;;  %v1134_v23 = vadd.f32 0.18741608, %v1133_v51  ;;  %v1145_v34 = vadd.f32 0.4994258, %v1144_v14  ;;  %v1172_v25 = vadd.f32 0.05243302, %v1171_v9 }
 0x12f   : > { %v1082_v8 = vmul.f32 %v1081_v21, %v1057_v2  ;;  %v1182_v55 = vmul.f32 %v1181_v3, %v5802_v24  ;;  %v1207_v26 = vmul.f32 2.1237322e-06, %v5831_v11  ;;  %v1218_v12 = vmul.f32 3.8918573e-05, %v5831_v11  ;;  %v4939_v3 = vld [vmem:[#allocation9 + $0xd8] sm:$0xff] }
 0x130   : > { %v1119_v38 = vand.u32 2147483648, %v5824_v0  ;;  %v1146_v18 = vmul.f32 %v1145_v34, %v5784_v62  ;;  %v1173_v29 = vmul.f32 %v1172_v25, %v5802_v24  ;;  %v1097_v33 = vmul.f32 %v1096_v53, %v5726_v19  ;;  %v4915_v19 = vld [vmem:[#allocation9 + $0x18] sm:$0xff]  ;;  %4200 = vmatpush.bf16.msrb.mxu3 %v4939_v3 }
 0x131   : > { %v4527_v28 = vclamps-f32 %v1082_v8, 1.0  ;;  %v5044_v31 = vpop.eup %5043  ;;  %v1183_v48 = vadd.f32 0.112945676, %v1182_v55  ;;  %v1208_v41 = vadd.f32 0.00028619796, %v1207_v26  ;;  %v1135_v17 = vmul.f32 %v1134_v23, %v5784_v62  ;;  %4053 = vmatpush.bf16.msrb.mxu0 %v4915_v19  ;;  %v4931_v53 = vld [vmem:[#allocation9 + $0x98] sm:$0xff] }
 0x132   : > { %v1219_v35 = vadd.f32 0.001143296, %v1218_v12  ;;  %v1109_v39 = vmul.f32 %v5044_v31, %v5824_v0  ;;  %v5848_v45 = vadd.f32 %v633_v27, %v5559_v13  ;;  %v5850_v44 = vadd.f32 1.0, %v1146_v18  ;;  %4151 = vmatpush.bf16.msrb.mxu2 %v4931_v53 }
 0x133   : > { %v3410_v37 = vadd.f32 1.0, %v4527_v28  ;;  %v1174_v47 = vadd.f32 0.18741608, %v1173_v29  ;;  %v1184_v49 = vmul.f32 %v1183_v48, %v5802_v24  ;;  %v1209_v50 = vmul.f32 %v1208_v41, %v5831_v11 }
 0x134   : > { %v1110_v60 = vsub.f32 1.0, %v1109_v39  ;;  %vm5855_vm8 = vcmp.eq.f32.partialorder %v1117_v63, 8.507059e+37  ;;  %v1220_v62 = vmul.f32 %v1219_v35, %v5831_v11  ;;  %vm1114_vm9 = vweird.f32 %v5044_v31 }
 0x135   : > { %v3474_v57 = vmul.f32 %v3410_v37, %v5750_v16  ;;  %v1120_v10 = vor.u32 1.1754944e-38, %v1119_v38  ;;  %5045 = vrcp.f32 %v5850_v44  ;;  %v5862_v20 = vadd.f32 %v682_v46, %v5563_v15 }
 0x136   : > { %v1111_v54 = vmul.f32 %v5044_v31, %v1110_v60  ;;  %v1175_v16 = vmul.f32 %v1174_v47, %v5802_v24  ;;  %v1185_v2 = vadd.f32 0.4994258, %v1184_v49  ;;  %vm1113_vm10 = vweird.f32 %v5824_v0 }
 0x137   : > { %v3535_v1 = vpack.c.bf16 %v3474_v57, %v3473_v56  ;;  %v1136_v42 = vadd.f32 1.1283791, %v1135_v17  ;;  %v1210_v4 = vadd.f32 0.0036580483, %v1209_v50  ;;  %v1221_v7 = vadd.f32 0.014752088, %v1220_v62  ;;  %vm1115_vm11 = vmor %vm1113_vm10, %vm1114_vm9 }
 0x138   : > { %v1112_v43 = vadd.f32 %v5044_v31, %v1111_v54  ;;  %v1157_v51 = vand.u32 2147483647, %v5850_v44  ;;  %v1186_v14 = vmul.f32 %v1185_v2, %v5802_v24  ;;  %v5869_v9 = vmul.f32 0.70710677, %v5848_v45 }
 0x139   : > { %3567 = vst [vmem:[#allocation2 + $0x10] sm:$0xff] %v3535_v1  ;;  %v1159_v56 = vand.u32 2147483648, %v5850_v44  ;;  %v1211_v21 = vmul.f32 %v1210_v4, %v5831_v11  ;;  %v1222_v0 = vmul.f32 %v1221_v7, %v5831_v11  ;;  %v5876_v8 = vmul.f32 0.70710677, %v5862_v20 }
 0x13a   : > { %v1116_v23 = vsel %vm1115_vm11, %v5044_v31, %v1112_v43  ;;  %v1176_v34 = vadd.f32 1.1283791, %v1175_v16  ;;  %v5878_v25 = vadd.f32 1.0, %v1186_v14  ;;  %v1245_v24 = vmul.f32 %v5869_v9, %v5869_v9 }
 0x13b   : > { %v5046_v63 = vpop.eup %5045  ;;  %v1121_v55 = vsel %vm5855_vm8, %v1120_v10, %v1116_v23  ;;  %v1212_v26 = vadd.f32 0.05243302, %v1211_v21  ;;  %v1223_v12 = vadd.f32 0.112945676, %v1222_v0  ;;  %v1285_v27 = vmul.f32 %v5876_v8, %v5876_v8 }
 0x13c   : > { %v723_v28 = vmul.f32 0.5, %v5656_v58  ;;  %v5888_v38 = vmul.f32 0.5, %v5754_v22  ;;  %v1149_v18 = vmul.f32 %v5046_v63, %v5850_v44  ;;  %5047 = vrcp.f32 %v5878_v25 }
 0x13d   : > { %v1122_v29 = vmul.f32 %v1121_v55, %v1097_v33  ;;  %v1137_v31 = vmul.f32 %v1136_v42, %v5765_v30  ;;  %vm1153_vm12 = vweird.f32 %v5850_v44  ;;  %vm5894_vm13 = vcmp.eq.f32.partialorder %v1157_v51, 8.507059e+37  ;;  %v537_v55 = vpop.f32.mrf.mxu0 }
 0x13e   : > { %v1150_v41 = vsub.f32 1.0, %v1149_v18  ;;  %v1213_v35 = vmul.f32 %v1212_v26, %v5831_v11  ;;  %v1224_v58 = vmul.f32 %v1223_v12, %v5831_v11  ;;  %v5900_v22 = vmin.f32 %v1245_v24, 16.0 }
 0x13f   : > { %vm1154_vm14 = vweird.f32 %v5046_v63  ;;  %v1160_v37 = vor.u32 1.1754944e-38, %v1159_v56  ;;  %v1177_v39 = vmul.f32 %v1176_v34, %v5779_v59  ;;  %v5903_v33 = vmin.f32 %v1285_v27, 16.0 }
 0x140   : > { %v1151_v30 = vmul.f32 %v5046_v63, %v1150_v41  ;;  %v1197_v17 = vand.u32 2147483647, %v5878_v25  ;;  %v1225_v46 = vadd.f32 0.4994258, %v1224_v58  ;;  %v1247_v47 = vmul.f32 2.1237322e-06, %v5900_v22  ;;  %vm1155_vm0 = vmor %vm1153_vm12, %vm1154_vm14  ;;  %v586_v41 = vpop.f32.mrf.mxu1 }
 0x141   : > { %v4528_v49 = vclamps-f32 %v1122_v29, 1.0  ;;  %vm1193_vm15 = vweird.f32 %v5878_v25  ;;  %v1258_v50 = vmul.f32 3.8918573e-05, %v5900_v22  ;;  %v1287_v19 = vmul.f32 2.1237322e-06, %v5903_v33 }
 0x142   : > { %v5048_v52 = vpop.eup %5047  ;;  %v1152_v57 = vadd.f32 %v5046_v63, %v1151_v30  ;;  %v1214_v60 = vadd.f32 0.18741608, %v1213_v35  ;;  %v1226_v59 = vmul.f32 %v1225_v46, %v5831_v11  ;;  %v1248_v61 = vadd.f32 0.00028619796, %v1247_v47 }
 0x143   : > { %v1189_v62 = vmul.f32 %v5048_v52, %v5878_v25  ;;  %v1199_v10 = vand.u32 2147483648, %v5878_v25  ;;  %v1259_v1 = vadd.f32 0.001143296, %v1258_v50  ;;  %v1298_v54 = vmul.f32 3.8918573e-05, %v5903_v33 }
 0x144   : > { %v1156_v16 = vsel %vm1155_vm0, %v5046_v63, %v1152_v57  ;;  %v5917_v2 = vadd.f32 1.0, %v1226_v59  ;;  %v1249_v42 = vmul.f32 %v1248_v61, %v5900_v22  ;;  %v1288_v4 = vadd.f32 0.00028619796, %v1287_v19 }
 0x145   : > { %v3411_v7 = vadd.f32 1.0, %v4528_v49  ;;  %v1161_v43 = vsel %vm5894_vm13, %v1160_v37, %v1156_v16  ;;  %v1190_v51 = vsub.f32 1.0, %v1189_v62  ;;  %v1260_v44 = vmul.f32 %v1259_v1, %v5900_v22 }
 0x146   : > { %v1162_v14 = vmul.f32 %v1161_v43, %v1137_v31  ;;  %vm5923_vm1 = vcmp.eq.f32.partialorder %v1197_v17, 8.507059e+37  ;;  %v1215_v21 = vmul.f32 %v1214_v60, %v5831_v11  ;;  %5049 = vrcp.f32 %v5917_v2 }
 0x147   : > { %v1191_v0 = vmul.f32 %v5048_v52, %v1190_v51  ;;  %vm1194_vm2 = vweird.f32 %v5048_v52  ;;  %v1250_v53 = vadd.f32 0.0036580483, %v1249_v42  ;;  %v1261_v3 = vadd.f32 0.014752088, %v1260_v44 }
 0x148   : > { %v4529_v23 = vclamps-f32 %v1162_v14, 1.0  ;;  %v1200_v34 = vor.u32 1.1754944e-38, %v1199_v10  ;;  %v1289_v24 = vmul.f32 %v1288_v4, %v5903_v33  ;;  %v1299_v63 = vadd.f32 0.001143296, %v1298_v54  ;;  %vm1195_vm3 = vmor %vm1193_vm15, %vm1194_vm2 }
 0x149   : > { %v3475_v26 = vmul.f32 %v3411_v7, %v723_v28  ;;  %v1192_v12 = vadd.f32 %v5048_v52, %v1191_v0  ;;  %v1251_v27 = vmul.f32 %v1250_v53, %v5900_v22  ;;  %v1262_v18 = vmul.f32 %v1261_v3, %v5900_v22 }
 0x14a   : > { %v3412_v29 = vadd.f32 1.0, %v4529_v23  ;;  %v1216_v11 = vadd.f32 1.1283791, %v1215_v21  ;;  %v1290_v31 = vadd.f32 0.0036580483, %v1289_v24  ;;  %v1300_v48 = vmul.f32 %v1299_v63, %v5903_v33 }
 0x14b   : > { %v1196_v35 = vsel %vm1195_vm3, %v5048_v52, %v1192_v12  ;;  %v1252_v58 = vadd.f32 0.05243302, %v1251_v27  ;;  %v1263_v37 = vadd.f32 0.112945676, %v1262_v18  ;;  %v5936_v30 = vadd.f32 %v537_v55, %v5543_v5 }
 0x14c   : > { %v5050_v28 = vpop.eup %5049  ;;  %v3476_v17 = vmul.f32 %v3412_v29, %v5888_v38  ;;  %v1201_v46 = vsel %vm5923_vm1, %v1200_v34, %v1196_v35  ;;  %v1291_v25 = vmul.f32 %v1290_v31, %v5903_v33  ;;  %v1301_v47 = vadd.f32 0.014752088, %v1300_v48  ;;  %v635_v35 = vpop.f32.mrf.mxu2 }
 0x14d   : > { %v1202_v49 = vmul.f32 %v1201_v46, %v1177_v39  ;;  %v1229_v50 = vmul.f32 %v5050_v28, %v5917_v2  ;;  %v1253_v19 = vmul.f32 %v1252_v58, %v5900_v22  ;;  %v5945_v52 = vadd.f32 %v586_v41, %v5545_v6 }
 0x14e   : > { %v3536_v57 = vpack.c.bf16 %v3476_v17, %v3475_v26  ;;  %v1264_v60 = vmul.f32 %v1263_v37, %v5900_v22  ;;  %v1292_v59 = vadd.f32 0.05243302, %v1291_v25  ;;  %v1302_v38 = vmul.f32 %v1301_v47, %v5903_v33 }
 0x14f   : > { %v1217_v61 = vmul.f32 %v1216_v11, %v5813_v32  ;;  %v1230_v62 = vsub.f32 1.0, %v1229_v50  ;;  %v1237_v10 = vand.u32 2147483647, %v5917_v2  ;;  %v1254_v1 = vadd.f32 0.18741608, %v1253_v19  ;;  %v684_v50 = vpop.f32.mrf.mxu3 }
 0x150   : > { %3568 = vst [vmem:[#allocation2 + $0x18] sm:$0xff] %v3536_v57  ;;  %v1239_v39 = vand.u32 2147483648, %v5917_v2  ;;  %v1265_v54 = vadd.f32 0.4994258, %v1264_v60  ;;  %v1293_v16 = vmul.f32 %v1292_v59, %v5903_v33  ;;  %v1303_v42 = vadd.f32 0.112945676, %v1302_v38 }
 0x151   : > { %v4530_v4 = vclamps-f32 %v1202_v49, 1.0  ;;  %v1231_v7 = vmul.f32 %v5050_v28, %v1230_v62  ;;  %vm1234_vm4 = vweird.f32 %v5050_v28  ;;  %v5954_v43 = vmul.f32 0.70710677, %v5936_v30 }
 0x152   : > { %v1266_v51 = vmul.f32 %v1265_v54, %v5900_v22  ;;  %v1294_v32 = vadd.f32 0.18741608, %v1293_v16  ;;  %v1304_v44 = vmul.f32 %v1303_v42, %v5903_v33  ;;  %v5959_v14 = vmul.f32 0.70710677, %v5945_v52 }
 0x153   : > { %v1232_v56 = vadd.f32 %v5050_v28, %v1231_v7  ;;  %vm1233_vm5 = vweird.f32 %v5917_v2  ;;  %v1255_v21 = vmul.f32 %v1254_v1, %v5900_v22  ;;  %v1325_v0 = vmul.f32 %v5954_v43, %v5954_v43 }
 0x154   : > { %vm1235_vm6 = vmor %vm1233_vm5, %vm1234_vm4  ;;  %v1240_v53 = vor.u32 1.1754944e-38, %v1239_v39  ;;  %v5965_v3 = vadd.f32 1.0, %v1266_v51  ;;  %v1305_v23 = vadd.f32 0.4994258, %v1304_v44  ;;  %v1365_v34 = vmul.f32 %v5959_v14, %v5959_v14 }
 0x155   : > { %v1236_v24 = vsel %vm1235_vm6, %v5050_v28, %v1232_v56  ;;  %vm1238_vm7 = vcmp.eq.f32.partialorder %v1237_v10, 8.507059e+37  ;;  %v1295_v63 = vmul.f32 %v1294_v32, %v5903_v33  ;;  %v5970_v55 = vmin.f32 %v1325_v0, 16.0 }
 0x156   : > { %v725_v2 = vmul.f32 0.5, %v5769_v36  ;;  %v3413_v22 = vadd.f32 1.0, %v4530_v4  ;;  %v1241_v26 = vsel %vm1238_vm7, %v1240_v53, %v1236_v24  ;;  %5051 = vrcp.f32 %v5965_v3 }
 0x157   : > { %v1242_v12 = vmul.f32 %v1241_v26, %v1217_v61  ;;  %v1256_v27 = vadd.f32 1.1283791, %v1255_v21  ;;  %v1277_v18 = vand.u32 2147483647, %v5965_v3  ;;  %v1306_v29 = vmul.f32 %v1305_v23, %v5903_v33 }
 0x158   : > { %v726_v11 = vmul.f32 0.5, %v5799_v40  ;;  %v1327_v31 = vmul.f32 2.1237322e-06, %v5970_v55  ;;  %v1338_v48 = vmul.f32 3.8918573e-05, %v5970_v55  ;;  %v5979_v41 = vmin.f32 %v1365_v34, 16.0 }
 0x159   : > { %v4531_v36 = vclamps-f32 %v1242_v12, 1.0  ;;  %v1279_v58 = vand.u32 2147483648, %v5965_v3  ;;  %v1296_v37 = vadd.f32 1.1283791, %v1295_v63  ;;  %v5982_v28 = vadd.f32 1.0, %v1306_v29 }
 0x15a   : > { %v3477_v17 = vmul.f32 %v3413_v22, %v725_v2  ;;  %v1328_v46 = vadd.f32 0.00028619796, %v1327_v31  ;;  %v1339_v25 = vadd.f32 0.001143296, %v1338_v48  ;;  %v1367_v33 = vmul.f32 2.1237322e-06, %v5979_v41 }
 0x15b   : > { %v3414_v47 = vadd.f32 1.0, %v4531_v36  ;;  %v1257_v40 = vmul.f32 %v1256_v27, %v5869_v9  ;;  %5053 = vrcp.f32 %v5982_v28  ;;  %v5988_v49 = vadd.f32 %v635_v35, %v5559_v13 }
 0x15c   : > { %v5052_v19 = vpop.eup %5051  ;;  %vm1273_vm8 = vweird.f32 %v5965_v3  ;;  %v1329_v57 = vmul.f32 %v1328_v46, %v5970_v55  ;;  %v1340_v60 = vmul.f32 %v1339_v25, %v5970_v55  ;;  %v1368_v59 = vadd.f32 0.00028619796, %v1367_v33 }
 0x15d   : > { %v3478_v38 = vmul.f32 %v3414_v47, %v726_v11  ;;  %v1269_v61 = vmul.f32 %v5052_v19, %v5965_v3  ;;  %vm5994_vm9 = vcmp.eq.f32.partialorder %v1277_v18, 8.507059e+37  ;;  %v1280_v9 = vor.u32 1.1754944e-38, %v1279_v58 }
 0x15e   : > { %v1297_v10 = vmul.f32 %v1296_v37, %v5876_v8  ;;  %v1330_v1 = vadd.f32 0.0036580483, %v1329_v57  ;;  %v1341_v39 = vadd.f32 0.014752088, %v1340_v60  ;;  %v1369_v54 = vmul.f32 %v1368_v59, %v5979_v41 }
 0x15f   : > { %v6001_v16 = vadd.f32 %v684_v50, %v5563_v15  ;;  %v3537_v42 = vpack.c.bf16 %v3478_v38, %v3477_v17  ;;  %v1270_v4 = vsub.f32 1.0, %v1269_v61  ;;  %v1317_v7 = vand.u32 2147483647, %v5982_v28 }
 0x160   : > { %v1378_v51 = vmul.f32 3.8918573e-05, %v5979_v41  ;;  %vm1313_vm10 = vweird.f32 %v5982_v28  ;;  %v1331_v32 = vmul.f32 %v1330_v1, %v5970_v55  ;;  %v1342_v44 = vmul.f32 %v1341_v39, %v5970_v55 }
 0x161   : > { %v1370_v8 = vadd.f32 0.0036580483, %v1369_v54  ;;  %v6009_v56 = vmul.f32 0.70710677, %v5988_v49  ;;  %v5054_v21 = vpop.eup %5053  ;;  %3569 = vst [vmem:[#allocation2 + $0x20] sm:$0xff] %v3537_v42  ;;  %v1271_v0 = vmul.f32 %v5052_v19, %v1270_v4  ;;  %vm1274_vm11 = vweird.f32 %v5052_v19 }
 0x162   : > { %v1319_v53 = vand.u32 2147483648, %v5982_v28  ;;  %v1379_v23 = vadd.f32 0.001143296, %v1378_v51  ;;  %v1309_v34 = vmul.f32 %v5054_v21, %v5982_v28  ;;  %v1332_v24 = vadd.f32 0.05243302, %v1331_v32  ;;  %vm1275_vm12 = vmor %vm1273_vm8, %vm1274_vm11 }
 0x163   : > { %v1343_v63 = vadd.f32 0.112945676, %v1342_v44  ;;  %v6014_v2 = vmul.f32 0.70710677, %v6001_v16  ;;  %v1272_v22 = vadd.f32 %v5052_v19, %v1271_v0  ;;  %v1371_v26 = vmul.f32 %v1370_v8, %v5979_v41 }
 0x164   : > { %v1380_v12 = vmul.f32 %v1379_v23, %v5979_v41  ;;  %v1405_v27 = vmul.f32 %v6009_v56, %v6009_v56  ;;  %v1310_v18 = vsub.f32 1.0, %v1309_v34  ;;  %vm1314_vm13 = vweird.f32 %v5054_v21 }
 0x165   : > { %v1333_v29 = vmul.f32 %v1332_v24, %v5970_v55  ;;  %v1344_v11 = vmul.f32 %v1343_v63, %v5970_v55  ;;  %v1276_v31 = vsel %vm1275_vm12, %v5052_v19, %v1272_v22  ;;  %v1372_v48 = vadd.f32 0.05243302, %v1371_v26  ;;  %vm1315_vm15 = vmor %vm1313_vm10, %vm1314_vm13 }
 0x166   : > { %v1381_v35 = vadd.f32 0.014752088, %v1380_v12  ;;  %v6024_v36 = vmin.f32 %v1405_v27, 16.0  ;;  %v1281_v58 = vsel %vm5994_vm9, %v1280_v9, %v1276_v31  ;;  %v1311_v37 = vmul.f32 %v5054_v21, %v1310_v18 }
 0x167   : > { %v1334_v17 = vadd.f32 0.18741608, %v1333_v29  ;;  %v1345_v46 = vadd.f32 0.4994258, %v1344_v11  ;;  %v1282_v25 = vmul.f32 %v1281_v58, %v1257_v40  ;;  %v1445_v47 = vmul.f32 %v6014_v2, %v6014_v2  ;;  %v589_v58 = vpop.f32.mrf.mxu1 }
 0x168   : > { %v1382_v3 = vmul.f32 %v1381_v35, %v5979_v41  ;;  %v1407_v33 = vmul.f32 2.1237322e-06, %v6024_v36  ;;  %v1312_v50 = vadd.f32 %v5054_v21, %v1311_v37  ;;  %vm1318_vm14 = vcmp.eq.f32.partialorder %v1317_v7, 8.507059e+37 }
 0x169   : > { %v1320_v19 = vor.u32 1.1754944e-38, %v1319_v53  ;;  %v1346_v57 = vmul.f32 %v1345_v46, %v5970_v55  ;;  %v4532_v60 = vclamps-f32 %v1282_v25, 1.0  ;;  %v1335_v59 = vmul.f32 %v1334_v17, %v5970_v55 }
 0x16a   : > { %v1373_v40 = vmul.f32 %v1372_v48, %v5979_v41  ;;  %v1383_v38 = vadd.f32 0.112945676, %v1382_v3  ;;  %v1316_v61 = vsel %vm1315_vm15, %v5054_v21, %v1312_v50  ;;  %v1408_v9 = vadd.f32 0.00028619796, %v1407_v33 }
 0x16b   : > { %v6038_v62 = vadd.f32 1.0, %v1346_v57  ;;  %v1418_v1 = vmul.f32 3.8918573e-05, %v6024_v36  ;;  %v3415_v39 = vadd.f32 1.0, %v4532_v60  ;;  %v1321_v54 = vsel %vm1318_vm14, %v1320_v19, %v1316_v61 }
 0x16c   : > { %v1384_v42 = vmul.f32 %v1383_v38, %v5979_v41  ;;  %v6042_v4 = vmin.f32 %v1445_v47, 16.0  ;;  %v1322_v7 = vmul.f32 %v1321_v54, %v1297_v10  ;;  %v727_v55 = vmul.f32 0.5, %v5848_v45 }
 0x16d   : > { %5055 = vrcp.f32 %v6038_v62  ;;  %v728_v28 = vmul.f32 0.5, %v5862_v20  ;;  %v1336_v51 = vadd.f32 1.1283791, %v1335_v59  ;;  %v1374_v32 = vadd.f32 0.18741608, %v1373_v40 }
 0x16e   : > { %v4533_v44 = vclamps-f32 %v1322_v7, 1.0  ;;  %v1385_v8 = vadd.f32 0.4994258, %v1384_v42  ;;  %v1409_v21 = vmul.f32 %v1408_v9, %v6024_v36  ;;  %v1419_v0 = vadd.f32 0.001143296, %v1418_v1 }
 0x16f   : > { %v3479_v53 = vmul.f32 %v3415_v39, %v727_v55  ;;  %v6049_v23 = vmul.f32 0.5, %v5936_v30  ;;  %v6052_v34 = vmul.f32 0.5, %v5945_v52  ;;  %v1447_v10 = vmul.f32 2.1237322e-06, %v6042_v4  ;;  %v540_v30 = vpop.f32.mrf.mxu0 }
 0x170   : > { %v3416_v24 = vadd.f32 1.0, %v4533_v44  ;;  %v1386_v45 = vmul.f32 %v1385_v8, %v5979_v41  ;;  %v1410_v20 = vadd.f32 0.0036580483, %v1409_v21  ;;  %v1420_v63 = vmul.f32 %v1419_v0, %v6024_v36 }
 0x171   : > { %v1337_v22 = vmul.f32 %v1336_v51, %v5954_v43  ;;  %v1375_v26 = vmul.f32 %v1374_v32, %v5979_v41  ;;  %v1448_v12 = vadd.f32 0.00028619796, %v1447_v10  ;;  %v1458_v27 = vmul.f32 3.8918573e-05, %v6042_v4 }
 0x172   : > { %v3480_v29 = vmul.f32 %v3416_v24, %v728_v28  ;;  %v6060_v52 = vadd.f32 1.0, %v1386_v45  ;;  %v1411_v11 = vmul.f32 %v1410_v20, %v6024_v36  ;;  %v1421_v31 = vadd.f32 0.014752088, %v1420_v63 }
 0x173   : > { %v5056_v18 = vpop.eup %5055  ;;  %vm1353_vm0 = vweird.f32 %v6038_v62  ;;  %v1449_v35 = vmul.f32 %v1448_v12, %v6042_v4  ;;  %v1459_v43 = vadd.f32 0.001143296, %v1458_v27  ;;  %v1357_v37 = vand.u32 2147483647, %v6038_v62  ;;  %v4914_v27 = vld [vmem:[#allocation9 + $0x10] sm:$0xff] }
 0x174   : > { %v1349_v48 = vmul.f32 %v5056_v18, %v6038_v62  ;;  %v3538_v41 = vpack.c.bf16 %v3480_v29, %v3479_v53  ;;  %5057 = vrcp.f32 %v6060_v52  ;;  %v6069_v17 = vadd.f32 %v540_v30, %v5543_v5  ;;  %v4922_v30 = vld [vmem:[#allocation9 + $0x50] sm:$0xff]  ;;  %4054 = vmatpush.bf16.msrb.mxu0 %v4914_v27 }
 0x175   : > { %v1359_v25 = vand.u32 2147483648, %v6038_v62  ;;  %v1412_v3 = vadd.f32 0.05243302, %v1411_v11  ;;  %v1422_v33 = vmul.f32 %v1421_v31, %v6024_v36  ;;  %v1376_v47 = vadd.f32 1.1283791, %v1375_v26  ;;  %4103 = vmatpush.bf16.msrb.mxu1 %v4922_v30 }
 0x176   : > { %v1350_v46 = vsub.f32 1.0, %v1349_v48  ;;  %3570 = vst [vmem:[#allocation2 + $0x28] sm:$0xff] %v3538_v41  ;;  %v1450_v50 = vadd.f32 0.0036580483, %v1449_v35  ;;  %v1460_v19 = vmul.f32 %v1459_v43, %v6042_v4  ;;  %v6075_v57 = vadd.f32 %v589_v58, %v5545_v6  ;;  %v638_v58 = vpop.f32.mrf.mxu2 }
 0x177   : > { %vm1354_vm1 = vweird.f32 %v5056_v18  ;;  %v1413_v59 = vmul.f32 %v1412_v3, %v6024_v36  ;;  %v1423_v40 = vadd.f32 0.112945676, %v1422_v33  ;;  %vm6078_vm2 = vcmp.eq.f32.partialorder %v1357_v37, 8.507059e+37 }
 0x178   : > { %v1351_v60 = vmul.f32 %v5056_v18, %v1350_v46  ;;  %v1451_v61 = vmul.f32 %v1450_v50, %v6042_v4  ;;  %v1461_v9 = vadd.f32 0.014752088, %v1460_v19  ;;  %v6084_v1 = vmul.f32 0.70710677, %v6069_v17  ;;  %vm1355_vm3 = vmor %vm1353_vm0, %vm1354_vm1  ;;  %v4930_v19 = vld [vmem:[#allocation9 + $0x90] sm:$0xff] }
 0x179   : > { %v1360_v54 = vor.u32 1.1754944e-38, %v1359_v25  ;;  %v1414_v42 = vadd.f32 0.18741608, %v1413_v59  ;;  %v1424_v7 = vmul.f32 %v1423_v40, %v6024_v36  ;;  %v6093_v44 = vmul.f32 0.70710677, %v6075_v57  ;;  %4152 = vmatpush.bf16.msrb.mxu2 %v4930_v19 }
 0x17a   : > { %v1352_v39 = vadd.f32 %v5056_v18, %v1351_v60  ;;  %v5058_v55 = vpop.eup %5057  ;;  %v1452_v28 = vadd.f32 0.05243302, %v1451_v61  ;;  %v1462_v51 = vmul.f32 %v1461_v9, %v6042_v4  ;;  %v1485_v32 = vmul.f32 %v6084_v1, %v6084_v1  ;;  %v4938_v60 = vld [vmem:[#allocation9 + $0xd0] sm:$0xff] }
 0x17b   : > { %v1377_v21 = vmul.f32 %v1376_v47, %v5959_v14  ;;  %v1389_v0 = vmul.f32 %v5058_v55, %v6060_v52  ;;  %v1399_v53 = vand.u32 2147483648, %v6060_v52  ;;  %v1425_v10 = vadd.f32 0.4994258, %v1424_v7  ;;  %4201 = vmatpush.bf16.msrb.mxu3 %v4938_v60 }
 0x17c   : > { %v1356_v8 = vsel %vm1355_vm3, %v5056_v18, %v1352_v39  ;;  %v1453_v24 = vmul.f32 %v1452_v28, %v6042_v4  ;;  %v1463_v45 = vadd.f32 0.112945676, %v1462_v51  ;;  %v1415_v26 = vmul.f32 %v1414_v42, %v6024_v36 }
 0x17d   : > { %v1361_v62 = vsel %vm6078_vm2, %v1360_v54, %v1356_v8  ;;  %v1390_v63 = vsub.f32 1.0, %v1389_v0  ;;  %v6102_v12 = vmin.f32 %v1485_v32, 16.0  ;;  %v1426_v14 = vmul.f32 %v1425_v10, %v6024_v36 }
 0x17e   : > { %v1362_v20 = vmul.f32 %v1361_v62, %v1337_v22  ;;  %v1454_v18 = vadd.f32 0.18741608, %v1453_v24  ;;  %v1464_v29 = vmul.f32 %v1463_v45, %v6042_v4  ;;  %v1525_v11 = vmul.f32 %v6093_v44, %v6093_v44 }
 0x17f   : > { %v1391_v31 = vmul.f32 %v5058_v55, %v1390_v63  ;;  %vm1394_vm4 = vweird.f32 %v5058_v55  ;;  %v1397_v48 = vand.u32 2147483647, %v6060_v52  ;;  %v1487_v22 = vmul.f32 2.1237322e-06, %v6102_v12 }
 0x180   : > { %v4534_v35 = vclamps-f32 %v1362_v20, 1.0  ;;  %vm1393_vm5 = vweird.f32 %v6060_v52  ;;  %v6111_v43 = vadd.f32 1.0, %v1426_v14  ;;  %v1465_v36 = vadd.f32 0.4994258, %v1464_v29 }
 0x181   : > { %v1392_v41 = vadd.f32 %v5058_v55, %v1391_v31  ;;  %v1400_v37 = vor.u32 1.1754944e-38, %v1399_v53  ;;  %v1488_v46 = vadd.f32 0.00028619796, %v1487_v22  ;;  %v1498_v25 = vmul.f32 3.8918573e-05, %v6102_v12  ;;  %vm1395_vm6 = vmor %vm1393_vm5, %vm1394_vm4 }
 0x182   : > { %v1416_v3 = vadd.f32 1.1283791, %v1415_v26  ;;  %5059 = vrcp.f32 %v6111_v43  ;;  %v1455_v33 = vmul.f32 %v1454_v18, %v6042_v4  ;;  %v6116_v47 = vmin.f32 %v1525_v11, 16.0 }
 0x183   : > { %v1396_v50 = vsel %vm1395_vm6, %v5058_v55, %v1392_v41  ;;  %vm1398_vm7 = vcmp.eq.f32.partialorder %v1397_v48, 8.507059e+37  ;;  %v1466_v52 = vmul.f32 %v1465_v36, %v6042_v4  ;;  %v6120_v59 = vadd.f32 %v638_v58, %v5559_v13 }
 0x184   : > { %v3417_v40 = vadd.f32 1.0, %v4534_v35  ;;  %v1401_v38 = vsel %vm1398_vm7, %v1400_v37, %v1396_v50  ;;  %v1437_v61 = vand.u32 2147483647, %v6111_v43  ;;  %v1489_v9 = vmul.f32 %v1488_v46, %v6102_v12 }
 0x185   : > { %v1402_v39 = vmul.f32 %v1401_v38, %v1377_v21  ;;  %v1439_v54 = vand.u32 2147483648, %v6111_v43  ;;  %v6125_v42 = vadd.f32 1.0, %v1466_v52  ;;  %v1499_v7 = vadd.f32 0.001143296, %v1498_v25 }
 0x186   : > { %v1417_v4 = vmul.f32 %v1416_v3, %v6009_v56  ;;  %v1456_v55 = vadd.f32 1.1283791, %v1455_v33  ;;  %v1490_v28 = vadd.f32 0.0036580483, %v1489_v9  ;;  %v1527_v51 = vmul.f32 2.1237322e-06, %v6116_v47  ;;  %v687_v56 = vpop.f32.mrf.mxu3 }
 0x187   : > { %v4535_v32 = vclamps-f32 %v1402_v39, 1.0  ;;  %vm1433_vm8 = vweird.f32 %v6111_v43  ;;  %5061 = vrcp.f32 %v6125_v42  ;;  %v1538_v8 = vmul.f32 3.8918573e-05, %v6116_v47 }
 0x188   : > { %v5060_v21 = vpop.eup %5059  ;;  %v3481_v0 = vmul.f32 %v3417_v40, %v6049_v23  ;;  %v1491_v53 = vmul.f32 %v1490_v28, %v6102_v12  ;;  %v1500_v62 = vmul.f32 %v1499_v7, %v6102_v12  ;;  %v1528_v10 = vadd.f32 0.00028619796, %v1527_v51 }
 0x189   : > { %v3418_v24 = vadd.f32 1.0, %v4535_v32  ;;  %v1429_v45 = vmul.f32 %v5060_v21, %v6111_v43  ;;  %vm6136_vm9 = vcmp.eq.f32.partialorder %v1437_v61, 8.507059e+37  ;;  %v1440_v63 = vor.u32 1.1754944e-38, %v1439_v54 }
 0x18a   : > { %v6141_v26 = vmul.f32 %v1456_v55, %v6014_v2  ;;  %v1492_v27 = vadd.f32 0.05243302, %v1491_v53  ;;  %v1501_v30 = vadd.f32 0.014752088, %v1500_v62  ;;  %v1529_v23 = vmul.f32 %v1528_v10, %v6116_v47 }
 0x18b   : > { %v3482_v14 = vmul.f32 %v3418_v24, %v6052_v34  ;;  %v1430_v18 = vsub.f32 1.0, %v1429_v45  ;;  %v1539_v29 = vadd.f32 0.001143296, %v1538_v8  ;;  %v6146_v11 = vadd.f32 %v687_v56, %v5563_v15 }
 0x18c   : > { %vm1473_vm10 = vweird.f32 %v6125_v42  ;;  %v1493_v31 = vmul.f32 %v1492_v27, %v6102_v12  ;;  %v1502_v48 = vmul.f32 %v1501_v30, %v6102_v12  ;;  %v1530_v22 = vadd.f32 0.0036580483, %v1529_v23 }
 0x18d   : > { %v6152_v2 = vmul.f32 0.70710677, %v6120_v59  ;;  %v5062_v35 = vpop.eup %5061  ;;  %v3539_v36 = vpack.c.bf16 %v3482_v14, %v3481_v0  ;;  %v1431_v58 = vmul.f32 %v5060_v21, %v1430_v18  ;;  %vm1434_vm11 = vweird.f32 %v5060_v21 }
 0x18e   : > { %v1540_v34 = vmul.f32 %v1539_v29, %v6116_v47  ;;  %v1469_v41 = vmul.f32 %v5062_v35, %v6125_v42  ;;  %v1477_v37 = vand.u32 2147483647, %v6125_v42  ;;  %v1479_v46 = vand.u32 2147483648, %v6125_v42  ;;  %vm1435_vm12 = vmor %vm1433_vm8, %vm1434_vm11 }
 0x18f   : > { %v1503_v25 = vadd.f32 0.112945676, %v1502_v48  ;;  %3571 = vst [vmem:[#allocation2 + $0x30] sm:$0xff] %v3539_v36  ;;  %v1432_v3 = vadd.f32 %v5060_v21, %v1431_v58  ;;  %v1531_v33 = vmul.f32 %v1530_v22, %v6116_v47  ;;  %v1565_v52 = vmul.f32 %v6152_v2, %v6152_v2 }
 0x190   : > { %v1541_v50 = vadd.f32 0.014752088, %v1540_v34  ;;  %v1470_v19 = vsub.f32 1.0, %v1469_v41  ;;  %vm1474_vm13 = vweird.f32 %v5062_v35  ;;  %v1494_v60 = vadd.f32 0.18741608, %v1493_v31 }
 0x191   : > { %v1504_v40 = vmul.f32 %v1503_v25, %v6102_v12  ;;  %v1436_v38 = vsel %vm1435_vm12, %v5060_v21, %v1432_v3  ;;  %v1532_v61 = vadd.f32 0.05243302, %v1531_v33  ;;  %v6165_v39 = vmin.f32 %v1565_v52, 16.0  ;;  %vm1475_vm15 = vmor %vm1473_vm10, %vm1474_vm13 }
 0x192   : > { %v1542_v9 = vmul.f32 %v1541_v50, %v6116_v47  ;;  %v1441_v54 = vsel %vm6136_vm9, %v1440_v63, %v1436_v38  ;;  %v1471_v7 = vmul.f32 %v5062_v35, %v1470_v19  ;;  %v6170_v28 = vmul.f32 0.70710677, %v6146_v11 }
 0x193   : > { %v1505_v55 = vadd.f32 0.4994258, %v1504_v40  ;;  %v1442_v43 = vmul.f32 %v1441_v54, %v1417_v4  ;;  %v1533_v51 = vmul.f32 %v1532_v61, %v6116_v47  ;;  %v1567_v8 = vmul.f32 2.1237322e-06, %v6165_v39 }
 0x194   : > { %v1543_v32 = vadd.f32 0.112945676, %v1542_v9  ;;  %v1472_v21 = vadd.f32 %v5062_v35, %v1471_v7  ;;  %vm1478_vm14 = vcmp.eq.f32.partialorder %v1477_v37, 8.507059e+37  ;;  %v1578_v53 = vmul.f32 3.8918573e-05, %v6165_v39 }
 0x195   : > { %v1506_v0 = vmul.f32 %v1505_v55, %v6102_v12  ;;  %v4536_v62 = vclamps-f32 %v1442_v43, 1.0  ;;  %v1480_v10 = vor.u32 1.1754944e-38, %v1479_v46  ;;  %v1534_v56 = vadd.f32 0.18741608, %v1533_v51 }
 0x196   : > { %v1544_v4 = vmul.f32 %v1543_v32, %v6116_v47  ;;  %v1476_v24 = vsel %vm1475_vm15, %v5062_v35, %v1472_v21  ;;  %v1568_v20 = vadd.f32 0.00028619796, %v1567_v8  ;;  %v1579_v63 = vadd.f32 0.001143296, %v1578_v53 }
 0x197   : > { %v6180_v45 = vadd.f32 1.0, %v1506_v0  ;;  %v1481_v27 = vsel %vm1478_vm14, %v1480_v10, %v1476_v24  ;;  %v1495_v30 = vmul.f32 %v1494_v60, %v6102_v12  ;;  %v1605_v14 = vmul.f32 %v6170_v28, %v6170_v28 }
 0x198   : > { %v1545_v23 = vadd.f32 0.4994258, %v1544_v4  ;;  %v731_v18 = vmul.f32 0.5, %v5988_v49  ;;  %v3419_v42 = vadd.f32 1.0, %v4536_v62  ;;  %v1482_v29 = vmul.f32 %v1481_v27, %v6141_v26  ;;  %v542_v26 = vpop.f32.mrf.mxu0 }
 0x199   : > { %5063 = vrcp.f32 %v6180_v45  ;;  %v732_v31 = vmul.f32 0.5, %v6001_v16  ;;  %v6190_v48 = vmul.f32 0.5, %v6069_v17  ;;  %v1535_v22 = vmul.f32 %v1534_v56, %v6116_v47 }
 0x19a   : > { %v1546_v12 = vmul.f32 %v1545_v23, %v6116_v47  ;;  %v4537_v35 = vclamps-f32 %v1482_v29, 1.0  ;;  %v6195_v36 = vmul.f32 0.5, %v6075_v57  ;;  %v1569_v49 = vmul.f32 %v1568_v20, %v6165_v39 }
 0x19b   : > { %v1580_v58 = vmul.f32 %v1579_v63, %v6165_v39  ;;  %v1496_v34 = vadd.f32 1.1283791, %v1495_v30  ;;  %v1517_v41 = vand.u32 2147483647, %v6180_v45  ;;  %v6202_v17 = vmin.f32 %v1605_v14, 16.0 }
 0x19c   : > { %v6200_v16 = vadd.f32 1.0, %v1546_v12  ;;  %v3483_v37 = vmul.f32 %v3419_v42, %v731_v18  ;;  %v3420_v46 = vadd.f32 1.0, %v4537_v35  ;;  %v1570_v25 = vadd.f32 0.0036580483, %v1569_v49 }
 0x19d   : > { %v1581_v47 = vadd.f32 0.014752088, %v1580_v58  ;;  %v1519_v3 = vand.u32 2147483648, %v6180_v45  ;;  %v1536_v57 = vadd.f32 1.1283791, %v1535_v22  ;;  %v6207_v33 = vadd.f32 %v542_v26, %v5543_v5  ;;  %v591_v26 = vpop.f32.mrf.mxu1 }
 0x19e   : > { %5065 = vrcp.f32 %v6200_v16  ;;  %v3484_v52 = vmul.f32 %v3420_v46, %v732_v31  ;;  %v1571_v19 = vmul.f32 %v1570_v25, %v6165_v39  ;;  %v1607_v40 = vmul.f32 2.1237322e-06, %v6202_v17 }
 0x19f   : > { %v5064_v50 = vpop.eup %5063  ;;  %v1582_v60 = vmul.f32 %v1581_v47, %v6165_v39  ;;  %v1497_v38 = vmul.f32 %v1496_v34, %v6084_v1  ;;  %vm1513_vm0 = vweird.f32 %v6180_v45  ;;  %v6216_v9 = vmul.f32 0.5, %v6120_v59 }
 0x1a0   : > { %v1509_v61 = vmul.f32 %v5064_v50, %v6180_v45  ;;  %v3540_v54 = vpack.c.bf16 %v3484_v52, %v3483_v37  ;;  %vm6218_vm1 = vcmp.eq.f32.partialorder %v1517_v41, 8.507059e+37  ;;  %v1608_v43 = vadd.f32 0.00028619796, %v1607_v40 }
 0x1a1   : > { %v1583_v55 = vadd.f32 0.112945676, %v1582_v60  ;;  %v1520_v32 = vor.u32 1.1754944e-38, %v1519_v3  ;;  %v1618_v8 = vmul.f32 3.8918573e-05, %v6202_v17  ;;  %v1537_v21 = vmul.f32 %v1536_v57, %v6093_v44  ;;  %v640_v3 = vpop.f32.mrf.mxu2 }
 0x1a2   : > { %v1510_v51 = vsub.f32 1.0, %v1509_v61  ;;  %v6224_v1 = vmul.f32 0.70710677, %v6207_v33  ;;  %3572 = vst [vmem:[#allocation2 + $0x38] sm:$0xff] %v3540_v54  ;;  %v1572_v0 = vadd.f32 0.05243302, %v1571_v19  ;;  %v1609_v53 = vmul.f32 %v1608_v43, %v6202_v17 }
 0x1a3   : > { %v1584_v59 = vmul.f32 %v1583_v55, %v6165_v39  ;;  %vm1514_vm2 = vweird.f32 %v5064_v50  ;;  %v1619_v56 = vadd.f32 0.001143296, %v1618_v8  ;;  %vm1553_vm3 = vweird.f32 %v6200_v16 }
 0x1a4   : > { %v5066_v62 = vpop.eup %5065  ;;  %v1511_v10 = vmul.f32 %v5064_v50, %v1510_v51  ;;  %v1645_v4 = vmul.f32 %v6224_v1, %v6224_v1  ;;  %v1557_v20 = vand.u32 2147483647, %v6200_v16  ;;  %v1610_v27 = vadd.f32 0.0036580483, %v1609_v53  ;;  %vm1515_vm4 = vmor %vm1513_vm0, %vm1514_vm2 }
 0x1a5   : > { %v1549_v24 = vmul.f32 %v5066_v62, %v6200_v16  ;;  %v1585_v63 = vadd.f32 0.4994258, %v1584_v59  ;;  %v1620_v30 = vmul.f32 %v1619_v56, %v6202_v17  ;;  %v1559_v18 = vand.u32 2147483648, %v6200_v16 }
 0x1a6   : > { %v1512_v44 = vadd.f32 %v5064_v50, %v1511_v10  ;;  %v6235_v23 = vmin.f32 %v1645_v4, 16.0  ;;  %v1573_v42 = vmul.f32 %v1572_v0, %v6165_v39  ;;  %v1611_v22 = vmul.f32 %v1610_v27, %v6202_v17 }
 0x1a7   : > { %v1550_v14 = vsub.f32 1.0, %v1549_v24  ;;  %v1586_v29 = vmul.f32 %v1585_v63, %v6165_v39  ;;  %v1621_v12 = vadd.f32 0.014752088, %v1620_v30  ;;  %vm1554_vm5 = vweird.f32 %v5066_v62 }
 0x1a8   : > { %v1516_v31 = vsel %vm1515_vm4, %v5064_v50, %v1512_v44  ;;  %v1647_v35 = vmul.f32 2.1237322e-06, %v6235_v23  ;;  %v1612_v41 = vadd.f32 0.05243302, %v1611_v22  ;;  %vm1558_vm6 = vcmp.eq.f32.partialorder %v1557_v20, 8.507059e+37  ;;  %vm1555_vm7 = vmor %vm1553_vm3, %vm1554_vm5 }
 0x1a9   : > { %v1521_v49 = vsel %vm6218_vm1, %v1520_v32, %v1516_v31  ;;  %v1551_v58 = vmul.f32 %v5066_v62, %v1550_v14  ;;  %v6246_v45 = vadd.f32 1.0, %v1586_v29  ;;  %v1622_v37 = vmul.f32 %v1621_v12, %v6202_v17 }
 0x1aa   : > { %v1522_v34 = vmul.f32 %v1521_v49, %v1497_v38  ;;  %v1648_v46 = vadd.f32 0.00028619796, %v1647_v35  ;;  %v1560_v47 = vor.u32 1.1754944e-38, %v1559_v18  ;;  %v1574_v50 = vadd.f32 0.18741608, %v1573_v42 }
 0x1ab   : > { %v1552_v25 = vadd.f32 %v5066_v62, %v1551_v58  ;;  %5067 = vrcp.f32 %v6246_v45  ;;  %v1613_v52 = vmul.f32 %v1612_v41, %v6202_v17  ;;  %v6254_v19 = vadd.f32 %v591_v26, %v5545_v6 }
 0x1ac   : > { %v4538_v57 = vclamps-f32 %v1522_v34, 1.0  ;;  %v1623_v40 = vadd.f32 0.112945676, %v1622_v37  ;;  %v1649_v38 = vmul.f32 %v1648_v46, %v6235_v23  ;;  %v1658_v61 = vmul.f32 3.8918573e-05, %v6235_v23 }
 0x1ad   : > { %v1556_v60 = vsel %vm1555_vm7, %v5066_v62, %v1552_v25  ;;  %v6259_v55 = vmul.f32 0.5, %v6146_v11  ;;  %v641_v16 = vadd.f32 %v640_v3, %v5559_v13  ;;  %v1614_v51 = vadd.f32 0.18741608, %v1613_v52 }
 0x1ae   : > { %v3421_v54 = vadd.f32 1.0, %v4538_v57  ;;  %v1561_v7 = vsel %vm1558_vm6, %v1560_v47, %v1556_v60  ;;  %v1624_v32 = vmul.f32 %v1623_v40, %v6202_v17  ;;  %v1650_v8 = vadd.f32 0.0036580483, %v1649_v38 }
 0x1af   : > { %v1562_v43 = vmul.f32 %v1561_v7, %v1537_v21  ;;  %v1575_v0 = vmul.f32 %v1574_v50, %v6165_v39  ;;  %v1597_v59 = vand.u32 2147483647, %v6246_v45  ;;  %v1659_v53 = vadd.f32 0.001143296, %v1658_v61  ;;  %v689_v61 = vpop.f32.mrf.mxu3 }
 0x1b0   : > { %v6266_v62 = vmul.f32 0.70710677, %v6254_v19  ;;  %v1599_v11 = vand.u32 2147483648, %v6246_v45  ;;  %v1625_v4 = vadd.f32 0.4994258, %v1624_v32  ;;  %v1651_v24 = vmul.f32 %v1650_v8, %v6235_v23 }
 0x1b1   : > { %v5068_v10 = vpop.eup %5067  ;;  %v4539_v56 = vclamps-f32 %v1562_v43, 1.0  ;;  %v3485_v21 = vmul.f32 %v3421_v54, %v6190_v48  ;;  %v1660_v63 = vmul.f32 %v1659_v53, %v6235_v23  ;;  %v1615_v27 = vmul.f32 %v1614_v51, %v6202_v17 }
 0x1b2   : > { %v1589_v20 = vmul.f32 %v5068_v10, %v6246_v45  ;;  %v1685_v39 = vmul.f32 %v6266_v62, %v6266_v62  ;;  %v1626_v30 = vmul.f32 %v1625_v4, %v6202_v17  ;;  %v1652_v14 = vadd.f32 0.05243302, %v1651_v24 }
 0x1b3   : > { %v3422_v44 = vadd.f32 1.0, %v4539_v56  ;;  %vm1594_vm8 = vweird.f32 %v5068_v10  ;;  %v1661_v42 = vadd.f32 0.014752088, %v1660_v63  ;;  %v6283_v12 = vmul.f32 0.70710677, %v641_v16 }
 0x1b4   : > { %v1590_v18 = vsub.f32 1.0, %v1589_v20  ;;  %v6277_v29 = vmin.f32 %v1685_v39, 16.0  ;;  %v6280_v31 = vadd.f32 1.0, %v1626_v30  ;;  %v1653_v22 = vmul.f32 %v1652_v14, %v6235_v23 }
 0x1b5   : > { %v3486_v48 = vmul.f32 %v3422_v44, %v6195_v36  ;;  %v1662_v49 = vmul.f32 %v1661_v42, %v6235_v23  ;;  %v1576_v34 = vadd.f32 1.1283791, %v1575_v0  ;;  %v6290_v41 = vmul.f32 0.5, %v6207_v33 }
 0x1b6   : > { %v1591_v35 = vmul.f32 %v5068_v10, %v1590_v18  ;;  %v1687_v58 = vmul.f32 2.1237322e-06, %v6277_v29  ;;  %v1698_v17 = vmul.f32 3.8918573e-05, %v6277_v29  ;;  %5069 = vrcp.f32 %v6280_v31 }
 0x1b7   : > { %v3541_v26 = vpack.c.bf16 %v3486_v48, %v3485_v21  ;;  %vm1593_vm9 = vweird.f32 %v6246_v45  ;;  %v1616_v37 = vadd.f32 1.1283791, %v1615_v27  ;;  %v1663_v46 = vadd.f32 0.112945676, %v1662_v49 }
 0x1b8   : > { %v1592_v36 = vadd.f32 %v5068_v10, %v1591_v35  ;;  %vm1595_vm10 = vmor %vm1593_vm9, %vm1594_vm8  ;;  %v1600_v25 = vor.u32 1.1754944e-38, %v1599_v11  ;;  %v1688_v47 = vadd.f32 0.00028619796, %v1687_v58  ;;  %v1699_v3 = vadd.f32 0.001143296, %v1698_v17 }
 0x1b9   : > { %3573 = vst [vmem:[#allocation2 + $0x40] sm:$0xff] %v3541_v26  ;;  %v1725_v57 = vmul.f32 %v6283_v12, %v6283_v12  ;;  %vm1598_vm11 = vcmp.eq.f32.partialorder %v1597_v59, 8.507059e+37  ;;  %v1654_v52 = vadd.f32 0.18741608, %v1653_v22  ;;  %v1664_v33 = vmul.f32 %v1663_v46, %v6235_v23 }
 0x1ba   : > { %v1596_v50 = vsel %vm1595_vm10, %v5068_v10, %v1592_v36  ;;  %v1689_v40 = vmul.f32 %v1688_v47, %v6277_v29  ;;  %v1700_v45 = vmul.f32 %v1699_v3, %v6277_v29  ;;  %v1577_v54 = vmul.f32 %v1576_v34, %v6152_v2  ;;  %v545_v36 = vpop.f32.mrf.mxu0 }
 0x1bb   : > { %v1601_v60 = vsel %vm1598_vm11, %v1600_v25, %v1596_v50  ;;  %v6299_v38 = vmin.f32 %v1725_v57, 16.0  ;;  %v1665_v7 = vadd.f32 0.4994258, %v1664_v33  ;;  %v6303_v43 = vmul.f32 0.5, %v6254_v19 }
 0x1bc   : > { %v6305_v51 = vmul.f32 0.5, %v641_v16  ;;  %v5070_v32 = vpop.eup %5069  ;;  %v1617_v8 = vmul.f32 %v1616_v37, %v6170_v28  ;;  %v1690_v0 = vadd.f32 0.0036580483, %v1689_v40  ;;  %v1701_v59 = vadd.f32 0.014752088, %v1700_v45 }
 0x1bd   : > { %v1727_v53 = vmul.f32 2.1237322e-06, %v6299_v38  ;;  %v1602_v10 = vmul.f32 %v1601_v60, %v1577_v54  ;;  %v1629_v56 = vmul.f32 %v5070_v32, %v6280_v31  ;;  %v1655_v11 = vmul.f32 %v1654_v52, %v6235_v23 }
 0x1be   : > { %v6312_v2 = vadd.f32 %v689_v61, %v5563_v15  ;;  %v1666_v19 = vmul.f32 %v1665_v7, %v6235_v23  ;;  %v1691_v16 = vmul.f32 %v1690_v0, %v6277_v29  ;;  %v1702_v4 = vmul.f32 %v1701_v59, %v6277_v29 }
 0x1bf   : > { %v1728_v24 = vadd.f32 0.00028619796, %v1727_v53  ;;  %v1630_v28 = vsub.f32 1.0, %v1629_v56  ;;  %v1637_v21 = vand.u32 2147483647, %v6280_v31  ;;  %v1639_v20 = vand.u32 2147483648, %v6280_v31 }
 0x1c0   : > { %v1738_v63 = vmul.f32 3.8918573e-05, %v6299_v38  ;;  %v6320_v39 = vadd.f32 1.0, %v1666_v19  ;;  %v1692_v44 = vadd.f32 0.05243302, %v1691_v16  ;;  %vm1634_vm12 = vweird.f32 %v5070_v32 }
 0x1c1   : > { %v1703_v27 = vadd.f32 0.112945676, %v1702_v4  ;;  %v1729_v30 = vmul.f32 %v1728_v24, %v6299_v38  ;;  %v1631_v14 = vmul.f32 %v5070_v32, %v1630_v28  ;;  %v6324_v18 = vmul.f32 0.70710677, %v6312_v2 }
 0x1c2   : > { %v1739_v23 = vadd.f32 0.001143296, %v1738_v63  ;;  %v4540_v42 = vclamps-f32 %v1602_v10, 1.0  ;;  %vm1633_vm13 = vweird.f32 %v6280_v31  ;;  %v1656_v48 = vadd.f32 1.1283791, %v1655_v11 }
 0x1c3   : > { %5071 = vrcp.f32 %v6320_v39  ;;  %v1632_v22 = vadd.f32 %v5070_v32, %v1631_v14  ;;  %v1693_v35 = vmul.f32 %v1692_v44, %v6277_v29  ;;  %v1704_v49 = vmul.f32 %v1703_v27, %v6277_v29  ;;  %vm1635_vm14 = vmor %vm1633_vm13, %vm1634_vm12 }
 0x1c4   : > { %v1730_v58 = vadd.f32 0.0036580483, %v1729_v30  ;;  %vm1638_vm15 = vcmp.eq.f32.partialorder %v1637_v21, 8.507059e+37  ;;  %v1640_v17 = vor.u32 1.1754944e-38, %v1639_v20  ;;  %v1740_v26 = vmul.f32 %v1739_v23, %v6299_v38  ;;  %v4913_v21 = vld [vmem:[#allocation9 + $0x8] sm:$0xff] }
 0x1c5   : > { %v1765_v34 = vmul.f32 %v6324_v18, %v6324_v18  ;;  %v1636_v37 = vsel %vm1635_vm14, %v5070_v32, %v1632_v22  ;;  %v1694_v31 = vadd.f32 0.18741608, %v1693_v35  ;;  %v1705_v46 = vadd.f32 0.4994258, %v1704_v49  ;;  %v4921_v20 = vld [vmem:[#allocation9 + $0x48] sm:$0xff]  ;;  %4055 = vmatpush.bf16.msrb.mxu0 %v4913_v21 }
 0x1c6   : > { %v1731_v25 = vmul.f32 %v1730_v58, %v6299_v38  ;;  %v3423_v47 = vadd.f32 1.0, %v4540_v42  ;;  %v1641_v3 = vsel %vm1638_vm15, %v1640_v17, %v1636_v37  ;;  %v1741_v57 = vadd.f32 0.014752088, %v1740_v26  ;;  %4104 = vmatpush.bf16.msrb.mxu1 %v4921_v20 }
 0x1c7   : > { %v6334_v50 = vmin.f32 %v1765_v34, 16.0  ;;  %v1642_v52 = vmul.f32 %v1641_v3, %v1617_v8  ;;  %v1657_v33 = vmul.f32 %v1656_v48, %v6224_v1  ;;  %v1706_v60 = vmul.f32 %v1705_v46, %v6277_v29 }
 0x1c8   : > { %v6339_v40 = vadd.f32 %v545_v36, %v5543_v5  ;;  %v1695_v61 = vmul.f32 %v1694_v31, %v6277_v29  ;;  %v1742_v54 = vmul.f32 %v1741_v57, %v6299_v38  ;;  %v1677_v8 = vand.u32 2147483647, %v6320_v39 }
 0x1c9   : > { %v5072_v45 = vpop.eup %5071  ;;  %v1767_v7 = vmul.f32 2.1237322e-06, %v6334_v50  ;;  %v1778_v32 = vmul.f32 3.8918573e-05, %v6334_v50  ;;  %v4541_v0 = vclamps-f32 %v1642_v52, 1.0  ;;  %v3487_v53 = vmul.f32 %v3423_v47, %v6216_v9  ;;  %v4937_v47 = vld [vmem:[#allocation9 + $0xc8] sm:$0xff]  ;;  %v594_v52 = vpop.f32.mrf.mxu1 }
 0x1ca   : > { %v1669_v59 = vmul.f32 %v5072_v45, %v6320_v39  ;;  %v1732_v1 = vadd.f32 0.05243302, %v1731_v25  ;;  %v6348_v10 = vadd.f32 1.0, %v1706_v60  ;;  %v1743_v56 = vadd.f32 0.112945676, %v1742_v54  ;;  %v4929_v25 = vld [vmem:[#allocation9 + $0x88] sm:$0xff]  ;;  %v643_v60 = vpop.f32.mrf.mxu2  ;;  %4202 = vmatpush.bf16.msrb.mxu3 %v4937_v47 }
 0x1cb   : > { %v1768_v11 = vadd.f32 0.00028619796, %v1767_v7  ;;  %v3424_v19 = vadd.f32 1.0, %v4541_v0  ;;  %v1679_v16 = vand.u32 2147483648, %v6320_v39  ;;  %v1779_v4 = vadd.f32 0.001143296, %v1778_v32  ;;  %4153 = vmatpush.bf16.msrb.mxu2 %v4929_v25 }
 0x1cc   : > { %v1670_v29 = vsub.f32 1.0, %v1669_v59  ;;  %vm1674_vm0 = vweird.f32 %v5072_v45  ;;  %v1696_v24 = vadd.f32 1.1283791, %v1695_v61  ;;  %5073 = vrcp.f32 %v6348_v10 }
 0x1cd   : > { %v6353_v28 = vmul.f32 0.70710677, %v6339_v40  ;;  %v3488_v9 = vmul.f32 %v3424_v19, %v6259_v55  ;;  %v1733_v44 = vmul.f32 %v1732_v1, %v6299_v38  ;;  %v1744_v27 = vmul.f32 %v1743_v56, %v6299_v38 }
 0x1ce   : > { %v1671_v63 = vmul.f32 %v5072_v45, %v1670_v29  ;;  %vm1673_vm1 = vweird.f32 %v6320_v39  ;;  %v6360_v30 = vmul.f32 0.5, %v6312_v2  ;;  %v1769_v14 = vmul.f32 %v1768_v11, %v6334_v50 }
 0x1cf   : > { %v1780_v23 = vmul.f32 %v1779_v4, %v6334_v50  ;;  %v3542_v42 = vpack.c.bf16 %v3488_v9, %v3487_v53  ;;  %vm1678_vm2 = vcmp.eq.f32.partialorder %v1677_v8, 8.507059e+37  ;;  %v1745_v55 = vadd.f32 0.4994258, %v1744_v27  ;;  %vm1675_vm3 = vmor %vm1673_vm1, %vm1674_vm0 }
 0x1d0   : > { %v1672_v48 = vadd.f32 %v5072_v45, %v1671_v63  ;;  %v1680_v22 = vor.u32 1.1754944e-38, %v1679_v16  ;;  %v1770_v35 = vadd.f32 0.0036580483, %v1769_v14  ;;  %v1805_v39 = vmul.f32 %v6353_v28, %v6353_v28 }
 0x1d1   : > { %v1781_v49 = vadd.f32 0.014752088, %v1780_v23  ;;  %3574 = vst [vmem:[#allocation2 + $0x48] sm:$0xff] %v3542_v42  ;;  %v1697_v58 = vmul.f32 %v1696_v24, %v6266_v62  ;;  %v1734_v17 = vadd.f32 0.18741608, %v1733_v44  ;;  %v1746_v26 = vmul.f32 %v1745_v55, %v6299_v38 }
 0x1d2   : > { %v1676_v2 = vsel %vm1675_vm3, %v5072_v45, %v1672_v48  ;;  %v5074_v34 = vpop.eup %5073  ;;  %v1771_v37 = vmul.f32 %v1770_v35, %v6334_v50  ;;  %v6371_v46 = vmin.f32 %v1805_v39, 16.0  ;;  %vm1713_vm4 = vweird.f32 %v6348_v10 }
 0x1d3   : > { %v1681_v36 = vsel %vm1678_vm2, %v1680_v22, %v1676_v2  ;;  %v1782_v31 = vmul.f32 %v1781_v49, %v6334_v50  ;;  %v1709_v57 = vmul.f32 %v5074_v34, %v6348_v10  ;;  %v1717_v62 = vand.u32 2147483647, %v6348_v10 }
 0x1d4   : > { %v1682_v3 = vmul.f32 %v1681_v36, %v1657_v33  ;;  %v1719_v45 = vand.u32 2147483648, %v6348_v10  ;;  %v6377_v61 = vadd.f32 1.0, %v1746_v26  ;;  %v1772_v54 = vadd.f32 0.05243302, %v1771_v37 }
 0x1d5   : > { %v1783_v7 = vadd.f32 0.112945676, %v1782_v31  ;;  %v1710_v32 = vsub.f32 1.0, %v1709_v57  ;;  %v1735_v0 = vmul.f32 %v1734_v17, %v6299_v38  ;;  %v1807_v33 = vmul.f32 2.1237322e-06, %v6371_v46 }
 0x1d6   : > { %v1818_v59 = vmul.f32 3.8918573e-05, %v6371_v46  ;;  %vm1714_vm5 = vweird.f32 %v5074_v34  ;;  %5075 = vrcp.f32 %v6377_v61  ;;  %v6384_v8 = vadd.f32 %v594_v52, %v5545_v6 }
 0x1d7   : > { %v6387_v1 = vadd.f32 %v643_v60, %v5559_v13  ;;  %v4542_v53 = vclamps-f32 %v1682_v3, 1.0  ;;  %v1711_v56 = vmul.f32 %v5074_v34, %v1710_v32  ;;  %v1773_v11 = vmul.f32 %v1772_v54, %v6334_v50  ;;  %vm1715_vm7 = vmor %vm1713_vm4, %vm1714_vm5 }
 0x1d8   : > { %v1784_v19 = vmul.f32 %v1783_v7, %v6334_v50  ;;  %vm6391_vm6 = vcmp.eq.f32.partialorder %v1717_v62, 8.507059e+37  ;;  %v1720_v29 = vor.u32 1.1754944e-38, %v1719_v45  ;;  %v1808_v16 = vadd.f32 0.00028619796, %v1807_v33 }
 0x1d9   : > { %v1819_v4 = vadd.f32 0.001143296, %v1818_v59  ;;  %v1712_v24 = vadd.f32 %v5074_v34, %v1711_v56  ;;  %v1736_v21 = vadd.f32 1.1283791, %v1735_v0  ;;  %v1774_v20 = vadd.f32 0.18741608, %v1773_v11 }
 0x1da   : > { %v1785_v9 = vadd.f32 0.4994258, %v1784_v19  ;;  %v1757_v63 = vand.u32 2147483647, %v6377_v61  ;;  %v1809_v44 = vmul.f32 %v1808_v16, %v6371_v46  ;;  %v6402_v14 = vmul.f32 0.70710677, %v6384_v8 }
 0x1db   : > { %v1820_v27 = vmul.f32 %v1819_v4, %v6371_v46  ;;  %v3425_v23 = vadd.f32 1.0, %v4542_v53  ;;  %v1716_v42 = vsel %vm1715_vm7, %v5074_v34, %v1712_v24  ;;  %v6406_v55 = vmul.f32 0.70710677, %v6387_v1 }
 0x1dc   : > { %v1786_v48 = vmul.f32 %v1785_v9, %v6334_v50  ;;  %v5076_v22 = vpop.eup %5075  ;;  %v1721_v10 = vsel %vm6391_vm6, %v1720_v29, %v1716_v42  ;;  %v1810_v35 = vadd.f32 0.0036580483, %v1809_v44  ;;  %v1845_v39 = vmul.f32 %v6402_v14, %v6402_v14 }
 0x1dd   : > { %v1821_v49 = vadd.f32 0.014752088, %v1820_v27  ;;  %v1722_v2 = vmul.f32 %v1721_v10, %v1697_v58  ;;  %v1737_v17 = vmul.f32 %v1736_v21, %v6283_v12  ;;  %v1749_v26 = vmul.f32 %v5076_v22, %v6377_v61 }
 0x1de   : > { %v1775_v34 = vmul.f32 %v1774_v20, %v6334_v50  ;;  %v6415_v36 = vadd.f32 1.0, %v1786_v48  ;;  %v1811_v37 = vmul.f32 %v1810_v35, %v6371_v46  ;;  %v6419_v25 = vmin.f32 %v1845_v39, 16.0 }
 0x1df   : > { %v1822_v31 = vmul.f32 %v1821_v49, %v6371_v46  ;;  %v4543_v47 = vclamps-f32 %v1722_v2, 1.0  ;;  %v1750_v3 = vsub.f32 1.0, %v1749_v26  ;;  %vm6421_vm8 = vcmp.eq.f32.partialorder %v1757_v63, 8.507059e+37  ;;  %v692_v2 = vpop.f32.mrf.mxu3 }
 0x1e0   : > { %v1759_v12 = vand.u32 2147483648, %v6377_v61  ;;  %v3489_v58 = vmul.f32 %v3425_v23, %v6290_v41  ;;  %vm1754_vm9 = vweird.f32 %v5076_v22  ;;  %5077 = vrcp.f32 %v6415_v36 }
 0x1e1   : > { %v1885_v50 = vmul.f32 %v6406_v55, %v6406_v55  ;;  %v3426_v62 = vadd.f32 1.0, %v4543_v47  ;;  %v1751_v52 = vmul.f32 %v5076_v22, %v1750_v3  ;;  %v1812_v60 = vadd.f32 0.05243302, %v1811_v37 }
 0x1e2   : > { %v1823_v45 = vadd.f32 0.112945676, %v1822_v31  ;;  %vm1753_vm10 = vweird.f32 %v6377_v61  ;;  %v1776_v54 = vadd.f32 1.1283791, %v1775_v34  ;;  %v1847_v7 = vmul.f32 2.1237322e-06, %v6419_v25 }
 0x1e3   : > { %v1858_v32 = vmul.f32 3.8918573e-05, %v6419_v25  ;;  %v3490_v0 = vmul.f32 %v3426_v62, %v6303_v43  ;;  %v1752_v41 = vadd.f32 %v5076_v22, %v1751_v52  ;;  %v1813_v33 = vmul.f32 %v1812_v60, %v6371_v46  ;;  %vm1755_vm11 = vmor %vm1753_vm10, %vm1754_vm9 }
 0x1e4   : > { %v1824_v59 = vmul.f32 %v1823_v45, %v6371_v46  ;;  %v1760_v53 = vor.u32 1.1754944e-38, %v1759_v12  ;;  %v1848_v56 = vadd.f32 0.00028619796, %v1847_v7  ;;  %v6437_v19 = vmin.f32 %v1885_v50, 16.0 }
 0x1e5   : > { %v1859_v11 = vadd.f32 0.001143296, %v1858_v32  ;;  %v3543_v61 = vpack.c.bf16 %v3490_v0, %v3489_v58  ;;  %v1756_v38 = vsel %vm1755_vm11, %v5076_v22, %v1752_v41  ;;  %v1814_v29 = vadd.f32 0.18741608, %v1813_v33 }
 0x1e6   : > { %v1825_v16 = vadd.f32 0.4994258, %v1824_v59  ;;  %v5078_v4 = vpop.eup %5077  ;;  %v1761_v43 = vsel %vm6421_vm8, %v1760_v53, %v1756_v38  ;;  %v1849_v24 = vmul.f32 %v1848_v56, %v6419_v25  ;;  %v1887_v20 = vmul.f32 2.1237322e-06, %v6437_v19 }
 0x1e7   : > { %v1860_v21 = vmul.f32 %v1859_v11, %v6419_v25  ;;  %3575 = vst [vmem:[#allocation2 + $0x50] sm:$0xff] %v3543_v61  ;;  %v1762_v9 = vmul.f32 %v1761_v43, %v1737_v17  ;;  %v1789_v63 = vmul.f32 %v5078_v4, %v6415_v36  ;;  %v1797_v44 = vand.u32 2147483647, %v6415_v36 }
 0x1e8   : > { %v1815_v27 = vmul.f32 %v1814_v29, %v6371_v46  ;;  %v1826_v23 = vmul.f32 %v1825_v16, %v6371_v46  ;;  %v1850_v42 = vadd.f32 0.0036580483, %v1849_v24  ;;  %v1888_v22 = vadd.f32 0.00028619796, %v1887_v20  ;;  %v547_v16 = vpop.f32.mrf.mxu0 }
 0x1e9   : > { %v1861_v48 = vadd.f32 0.014752088, %v1860_v21  ;;  %v4544_v10 = vclamps-f32 %v1762_v9, 1.0  ;;  %v1790_v35 = vsub.f32 1.0, %v1789_v63  ;;  %v1799_v49 = vand.u32 2147483648, %v6415_v36 }
 0x1ea   : > { %v1898_v39 = vmul.f32 3.8918573e-05, %v6437_v19  ;;  %v6450_v26 = vadd.f32 1.0, %v1826_v23  ;;  %v1851_v17 = vmul.f32 %v1850_v42, %v6419_v25  ;;  %v1889_v37 = vmul.f32 %v1888_v22, %v6437_v19 }
 0x1eb   : > { %v1862_v34 = vmul.f32 %v1861_v48, %v6419_v25  ;;  %v1791_v31 = vmul.f32 %v5078_v4, %v1790_v35  ;;  %vm1794_vm12 = vweird.f32 %v5078_v4  ;;  %v1816_v46 = vadd.f32 1.1283791, %v1815_v27 }
 0x1ec   : > { %v1899_v47 = vadd.f32 0.001143296, %v1898_v39  ;;  %v1777_v3 = vmul.f32 %v1776_v54, %v6324_v18  ;;  %vm1793_vm13 = vweird.f32 %v6415_v36  ;;  %5079 = vrcp.f32 %v6450_v26 }
 0x1ed   : > { %v6459_v57 = vadd.f32 %v692_v2, %v5563_v15  ;;  %v1792_v12 = vadd.f32 %v5078_v4, %v1791_v31  ;;  %vm1798_vm14 = vcmp.eq.f32.partialorder %v1797_v44, 8.507059e+37  ;;  %v1852_v58 = vadd.f32 0.05243302, %v1851_v17  ;;  %vm1795_vm15 = vmor %vm1793_vm13, %vm1794_vm12  ;;  %v596_v17 = vpop.f32.mrf.mxu1 }
 0x1ee   : > { %v1863_v50 = vadd.f32 0.112945676, %v1862_v34  ;;  %v3427_v62 = vadd.f32 1.0, %v4544_v10  ;;  %v1800_v52 = vor.u32 1.1754944e-38, %v1799_v49  ;;  %v1890_v60 = vadd.f32 0.0036580483, %v1889_v37 }
 0x1ef   : > { %v1900_v45 = vmul.f32 %v1899_v47, %v6437_v19  ;;  %v1796_v7 = vsel %vm1795_vm15, %v5078_v4, %v1792_v12  ;;  %v6463_v18 = vmul.f32 %v1816_v46, %v6353_v28  ;;  %v1853_v36 = vmul.f32 %v1852_v58, %v6419_v25 }
 0x1f0   : > { %v1864_v54 = vmul.f32 %v1863_v50, %v6419_v25  ;;  %v1801_v32 = vsel %vm1798_vm14, %v1800_v52, %v1796_v7  ;;  %v1891_v0 = vmul.f32 %v1890_v60, %v6437_v19  ;;  %v6469_v33 = vmul.f32 0.70710677, %v6459_v57 }
 0x1f1   : > { %v1901_v41 = vadd.f32 0.014752088, %v1900_v45  ;;  %v1802_v59 = vmul.f32 %v1801_v32, %v1777_v3  ;;  %vm1833_vm0 = vweird.f32 %v6450_v26  ;;  %v1854_v53 = vadd.f32 0.18741608, %v1853_v36 }
 0x1f2   : > { %v1865_v56 = vadd.f32 0.4994258, %v1864_v54  ;;  %v5080_v11 = vpop.eup %5079  ;;  %v1837_v28 = vand.u32 2147483647, %v6450_v26  ;;  %v1892_v61 = vadd.f32 0.05243302, %v1891_v0  ;;  %v1925_v29 = vmul.f32 %v6469_v33, %v6469_v33 }
 0x1f3   : > { %v1902_v38 = vmul.f32 %v1901_v41, %v6437_v19  ;;  %v4545_v4 = vclamps-f32 %v1802_v59, 1.0  ;;  %v1829_v43 = vmul.f32 %v5080_v11, %v6450_v26  ;;  %v1839_v24 = vand.u32 2147483648, %v6450_v26 }
 0x1f4   : > { %v1855_v21 = vmul.f32 %v1854_v53, %v6419_v25  ;;  %v1866_v20 = vmul.f32 %v1865_v56, %v6419_v25  ;;  %v1893_v9 = vmul.f32 %v1892_v61, %v6437_v19  ;;  %v6481_v44 = vmin.f32 %v1925_v29, 16.0  ;;  %v645_v61 = vpop.f32.mrf.mxu2 }
 0x1f5   : > { %v1903_v63 = vadd.f32 0.112945676, %v1902_v38  ;;  %v3491_v27 = vmul.f32 %v3427_v62, %v6305_v51  ;;  %v3428_v23 = vadd.f32 1.0, %v4545_v4  ;;  %v1830_v42 = vsub.f32 1.0, %v1829_v43 }
 0x1f6   : > { %v6485_v48 = vadd.f32 %v547_v16, %v5543_v5  ;;  %v6487_v22 = vadd.f32 1.0, %v1866_v20  ;;  %v1894_v10 = vadd.f32 0.18741608, %v1893_v9  ;;  %v1927_v49 = vmul.f32 2.1237322e-06, %v6481_v44 }
 0x1f7   : > { %v1904_v35 = vmul.f32 %v1903_v63, %v6437_v19  ;;  %v3492_v25 = vmul.f32 %v3428_v23, %v6360_v30  ;;  %v1831_v39 = vmul.f32 %v5080_v11, %v1830_v42  ;;  %vm1834_vm1 = vweird.f32 %v5080_v11 }
 0x1f8   : > { %v1938_v2 = vmul.f32 3.8918573e-05, %v6481_v44  ;;  %vm6493_vm2 = vcmp.eq.f32.partialorder %v1837_v28, 8.507059e+37  ;;  %v1840_v34 = vor.u32 1.1754944e-38, %v1839_v24  ;;  %v1856_v37 = vadd.f32 1.1283791, %v1855_v21  ;;  %vm1835_vm3 = vmor %vm1833_vm0, %vm1834_vm1 }
 0x1f9   : > { %5081 = vrcp.f32 %v6487_v22  ;;  %v3544_v31 = vpack.c.bf16 %v3492_v25, %v3491_v27  ;;  %v1832_v46 = vadd.f32 %v5080_v11, %v1831_v39  ;;  %v1895_v47 = vmul.f32 %v1894_v10, %v6437_v19 }
 0x1fa   : > { %v1905_v3 = vadd.f32 0.4994258, %v1904_v35  ;;  %v1877_v30 = vand.u32 2147483647, %v6487_v22  ;;  %v1928_v12 = vadd.f32 0.00028619796, %v1927_v49  ;;  %v6503_v50 = vadd.f32 %v596_v17, %v5545_v6 }
 0x1fb   : > { %v1939_v58 = vadd.f32 0.001143296, %v1938_v2  ;;  %3576 = vst [vmem:[#allocation2 + $0x58] sm:$0xff] %v3544_v31  ;;  %v1836_v62 = vsel %vm1835_vm3, %v5080_v11, %v1832_v46  ;;  %v1879_v52 = vand.u32 2147483648, %v6487_v22  ;;  %v6508_v45 = vmul.f32 0.70710677, %v6485_v48 }
 0x1fc   : > { %v1906_v60 = vmul.f32 %v1905_v3, %v6437_v19  ;;  %v1841_v26 = vsel %vm6493_vm2, %v1840_v34, %v1836_v62  ;;  %v1896_v7 = vadd.f32 1.1283791, %v1895_v47  ;;  %v1929_v36 = vmul.f32 %v1928_v12, %v6481_v44 }
 0x1fd   : > { %v1940_v54 = vmul.f32 %v1939_v58, %v6481_v44  ;;  %v6515_v32 = vmul.f32 0.5, %v6339_v40  ;;  %v6518_v0 = vmul.f32 0.5, %v6384_v8  ;;  %v1965_v19 = vmul.f32 %v6508_v45, %v6508_v45 }
 0x1fe   : > { %v6520_v41 = vadd.f32 1.0, %v1906_v60  ;;  %v1842_v53 = vmul.f32 %v1841_v26, %v6463_v18  ;;  %v1930_v56 = vadd.f32 0.0036580483, %v1929_v36  ;;  %v6526_v28 = vmul.f32 0.70710677, %v6503_v50 }
 0x1ff   : > { %v5082_v59 = vpop.eup %5081  ;;  %v1941_v11 = vadd.f32 0.014752088, %v1940_v54  ;;  %v1857_v40 = vmul.f32 %v1856_v37, %v6402_v14  ;;  %vm1873_vm4 = vweird.f32 %v6487_v22  ;;  %vm6532_vm5 = vcmp.eq.f32.partialorder %v1877_v30, 8.507059e+37 }
 0x200   : > { %v1869_v38 = vmul.f32 %v5082_v59, %v6487_v22  ;;  %5083 = vrcp.f32 %v6520_v41  ;;  %v1880_v29 = vor.u32 1.1754944e-38, %v1879_v52  ;;  %v6537_v18 = vmul.f32 %v1896_v7, %v6406_v55 }
 0x201   : > { %v1931_v16 = vmul.f32 %v1930_v56, %v6481_v44  ;;  %v1942_v43 = vmul.f32 %v1941_v11, %v6481_v44  ;;  %v6541_v14 = vmin.f32 %v1965_v19, 16.0  ;;  %v6544_v24 = vadd.f32 %v645_v61, %v5559_v13 }
 0x202   : > { %v1870_v4 = vsub.f32 1.0, %v1869_v38  ;;  %v4546_v21 = vclamps-f32 %v1842_v53, 1.0  ;;  %v1919_v20 = vand.u32 2147483648, %v6520_v41  ;;  %v2005_v63 = vmul.f32 %v6526_v28, %v6526_v28 }
 0x203   : > { %v1932_v9 = vadd.f32 0.05243302, %v1931_v16  ;;  %vm1874_vm6 = vweird.f32 %v5082_v59  ;;  %v1943_v55 = vadd.f32 0.112945676, %v1942_v43  ;;  %v1967_v23 = vmul.f32 2.1237322e-06, %v6541_v14 }
 0x204   : > { %v1871_v27 = vmul.f32 %v5082_v59, %v1870_v4  ;;  %vm1913_vm7 = vweird.f32 %v6520_v41  ;;  %v1978_v10 = vmul.f32 3.8918573e-05, %v6541_v14  ;;  %v6553_v35 = vmin.f32 %v2005_v63, 16.0  ;;  %vm1875_vm8 = vmor %vm1873_vm4, %vm1874_vm6 }
 0x205   : > { %v1933_v42 = vmul.f32 %v1932_v9, %v6481_v44  ;;  %v1917_v39 = vand.u32 2147483647, %v6520_v41  ;;  %v1944_v2 = vmul.f32 %v1943_v55, %v6481_v44  ;;  %v1968_v17 = vadd.f32 0.00028619796, %v1967_v23 }
 0x206   : > { %v5084_v49 = vpop.eup %5083  ;;  %v1872_v25 = vadd.f32 %v5082_v59, %v1871_v27  ;;  %v3429_v51 = vadd.f32 1.0, %v4546_v21  ;;  %v1920_v37 = vor.u32 1.1754944e-38, %v1919_v20  ;;  %v1979_v31 = vadd.f32 0.001143296, %v1978_v10 }
 0x207   : > { %v1909_v34 = vmul.f32 %v5084_v49, %v6520_v41  ;;  %v1945_v47 = vadd.f32 0.4994258, %v1944_v2  ;;  %v1969_v3 = vmul.f32 %v1968_v17, %v6541_v14  ;;  %v2007_v30 = vmul.f32 2.1237322e-06, %v6553_v35 }
 0x208   : > { %v1876_v46 = vsel %vm1875_vm8, %v5082_v59, %v1872_v25  ;;  %v1934_v62 = vadd.f32 0.18741608, %v1933_v42  ;;  %v1980_v52 = vmul.f32 %v1979_v31, %v6541_v14  ;;  %vm1914_vm9 = vweird.f32 %v5084_v49 }
 0x209   : > { %v1881_v12 = vsel %vm6532_vm5, %v1880_v29, %v1876_v46  ;;  %v1910_v58 = vsub.f32 1.0, %v1909_v34  ;;  %v1946_v22 = vmul.f32 %v1945_v47, %v6481_v44  ;;  %v1970_v26 = vadd.f32 0.0036580483, %v1969_v3  ;;  %vm1915_vm10 = vmor %vm1913_vm7, %vm1914_vm9 }
 0x20a   : > { %v1882_v60 = vmul.f32 %v1881_v12, %v1857_v40  ;;  %v2008_v7 = vadd.f32 0.00028619796, %v2007_v30  ;;  %v1981_v54 = vadd.f32 0.014752088, %v1980_v52  ;;  %v2018_v19 = vmul.f32 3.8918573e-05, %v6553_v35 }
 0x20b   : > { %v1911_v36 = vmul.f32 %v5084_v49, %v1910_v58  ;;  %v6567_v53 = vadd.f32 1.0, %v1946_v22  ;;  %v1971_v56 = vmul.f32 %v1970_v26, %v6541_v14  ;;  %v3493_v61 = vmul.f32 %v3429_v51, %v6515_v32 }
 0x20c   : > { %v4547_v59 = vclamps-f32 %v1882_v60, 1.0  ;;  %v2009_v11 = vmul.f32 %v2008_v7, %v6553_v35  ;;  %v1935_v40 = vmul.f32 %v1934_v62, %v6481_v44  ;;  %v1982_v8 = vmul.f32 %v1981_v54, %v6541_v14  ;;  %v4912_v60 = vld [vmem:[#allocation9] sm:$0xff] }
 0x20d   : > { %v1912_v38 = vadd.f32 %v5084_v49, %v1911_v36  ;;  %5085 = vrcp.f32 %v6567_v53  ;;  %v2019_v16 = vadd.f32 0.001143296, %v2018_v19  ;;  %v6578_v4 = vmul.f32 0.70710677, %v6544_v24  ;;  %4056 = vmatpush.bf16.msrb.mxu0 %v4912_v60 }
 0x20e   : > { %v3430_v29 = vadd.f32 1.0, %v4547_v59  ;;  %vm1918_vm11 = vcmp.eq.f32.partialorder %v1917_v39, 8.507059e+37  ;;  %v1972_v21 = vadd.f32 0.05243302, %v1971_v56  ;;  %v1983_v20 = vadd.f32 0.112945676, %v1982_v8  ;;  %v550_v59 = vpop.f32.mrf.mxu0 }
 0x20f   : > { %v1916_v43 = vsel %vm1915_vm10, %v5084_v49, %v1912_v38  ;;  %v743_v44 = vmul.f32 0.5, %v6387_v1  ;;  %v2010_v63 = vadd.f32 0.0036580483, %v2009_v11  ;;  %v1936_v41 = vadd.f32 1.1283791, %v1935_v40  ;;  %v4920_v56 = vld [vmem:[#allocation9 + $0x40] sm:$0xff] }
 0x210   : > { %v3494_v32 = vmul.f32 %v3430_v29, %v6518_v0  ;;  %v1921_v9 = vsel %vm1918_vm11, %v1920_v37, %v1916_v43  ;;  %v1973_v55 = vmul.f32 %v1972_v21, %v6541_v14  ;;  %v1984_v23 = vmul.f32 %v1983_v20, %v6541_v14  ;;  %v694_v37 = vpop.f32.mrf.mxu3  ;;  %4105 = vmatpush.bf16.msrb.mxu1 %v4920_v56 }
 0x211   : > { %v1922_v27 = vmul.f32 %v1921_v9, %v6537_v18  ;;  %v2011_v10 = vmul.f32 %v2010_v63, %v6553_v35  ;;  %v2020_v49 = vmul.f32 %v2019_v16, %v6553_v35  ;;  %v2045_v25 = vmul.f32 %v6578_v4, %v6578_v4 }
 0x212   : > { %v3545_v42 = vpack.c.bf16 %v3494_v32, %v3493_v61  ;;  %v6590_v1 = vmul.f32 0.5, %v6459_v57  ;;  %v6593_v39 = vmul.f32 0.5, %v6485_v48  ;;  %v1985_v18 = vadd.f32 0.4994258, %v1984_v23  ;;  %v4928_v23 = vld [vmem:[#allocation9 + $0x80] sm:$0xff] }
 0x213   : > { %v4548_v0 = vclamps-f32 %v1922_v27, 1.0  ;;  %v5086_v2 = vpop.eup %5085  ;;  %v1974_v17 = vadd.f32 0.18741608, %v1973_v55  ;;  %v2021_v51 = vadd.f32 0.014752088, %v2020_v49  ;;  %v6595_v34 = vmin.f32 %v2045_v25, 16.0  ;;  %4154 = vmatpush.bf16.msrb.mxu2 %v4928_v23 }
 0x214   : > { %3577 = vst [vmem:[#allocation2 + $0x60] sm:$0xff] %v3545_v42  ;;  %v1937_v31 = vmul.f32 %v1936_v41, %v6469_v33  ;;  %v1949_v46 = vmul.f32 %v5086_v2, %v6567_v53  ;;  %v1957_v47 = vand.u32 2147483647, %v6567_v53  ;;  %v6601_v57 = vmul.f32 0.5, %v6503_v50  ;;  %v4936_v42 = vld [vmem:[#allocation9 + $0xc0] sm:$0xff] }
 0x215   : > { %v1986_v48 = vmul.f32 %v1985_v18, %v6541_v14  ;;  %v2012_v3 = vadd.f32 0.05243302, %v2011_v10  ;;  %v2022_v30 = vmul.f32 %v2021_v51, %v6553_v35  ;;  %v2047_v12 = vmul.f32 2.1237322e-06, %v6595_v34  ;;  %4203 = vmatpush.bf16.msrb.mxu3 %v4936_v42 }
 0x216   : > { %v1950_v58 = vsub.f32 1.0, %v1949_v46  ;;  %v1959_v62 = vand.u32 2147483648, %v6567_v53  ;;  %v2058_v52 = vmul.f32 3.8918573e-05, %v6595_v34  ;;  %v6609_v33 = vadd.f32 %v694_v37, %v5563_v15 }
 0x217   : > { %v3431_v22 = vadd.f32 1.0, %v4548_v0  ;;  %v1975_v50 = vmul.f32 %v1974_v17, %v6541_v14  ;;  %v6612_v26 = vadd.f32 1.0, %v1986_v48  ;;  %v2023_v7 = vadd.f32 0.112945676, %v2022_v30 }
 0x218   : > { %v1951_v36 = vmul.f32 %v5086_v2, %v1950_v58  ;;  %vm1954_vm12 = vweird.f32 %v5086_v2  ;;  %v2048_v54 = vadd.f32 0.00028619796, %v2047_v12  ;;  %v2059_v19 = vadd.f32 0.001143296, %v2058_v52 }
 0x219   : > { %vm1953_vm13 = vweird.f32 %v6567_v53  ;;  %vm6615_vm14 = vcmp.eq.f32.partialorder %v1957_v47, 8.507059e+37  ;;  %5087 = vrcp.f32 %v6612_v26  ;;  %v2013_v14 = vmul.f32 %v2012_v3, %v6553_v35 }
 0x21a   : > { %v1952_v61 = vadd.f32 %v5086_v2, %v1951_v36  ;;  %v1960_v38 = vor.u32 1.1754944e-38, %v1959_v62  ;;  %v2024_v40 = vmul.f32 %v2023_v7, %v6553_v35  ;;  %v2049_v8 = vmul.f32 %v2048_v54, %v6595_v34  ;;  %vm1955_vm15 = vmor %vm1953_vm13, %vm1954_vm12  ;;  %v599_v54 = vpop.f32.mrf.mxu1 }
 0x21b   : > { %v1976_v29 = vadd.f32 1.1283791, %v1975_v50  ;;  %v2060_v53 = vmul.f32 %v2059_v19, %v6595_v34  ;;  %v6626_v16 = vmul.f32 0.70710677, %v6609_v33  ;;  %v6629_v43 = vadd.f32 %v550_v59, %v5543_v5 }
 0x21c   : > { %v3495_v21 = vmul.f32 %v3431_v22, %v743_v44  ;;  %v1956_v20 = vsel %vm1955_vm15, %v5086_v2, %v1952_v61  ;;  %v2025_v32 = vadd.f32 0.4994258, %v2024_v40  ;;  %v2050_v9 = vadd.f32 0.0036580483, %v2049_v8 }
 0x21d   : > { %v1961_v63 = vsel %vm6615_vm14, %v1960_v38, %v1956_v20  ;;  %v2014_v27 = vadd.f32 0.18741608, %v2013_v14  ;;  %v2061_v41 = vadd.f32 0.014752088, %v2060_v53  ;;  %v2085_v55 = vmul.f32 %v6626_v16, %v6626_v16 }
 0x21e   : > { %v1962_v10 = vmul.f32 %v1961_v63, %v1937_v31  ;;  %v1997_v49 = vand.u32 2147483647, %v6612_v26  ;;  %v2026_v25 = vmul.f32 %v2025_v32, %v6553_v35  ;;  %v2051_v44 = vmul.f32 %v2050_v9, %v6595_v34 }
 0x21f   : > { %v5088_v0 = vpop.eup %5087  ;;  %v1977_v18 = vmul.f32 %v1976_v29, %v6508_v45  ;;  %v2062_v2 = vmul.f32 %v2061_v41, %v6595_v34  ;;  %v6640_v17 = vmin.f32 %v2085_v55, 16.0  ;;  %v6643_v51 = vmul.f32 0.70710677, %v6629_v43 }
 0x220   : > { %v4549_v37 = vclamps-f32 %v1962_v10, 1.0  ;;  %v1989_v31 = vmul.f32 %v5088_v0, %v6612_v26  ;;  %v1999_v46 = vand.u32 2147483648, %v6612_v26  ;;  %v6647_v47 = vadd.f32 1.0, %v2026_v25 }
 0x221   : > { %v2015_v48 = vmul.f32 %v2014_v27, %v6553_v35  ;;  %v2052_v3 = vadd.f32 0.05243302, %v2051_v44  ;;  %v2063_v45 = vadd.f32 0.112945676, %v2062_v2  ;;  %v2087_v30 = vmul.f32 2.1237322e-06, %v6640_v17 }
 0x222   : > { %v3432_v12 = vadd.f32 1.0, %v4549_v37  ;;  %v1990_v58 = vsub.f32 1.0, %v1989_v31  ;;  %vm6651_vm0 = vcmp.eq.f32.partialorder %v1997_v49, 8.507059e+37  ;;  %5089 = vrcp.f32 %v6647_v47 }
 0x223   : > { %vm1994_vm1 = vweird.f32 %v5088_v0  ;;  %v2053_v52 = vmul.f32 %v2052_v3, %v6595_v34  ;;  %v2064_v60 = vmul.f32 %v2063_v45, %v6595_v34  ;;  %v2125_v35 = vmul.f32 %v6643_v51, %v6643_v51 }
 0x224   : > { %v3496_v22 = vmul.f32 %v3432_v12, %v6590_v1  ;;  %v1991_v50 = vmul.f32 %v5088_v0, %v1990_v58  ;;  %v2088_v7 = vadd.f32 0.00028619796, %v2087_v30  ;;  %v2098_v36 = vmul.f32 3.8918573e-05, %v6640_v17 }
 0x225   : > { %vm1993_vm2 = vweird.f32 %v6612_v26  ;;  %v2016_v19 = vadd.f32 1.1283791, %v2015_v48  ;;  %v2054_v59 = vadd.f32 0.18741608, %v2053_v52  ;;  %v2065_v56 = vadd.f32 0.4994258, %v2064_v60 }
 0x226   : > { %v3546_v11 = vpack.c.bf16 %v3496_v22, %v3495_v21  ;;  %v1992_v14 = vadd.f32 %v5088_v0, %v1991_v50  ;;  %v2089_v61 = vmul.f32 %v2088_v7, %v6640_v17  ;;  %v2099_v38 = vadd.f32 0.001143296, %v2098_v36  ;;  %vm1995_vm3 = vmor %vm1993_vm2, %vm1994_vm1 }
 0x227   : > { %v2000_v40 = vor.u32 1.1754944e-38, %v1999_v46  ;;  %v2066_v1 = vmul.f32 %v2065_v56, %v6595_v34  ;;  %v6666_v8 = vmin.f32 %v2125_v35, 16.0  ;;  %v6669_v29 = vadd.f32 %v599_v54, %v5545_v6 }
 0x228   : > { %v5090_v53 = vpop.eup %5089  ;;  %3578 = vst [vmem:[#allocation2 + $0x68] sm:$0xff] %v3546_v11  ;;  %v1996_v26 = vsel %vm1995_vm3, %v5088_v0, %v1992_v14  ;;  %v2055_v20 = vmul.f32 %v2054_v59, %v6595_v34  ;;  %v2090_v21 = vadd.f32 0.0036580483, %v2089_v61  ;;  %v2100_v32 = vmul.f32 %v2099_v38, %v6640_v17 }
 0x229   : > { %v2001_v9 = vsel %vm6651_vm0, %v2000_v40, %v1996_v26  ;;  %v2017_v63 = vmul.f32 %v2016_v19, %v6526_v28  ;;  %v2029_v27 = vmul.f32 %v5090_v53, %v6647_v47  ;;  %v2037_v41 = vand.u32 2147483647, %v6647_v47 }
 0x22a   : > { %v2002_v55 = vmul.f32 %v2001_v9, %v1977_v18  ;;  %v6678_v23 = vadd.f32 1.0, %v2066_v1  ;;  %v2091_v42 = vmul.f32 %v2090_v21, %v6640_v17  ;;  %v2101_v10 = vadd.f32 0.014752088, %v2100_v32 }
 0x22b   : > { %v2030_v49 = vsub.f32 1.0, %v2029_v27  ;;  %v2039_v34 = vand.u32 2147483648, %v6647_v47  ;;  %v2127_v25 = vmul.f32 2.1237322e-06, %v6666_v8  ;;  %v2138_v44 = vmul.f32 3.8918573e-05, %v6666_v8 }
 0x22c   : > { %v4550_v0 = vclamps-f32 %v2002_v55, 1.0  ;;  %v2056_v2 = vadd.f32 1.1283791, %v2055_v20  ;;  %5091 = vrcp.f32 %v6678_v23  ;;  %v6686_v28 = vmul.f32 0.70710677, %v6669_v29 }
 0x22d   : > { %v2031_v18 = vmul.f32 %v5090_v53, %v2030_v49  ;;  %vm2034_vm4 = vweird.f32 %v5090_v53  ;;  %v2092_v37 = vadd.f32 0.05243302, %v2091_v42  ;;  %v2102_v31 = vmul.f32 %v2101_v10, %v6640_v17  ;;  %v648_v10 = vpop.f32.mrf.mxu2 }
 0x22e   : > { %vm2033_vm5 = vweird.f32 %v6647_v47  ;;  %vm6690_vm6 = vcmp.eq.f32.partialorder %v2037_v41, 8.507059e+37  ;;  %v2128_v48 = vadd.f32 0.00028619796, %v2127_v25  ;;  %v2139_v3 = vadd.f32 0.001143296, %v2138_v44 }
 0x22f   : > { %v3433_v45 = vadd.f32 1.0, %v4550_v0  ;;  %v2032_v30 = vadd.f32 %v5090_v53, %v2031_v18  ;;  %v2040_v12 = vor.u32 1.1754944e-38, %v2039_v34  ;;  %v2103_v58 = vadd.f32 0.112945676, %v2102_v31  ;;  %vm2035_vm7 = vmor %vm2033_vm5, %vm2034_vm4 }
 0x230   : > { %v2057_v62 = vmul.f32 %v2056_v2, %v6578_v4  ;;  %v2129_v52 = vmul.f32 %v2128_v48, %v6666_v8  ;;  %v2140_v60 = vmul.f32 %v2139_v3, %v6666_v8  ;;  %v2165_v47 = vmul.f32 %v6686_v28, %v6686_v28 }
 0x231   : > { %v2036_v35 = vsel %vm2035_vm7, %v5090_v53, %v2032_v30  ;;  %vm2073_vm8 = vweird.f32 %v6678_v23  ;;  %v2077_v22 = vand.u32 2147483647, %v6678_v23  ;;  %v2093_v50 = vmul.f32 %v2092_v37, %v6640_v17 }
 0x232   : > { %v2104_v7 = vmul.f32 %v2103_v58, %v6640_v17  ;;  %v5092_v36 = vpop.eup %5091  ;;  %v2041_v4 = vsel %vm6690_vm6, %v2040_v12, %v2036_v35  ;;  %v2130_v54 = vadd.f32 0.0036580483, %v2129_v52  ;;  %v2141_v19 = vadd.f32 0.014752088, %v2140_v60  ;;  %v697_v12 = vpop.f32.mrf.mxu3 }
 0x233   : > { %v6705_v59 = vmin.f32 %v2165_v47, 16.0  ;;  %v3497_v56 = vmul.f32 %v3433_v45, %v6593_v39  ;;  %v2042_v11 = vmul.f32 %v2041_v4, %v2017_v63  ;;  %v2069_v14 = vmul.f32 %v5092_v36, %v6678_v23 }
 0x234   : > { %v2079_v61 = vand.u32 2147483648, %v6678_v23  ;;  %v2105_v38 = vadd.f32 0.4994258, %v2104_v7  ;;  %v2131_v40 = vmul.f32 %v2130_v54, %v6666_v8  ;;  %v2142_v1 = vmul.f32 %v2141_v19, %v6666_v8 }
 0x235   : > { %v2167_v53 = vmul.f32 2.1237322e-06, %v6705_v59  ;;  %v4551_v26 = vclamps-f32 %v2042_v11, 1.0  ;;  %v2070_v20 = vsub.f32 1.0, %v2069_v14  ;;  %v2094_v21 = vadd.f32 0.18741608, %v2093_v50 }
 0x236   : > { %v2178_v32 = vmul.f32 3.8918573e-05, %v6705_v59  ;;  %v2106_v9 = vmul.f32 %v2105_v38, %v6640_v17  ;;  %v2132_v39 = vadd.f32 0.05243302, %v2131_v40  ;;  %v2143_v63 = vadd.f32 0.112945676, %v2142_v1  ;;  %v552_v1 = vpop.f32.mrf.mxu0 }
 0x237   : > { %v2168_v27 = vadd.f32 0.00028619796, %v2167_v53  ;;  %v3434_v41 = vadd.f32 1.0, %v4551_v26  ;;  %v2071_v55 = vmul.f32 %v5092_v36, %v2070_v20  ;;  %vm2074_vm9 = vweird.f32 %v5092_v36 }
 0x238   : > { %v2179_v42 = vadd.f32 0.001143296, %v2178_v32  ;;  %v6715_v49 = vadd.f32 1.0, %v2106_v9  ;;  %v2133_v34 = vmul.f32 %v2132_v39, %v6666_v8  ;;  %v2144_v25 = vmul.f32 %v2143_v63, %v6666_v8  ;;  %vm2075_vm10 = vmor %vm2073_vm8, %vm2074_vm9 }
 0x239   : > { %v2169_v44 = vmul.f32 %v2168_v27, %v6705_v59  ;;  %v3498_v0 = vmul.f32 %v3434_v41, %v6601_v57  ;;  %v2072_v2 = vadd.f32 %v5092_v36, %v2071_v55  ;;  %v2095_v18 = vmul.f32 %v2094_v21, %v6640_v17  ;;  %v4882_v55 = vld [vmem:[#allocation2 + $0xc] sm:$0xf0] }
 0x23a   : > { %v2180_v37 = vmul.f32 %v2179_v42, %v6705_v59  ;;  %vm2078_vm11 = vcmp.eq.f32.partialorder %v2077_v22, 8.507059e+37  ;;  %v2080_v31 = vor.u32 1.1754944e-38, %v2079_v61  ;;  %5093 = vrcp.f32 %v6715_v49 }
 0x23b   : > { %v649_v46 = vadd.f32 %v648_v10, %v5559_v13  ;;  %v3547_v48 = vpack.c.bf16 %v3498_v0, %v3497_v56  ;;  %v2076_v3 = vsel %vm2075_vm10, %v5092_v36, %v2072_v2  ;;  %v2134_v45 = vadd.f32 0.18741608, %v2133_v34 }
 0x23c   : > { %v2145_v30 = vadd.f32 0.4994258, %v2144_v25  ;;  %v6728_v57 = vmul.f32 0.5, %v6544_v24  ;;  %v2081_v17 = vsel %vm2078_vm11, %v2080_v31, %v2076_v3  ;;  %v6731_v58 = vmul.f32 0.5, %v6609_v33 }
 0x23d   : > { %v2170_v23 = vadd.f32 0.0036580483, %v2169_v44  ;;  %3579 = vst [vmem:[#allocation2 + $0x70] sm:$0xff] %v3547_v48  ;;  %v2082_v52 = vmul.f32 %v2081_v17, %v2057_v62  ;;  %v2096_v60 = vadd.f32 1.1283791, %v2095_v18  ;;  %v2135_v50 = vmul.f32 %v2134_v45, %v6666_v8 }
 0x23e   : > { %v2146_v47 = vmul.f32 %v2145_v30, %v6666_v8  ;;  %v2181_v35 = vadd.f32 0.014752088, %v2180_v37  ;;  %v2117_v22 = vand.u32 2147483647, %v6715_v49  ;;  %v6736_v7 = vmul.f32 0.70710677, %v649_v46 }
 0x23f   : > { %v698_v24 = vadd.f32 %v697_v12, %v5563_v15  ;;  %v2119_v36 = vand.u32 2147483648, %v6715_v49  ;;  %v2171_v33 = vmul.f32 %v2170_v23, %v6705_v59  ;;  %v6745_v19 = vmul.f32 0.5, %v6629_v43  ;;  %v4588_v37 = vld [vmem:[#allocation2] sm:$0xf] }
 0x240   : > { %v6740_v4 = vadd.f32 1.0, %v2146_v47  ;;  %v2182_v62 = vmul.f32 %v2181_v35, %v6705_v59  ;;  %v5094_v54 = vpop.eup %5093  ;;  %v6748_v56 = vmul.f32 0.5, %v6669_v29  ;;  %v2205_v8 = vmul.f32 %v6736_v7, %v6736_v7 }
 0x241   : > { %v6752_v11 = vmul.f32 0.70710677, %v698_v24  ;;  %v4552_v14 = vclamps-f32 %v2082_v52, 1.0  ;;  %v2097_v61 = vmul.f32 %v2096_v60, %v6626_v16  ;;  %v2109_v38 = vmul.f32 %v5094_v54, %v6715_v49 }
 0x242   : > { %v6756_v40 = vmul.f32 0.5, %v649_v46  ;;  %vm2113_vm12 = vweird.f32 %v6715_v49  ;;  %vm6759_vm13 = vcmp.eq.f32.partialorder %v2117_v22, 8.507059e+37  ;;  %v2136_v29 = vadd.f32 1.1283791, %v2135_v50 }
 0x243   : > { %5095 = vrcp.f32 %v6740_v4  ;;  %v2110_v53 = vsub.f32 1.0, %v2109_v38  ;;  %v2120_v26 = vor.u32 1.1754944e-38, %v2119_v36  ;;  %v2172_v20 = vadd.f32 0.05243302, %v2171_v33 }
 0x244   : > { %v2183_v21 = vadd.f32 0.112945676, %v2182_v62  ;;  %v6764_v32 = vmin.f32 %v2205_v8, 16.0  ;;  %v6766_v16 = vmul.f32 0.5, %v698_v24  ;;  %v2245_v9 = vmul.f32 %v6752_v11, %v6752_v11 }
 0x245   : > { %v6771_v39 = vadd.f32 %v552_v1, %v5543_v5  ;;  %v3435_v63 = vadd.f32 1.0, %v4552_v14  ;;  %v2111_v27 = vmul.f32 %v5094_v54, %v2110_v53  ;;  %vm2114_vm14 = vweird.f32 %v5094_v54 }
 0x246   : > { %v2184_v41 = vmul.f32 %v2183_v21, %v6705_v59  ;;  %v6775_v42 = vmul.f32 %v2136_v29, %v6643_v51  ;;  %v2207_v10 = vmul.f32 2.1237322e-06, %v6764_v32  ;;  %v2218_v34 = vmul.f32 3.8918573e-05, %v6764_v32  ;;  %vm2115_vm0 = vmor %vm2113_vm12, %vm2114_vm14 }
 0x247   : > { %v6779_v25 = vmin.f32 %v2245_v9, 16.0  ;;  %v2112_v44 = vadd.f32 %v5094_v54, %v2111_v27  ;;  %vm2153_vm15 = vweird.f32 %v6740_v4  ;;  %v2157_v0 = vand.u32 2147483647, %v6740_v4 }
 0x248   : > { %v2173_v2 = vmul.f32 %v2172_v20, %v6705_v59  ;;  %v2185_v18 = vadd.f32 0.4994258, %v2184_v41  ;;  %v2208_v51 = vadd.f32 0.00028619796, %v2207_v10  ;;  %v2219_v46 = vadd.f32 0.001143296, %v2218_v34 }
 0x249   : > { %v5096_v31 = vpop.eup %5095  ;;  %v2247_v48 = vmul.f32 2.1237322e-06, %v6779_v25  ;;  %v4589_v3 = vor.u32 %v4882_v55, %v4588_v37  ;;  %v2116_v45 = vsel %vm2115_vm0, %v5094_v54, %v2112_v44  ;;  %v2159_v12 = vand.u32 2147483648, %v6740_v4  ;;  %v4590_v34 = vld [vmem:[#allocation2 + $0x10] sm:$0xf0] }
 0x24a   : > { %v2149_v30 = vmul.f32 %v5096_v31, %v6740_v4  ;;  %v6790_v17 = vmul.f32 0.70710677, %v6771_v39  ;;  %v2121_v23 = vsel %vm6759_vm13, %v2120_v26, %v2116_v45  ;;  %v2186_v52 = vmul.f32 %v2185_v18, %v6705_v59 }
 0x24b   : > { %v2209_v49 = vmul.f32 %v2208_v51, %v6764_v32  ;;  %v2220_v60 = vmul.f32 %v2219_v46, %v6764_v32  ;;  %4057 = vmatmul.bf16.vlgmr.msrb.gmra.mxu0 %v4589_v3  ;;  %v2122_v47 = vmul.f32 %v2121_v23, %v2097_v61  ;;  %v2174_v22 = vadd.f32 0.18741608, %v2173_v2 }
 0x24c   : > { %v2150_v35 = vsub.f32 1.0, %v2149_v30  ;;  %v2248_v50 = vadd.f32 0.00028619796, %v2247_v48  ;;  %vm2154_vm1 = vweird.f32 %v5096_v31  ;;  %v6797_v24 = vadd.f32 1.0, %v2186_v52 }
 0x24d   : > { %v2210_v36 = vadd.f32 0.0036580483, %v2209_v49  ;;  %v2221_v33 = vadd.f32 0.014752088, %v2220_v60  ;;  %v4553_v62 = vclamps-f32 %v2122_v47, 1.0  ;;  %v3499_v38 = vmul.f32 %v3435_v63, %v6728_v57  ;;  %vm2155_vm3 = vmor %vm2153_vm15, %vm2154_vm1  ;;  %v601_v63 = vpop.f32.mrf.mxu1 }
 0x24e   : > { %v2151_v54 = vmul.f32 %v5096_v31, %v2150_v35  ;;  %v2249_v8 = vmul.f32 %v2248_v50, %v6779_v25  ;;  %v2258_v14 = vmul.f32 3.8918573e-05, %v6779_v25  ;;  %vm6802_vm2 = vcmp.eq.f32.partialorder %v2157_v0, 8.507059e+37 }
 0x24f   : > { %5097 = vrcp.f32 %v6797_v24  ;;  %v2285_v61 = vmul.f32 %v6790_v17, %v6790_v17  ;;  %v3436_v43 = vadd.f32 1.0, %v4553_v62  ;;  %v2211_v53 = vmul.f32 %v2210_v36, %v6764_v32 }
 0x250   : > { %v2152_v29 = vadd.f32 %v5096_v31, %v2151_v54  ;;  %v2222_v26 = vmul.f32 %v2221_v33, %v6764_v32  ;;  %v2160_v57 = vor.u32 1.1754944e-38, %v2159_v12  ;;  %v2175_v20 = vmul.f32 %v2174_v22, %v6705_v59 }
 0x251   : > { %v2250_v21 = vadd.f32 0.0036580483, %v2249_v8  ;;  %v2259_v9 = vadd.f32 0.001143296, %v2258_v14  ;;  %v3500_v27 = vmul.f32 %v3436_v43, %v6731_v58  ;;  %v2212_v55 = vadd.f32 0.05243302, %v2211_v53 }
 0x252   : > { %v2156_v41 = vsel %vm2155_vm3, %v5096_v31, %v2152_v29  ;;  %v2223_v10 = vadd.f32 0.112945676, %v2222_v26  ;;  %v6820_v2 = vmin.f32 %v2285_v61, 16.0  ;;  %v6825_v58 = vadd.f32 %v601_v63, %v5545_v6  ;;  %v4880_v31 = vld [vmem:[#allocation2 + $0x4] sm:$0xf] }
 0x253   : > { %v2161_v44 = vsel %vm6802_vm2, %v2160_v57, %v2156_v41  ;;  %v2251_v0 = vmul.f32 %v2250_v21, %v6779_v25  ;;  %v2260_v4 = vmul.f32 %v2259_v9, %v6779_v25  ;;  %v3548_v18 = vpack.c.bf16 %v3500_v27, %v3499_v38 }
 0x254   : > { %v2213_v59 = vmul.f32 %v2212_v55, %v6764_v32  ;;  %v2224_v37 = vmul.f32 %v2223_v10, %v6764_v32  ;;  %v2287_v3 = vmul.f32 2.1237322e-06, %v6820_v2  ;;  %v4593_v45 = vor.u32 %v4880_v31, %v4590_v34  ;;  %v650_v55 = vpop.f32.mrf.mxu2 }
 0x255   : > { %v5098_v51 = vpop.eup %5097  ;;  %v2252_v46 = vadd.f32 0.05243302, %v2251_v0  ;;  %v2261_v48 = vadd.f32 0.014752088, %v2260_v4  ;;  %3580 = vst [vmem:[#allocation2 + $0x78] sm:$0xff] %v3548_v18  ;;  %v2162_v30 = vmul.f32 %v2161_v44, %v6775_v42  ;;  %v2199_v36 = vand.u32 2147483648, %v6797_v24 }
 0x256   : > { %v2176_v12 = vadd.f32 1.1283791, %v2175_v20  ;;  %v2189_v23 = vmul.f32 %v5098_v51, %v6797_v24  ;;  %v2214_v52 = vadd.f32 0.18741608, %v2213_v59  ;;  %v2225_v49 = vadd.f32 0.4994258, %v2224_v37  ;;  %4106 = vmatmul.bf16.vlgmr.msrb.gmra.mxu1 %v4593_v45 }
 0x257   : > { %v2253_v60 = vmul.f32 %v2252_v46, %v6779_v25  ;;  %v2262_v47 = vmul.f32 %v2261_v48, %v6779_v25  ;;  %v2288_v35 = vadd.f32 0.00028619796, %v2287_v3  ;;  %v2197_v50 = vand.u32 2147483647, %v6797_v24 }
 0x258   : > { %v2190_v22 = vsub.f32 1.0, %v2189_v23  ;;  %v2298_v33 = vmul.f32 3.8918573e-05, %v6820_v2  ;;  %v2226_v42 = vmul.f32 %v2225_v49, %v6764_v32  ;;  %v4554_v14 = vclamps-f32 %v2162_v30, 1.0 }
 0x259   : > { %v2254_v62 = vadd.f32 0.18741608, %v2253_v60  ;;  %v2263_v54 = vadd.f32 0.112945676, %v2262_v47  ;;  %v2289_v8 = vmul.f32 %v2288_v35, %v6820_v2  ;;  %vm2194_vm4 = vweird.f32 %v5098_v51 }
 0x25a   : > { %v2191_v38 = vmul.f32 %v5098_v51, %v2190_v22  ;;  %v2299_v1 = vadd.f32 0.001143296, %v2298_v33  ;;  %v2215_v61 = vmul.f32 %v2214_v52, %v6764_v32  ;;  %v6838_v43 = vadd.f32 1.0, %v2226_v42 }
 0x25b   : > { %v2264_v29 = vmul.f32 %v2263_v54, %v6779_v25  ;;  %v2290_v53 = vadd.f32 0.0036580483, %v2289_v8  ;;  %v2177_v26 = vmul.f32 %v2176_v12, %v6686_v28  ;;  %vm2193_vm5 = vweird.f32 %v6797_v24 }
 0x25c   : > { %v2192_v57 = vadd.f32 %v5098_v51, %v2191_v38  ;;  %v2300_v20 = vmul.f32 %v2299_v1, %v6820_v2  ;;  %vm2195_vm6 = vmor %vm2193_vm5, %vm2194_vm4  ;;  %vm2198_vm7 = vcmp.eq.f32.partialorder %v2197_v50, 8.507059e+37  ;;  %v2200_v21 = vor.u32 1.1754944e-38, %v2199_v36 }
 0x25d   : > { %5099 = vrcp.f32 %v6838_v43  ;;  %v2255_v9 = vmul.f32 %v2254_v62, %v6779_v25  ;;  %v3437_v32 = vadd.f32 1.0, %v4554_v14  ;;  %v2265_v27 = vadd.f32 0.4994258, %v2264_v29  ;;  %v555_v62 = vpop.f32.mrf.mxu0 }
 0x25e   : > { %v2196_v63 = vsel %vm2195_vm6, %v5098_v51, %v2192_v57  ;;  %v2291_v41 = vmul.f32 %v2290_v53, %v6820_v2  ;;  %v2216_v28 = vadd.f32 1.1283791, %v2215_v61  ;;  %v2237_v34 = vand.u32 2147483647, %v6838_v43 }
 0x25f   : > { %v2201_v10 = vsel %vm2198_vm7, %v2200_v21, %v2196_v63  ;;  %v2301_v24 = vadd.f32 0.014752088, %v2300_v20  ;;  %v2239_v0 = vand.u32 2147483648, %v6838_v43  ;;  %v2266_v4 = vmul.f32 %v2265_v27, %v6779_v25 }
 0x260   : > { %v2202_v44 = vmul.f32 %v2201_v10, %v2177_v26  ;;  %v2292_v18 = vadd.f32 0.05243302, %v2291_v41  ;;  %v2256_v59 = vadd.f32 1.1283791, %v2255_v9  ;;  %v6852_v31 = vmul.f32 0.70710677, %v6825_v58 }
 0x261   : > { %v2302_v37 = vmul.f32 %v2301_v24, %v6820_v2  ;;  %v6855_v51 = vadd.f32 %v650_v55, %v5559_v13  ;;  %v3501_v46 = vmul.f32 %v3437_v32, %v6745_v19  ;;  %v6858_v3 = vadd.f32 1.0, %v2266_v4  ;;  %v699_v19 = vpop.f32.mrf.mxu3 }
 0x262   : > { %v4555_v48 = vclamps-f32 %v2202_v44, 1.0  ;;  %v2293_v45 = vmul.f32 %v2292_v18, %v6820_v2  ;;  %v2217_v25 = vmul.f32 %v2216_v28, %v6736_v7  ;;  %v2325_v23 = vmul.f32 %v6852_v31, %v6852_v31 }
 0x263   : > { %v5100_v30 = vpop.eup %5099  ;;  %v2303_v12 = vadd.f32 0.112945676, %v2302_v37  ;;  %v6865_v52 = vmul.f32 0.70710677, %v6855_v51  ;;  %vm2233_vm8 = vweird.f32 %v6838_v43  ;;  %5101 = vrcp.f32 %v6858_v3 }
 0x264   : > { %v3438_v49 = vadd.f32 1.0, %v4555_v48  ;;  %v2229_v60 = vmul.f32 %v5100_v30, %v6838_v43  ;;  %vm6870_vm9 = vcmp.eq.f32.partialorder %v2237_v34, 8.507059e+37  ;;  %v2240_v7 = vor.u32 1.1754944e-38, %v2239_v0 }
 0x265   : > { %v6875_v35 = vmul.f32 %v2256_v59, %v6752_v11  ;;  %v2294_v22 = vadd.f32 0.18741608, %v2293_v45  ;;  %v2304_v33 = vmul.f32 %v2303_v12, %v6820_v2  ;;  %v6879_v42 = vmin.f32 %v2325_v23, 16.0 }
 0x266   : > { %v3502_v50 = vmul.f32 %v3438_v49, %v6748_v56  ;;  %v2230_v36 = vsub.f32 1.0, %v2229_v60  ;;  %vm2234_vm10 = vweird.f32 %v5100_v30  ;;  %v2277_v54 = vand.u32 2147483647, %v6858_v3 }
 0x267   : > { %v2365_v8 = vmul.f32 %v6865_v52, %v6865_v52  ;;  %v6885_v14 = vadd.f32 %v699_v19, %v5563_v15  ;;  %v2305_v1 = vadd.f32 0.4994258, %v2304_v33  ;;  %v2327_v56 = vmul.f32 2.1237322e-06, %v6879_v42  ;;  %vm2235_vm12 = vmor %vm2233_vm8, %vm2234_vm10 }
 0x268   : > { %v3549_v11 = vpack.c.bf16 %v3502_v50, %v3501_v46  ;;  %v2231_v38 = vmul.f32 %v5100_v30, %v2230_v36  ;;  %vm2273_vm11 = vweird.f32 %v6858_v3  ;;  %v2338_v61 = vmul.f32 3.8918573e-05, %v6879_v42 }
 0x269   : > { %v6890_v29 = vmin.f32 %v2365_v8, 16.0  ;;  %v6893_v53 = vadd.f32 %v555_v62, %v5543_v5  ;;  %v5102_v26 = vpop.eup %5101  ;;  %v2295_v20 = vmul.f32 %v2294_v22, %v6820_v2  ;;  %v2306_v21 = vmul.f32 %v2305_v1, %v6820_v2 }
 0x26a   : > { %3581 = vst [vmem:[#allocation2 + $0x80] sm:$0xff] %v3549_v11  ;;  %v2232_v57 = vadd.f32 %v5100_v30, %v2231_v38  ;;  %v2328_v9 = vadd.f32 0.00028619796, %v2327_v56  ;;  %v2269_v32 = vmul.f32 %v5102_v26, %v6858_v3  ;;  %vm6901_vm13 = vcmp.eq.f32.partialorder %v2277_v54, 8.507059e+37 }
 0x26b   : > { %v2279_v27 = vand.u32 2147483648, %v6858_v3  ;;  %v2339_v41 = vadd.f32 0.001143296, %v2338_v61  ;;  %v6906_v10 = vadd.f32 1.0, %v2306_v21  ;;  %v2367_v2 = vmul.f32 2.1237322e-06, %v6890_v29 }
 0x26c   : > { %v2236_v55 = vsel %vm2235_vm12, %v5100_v30, %v2232_v57  ;;  %v2329_v28 = vmul.f32 %v2328_v9, %v6879_v42  ;;  %v2270_v34 = vsub.f32 1.0, %v2269_v32  ;;  %v2378_v44 = vmul.f32 3.8918573e-05, %v6890_v29 }
 0x26d   : > { %v2241_v43 = vsel %vm6870_vm9, %v2240_v7, %v2236_v55  ;;  %v2340_v24 = vmul.f32 %v2339_v41, %v6879_v42  ;;  %v2296_v4 = vadd.f32 1.1283791, %v2295_v20  ;;  %5103 = vrcp.f32 %v6906_v10 }
 0x26e   : > { %v2242_v0 = vmul.f32 %v2241_v43, %v2217_v25  ;;  %v6916_v18 = vmul.f32 0.70710677, %v6885_v14  ;;  %v2271_v59 = vmul.f32 %v5102_v26, %v2270_v34  ;;  %vm2274_vm14 = vweird.f32 %v5102_v26 }
 0x26f   : > { %v2330_v37 = vadd.f32 0.0036580483, %v2329_v28  ;;  %v2341_v46 = vadd.f32 0.014752088, %v2340_v24  ;;  %v2280_v45 = vor.u32 1.1754944e-38, %v2279_v27  ;;  %v2319_v49 = vand.u32 2147483648, %v6906_v10  ;;  %vm2275_vm15 = vmor %vm2273_vm11, %vm2274_vm14 }
 0x270   : > { %v4556_v48 = vclamps-f32 %v2242_v0, 1.0  ;;  %v2368_v30 = vadd.f32 0.00028619796, %v2367_v2  ;;  %v2379_v12 = vadd.f32 0.001143296, %v2378_v44  ;;  %v2272_v23 = vadd.f32 %v5102_v26, %v2271_v59 }
 0x271   : > { %v2331_v60 = vmul.f32 %v2330_v37, %v6879_v42  ;;  %v2342_v25 = vmul.f32 %v2341_v46, %v6879_v42  ;;  %v2297_v19 = vmul.f32 %v2296_v4, %v6790_v17  ;;  %v2405_v22 = vmul.f32 %v6916_v18, %v6916_v18 }
 0x272   : > { %v2369_v47 = vmul.f32 %v2368_v30, %v6890_v29  ;;  %v2380_v7 = vmul.f32 %v2379_v12, %v6890_v29  ;;  %v2276_v50 = vsel %vm2275_vm15, %v5102_v26, %v2272_v23  ;;  %vm2313_vm0 = vweird.f32 %v6906_v10 }
 0x273   : > { %v2317_v36 = vand.u32 2147483647, %v6906_v10  ;;  %v2332_v33 = vadd.f32 0.05243302, %v2331_v60  ;;  %v2343_v62 = vadd.f32 0.112945676, %v2342_v25  ;;  %v5104_v54 = vpop.eup %5103  ;;  %v2281_v3 = vsel %vm6901_vm13, %v2280_v45, %v2276_v50 }
 0x274   : > { %v3439_v8 = vadd.f32 1.0, %v4556_v48  ;;  %v2370_v17 = vadd.f32 0.0036580483, %v2369_v47  ;;  %v2381_v11 = vadd.f32 0.014752088, %v2380_v7  ;;  %v2282_v38 = vmul.f32 %v2281_v3, %v6875_v35 }
 0x275   : > { %v2309_v1 = vmul.f32 %v5104_v54, %v6906_v10  ;;  %v2320_v56 = vor.u32 1.1754944e-38, %v2319_v49  ;;  %v2333_v61 = vmul.f32 %v2332_v33, %v6879_v42  ;;  %v2344_v26 = vmul.f32 %v2343_v62, %v6879_v42  ;;  %v604_v33 = vpop.f32.mrf.mxu1 }
 0x276   : > { %v2371_v57 = vmul.f32 %v2370_v17, %v6890_v29  ;;  %v2382_v20 = vmul.f32 %v2381_v11, %v6890_v29  ;;  %v6938_v21 = vmin.f32 %v2405_v22, 16.0  ;;  %v4557_v9 = vclamps-f32 %v2282_v38, 1.0 }
 0x277   : > { %v2310_v32 = vsub.f32 1.0, %v2309_v1  ;;  %v2334_v63 = vadd.f32 0.18741608, %v2333_v61  ;;  %v6941_v27 = vmul.f32 0.70710677, %v6893_v53  ;;  %v3503_v35 = vmul.f32 %v3439_v8, %v6756_v40 }
 0x278   : > { %v2345_v41 = vadd.f32 0.4994258, %v2344_v26  ;;  %v2372_v55 = vadd.f32 0.05243302, %v2371_v57  ;;  %v2383_v28 = vadd.f32 0.112945676, %v2382_v20  ;;  %vm2314_vm1 = vweird.f32 %v5104_v54 }
 0x279   : > { %v3440_v2 = vadd.f32 1.0, %v4557_v9  ;;  %v2311_v43 = vmul.f32 %v5104_v54, %v2310_v32  ;;  %v2407_v34 = vmul.f32 2.1237322e-06, %v6938_v21  ;;  %v2335_v24 = vmul.f32 %v2334_v63, %v6879_v42  ;;  %vm2315_vm2 = vmor %vm2313_vm0, %vm2314_vm1  ;;  %v4883_v20 = vld [vmem:[#allocation2 + $0x14] sm:$0xf0] }
 0x27a   : > { %v2346_v44 = vmul.f32 %v2345_v41, %v6879_v42  ;;  %v2373_v0 = vmul.f32 %v2372_v55, %v6890_v29  ;;  %v2384_v4 = vmul.f32 %v2383_v28, %v6890_v29  ;;  %v2418_v46 = vmul.f32 3.8918573e-05, %v6938_v21  ;;  %v4596_v41 = vld [vmem:[#allocation2 + $0x8] sm:$0xf]  ;;  %v4598_v55 = vld [vmem:[#allocation2 + $0x18] sm:$0xf0] }
 0x27b   : > { %v3504_v59 = vmul.f32 %v3440_v2, %v6766_v16  ;;  %v2312_v37 = vadd.f32 %v5104_v54, %v2311_v43  ;;  %v2408_v40 = vadd.f32 0.00028619796, %v2407_v34  ;;  %v2445_v42 = vmul.f32 %v6941_v27, %v6941_v27  ;;  %v4881_v43 = vld [vmem:[#allocation2 + $0xc] sm:$0xf] }
 0x27c   : > { %v6953_v48 = vadd.f32 1.0, %v2346_v44  ;;  %v2374_v45 = vadd.f32 0.18741608, %v2373_v0  ;;  %v2385_v30 = vadd.f32 0.4994258, %v2384_v4  ;;  %vm2318_vm3 = vcmp.eq.f32.partialorder %v2317_v36, 8.507059e+37 }
 0x27d   : > { %v3550_v12 = vpack.c.bf16 %v3504_v59, %v3503_v35  ;;  %v2316_v23 = vsel %vm2315_vm2, %v5104_v54, %v2312_v37  ;;  %v2409_v49 = vmul.f32 %v2408_v40, %v6938_v21  ;;  %v2336_v25 = vadd.f32 1.1283791, %v2335_v24 }
 0x27e   : > { %v2321_v16 = vsel %vm2318_vm3, %v2320_v56, %v2316_v23  ;;  %5105 = vrcp.f32 %v6953_v48  ;;  %v2375_v10 = vmul.f32 %v2374_v45, %v6890_v29  ;;  %v2386_v47 = vmul.f32 %v2385_v30, %v6890_v29 }
 0x27f   : > { %3582 = vst [vmem:[#allocation2 + $0x88] sm:$0xff] %v3550_v12  ;;  %v2322_v60 = vmul.f32 %v2321_v16, %v2297_v19  ;;  %v2410_v7 = vadd.f32 0.0036580483, %v2409_v49  ;;  %v2419_v22 = vadd.f32 0.001143296, %v2418_v46  ;;  %v6961_v50 = vmin.f32 %v2445_v42, 16.0 }
 0x280   : > { %v2357_v36 = vand.u32 2147483647, %v6953_v48  ;;  %v2359_v54 = vand.u32 2147483648, %v6953_v48  ;;  %v6965_v8 = vadd.f32 1.0, %v2386_v47  ;;  %v2376_v3 = vadd.f32 1.1283791, %v2375_v10 }
 0x281   : > { %v4558_v62 = vclamps-f32 %v2322_v60, 1.0  ;;  %v2411_v19 = vmul.f32 %v2410_v7, %v6938_v21  ;;  %v2420_v17 = vmul.f32 %v2419_v22, %v6938_v21  ;;  %v2447_v11 = vmul.f32 2.1237322e-06, %v6961_v50 }
 0x282   : > { %v6971_v29 = vmul.f32 0.5, %v6771_v39  ;;  %5107 = vrcp.f32 %v6965_v8  ;;  %v2458_v38 = vmul.f32 3.8918573e-05, %v6961_v50  ;;  %v6976_v1 = vadd.f32 %v604_v33, %v5545_v6 }
 0x283   : > { %v6979_v61 = vmul.f32 0.5, %v6825_v58  ;;  %v2337_v26 = vmul.f32 %v2336_v25, %v6852_v31  ;;  %vm2353_vm4 = vweird.f32 %v6953_v48  ;;  %v2412_v57 = vadd.f32 0.05243302, %v2411_v19 }
 0x284   : > { %v5106_v56 = vpop.eup %5105  ;;  %v6983_v9 = vadd.f32 1.0, %v4558_v62  ;;  %vm6986_vm5 = vcmp.eq.f32.partialorder %v2357_v36, 8.507059e+37  ;;  %v2360_v63 = vor.u32 1.1754944e-38, %v2359_v54  ;;  %v2421_v35 = vadd.f32 0.014752088, %v2420_v17 }
 0x285   : > { %v2349_v39 = vmul.f32 %v5106_v56, %v6953_v48  ;;  %v6991_v58 = vmul.f32 %v2376_v3, %v6865_v52  ;;  %v2399_v31 = vand.u32 2147483648, %v6965_v8  ;;  %v2413_v28 = vmul.f32 %v2412_v57, %v6938_v21  ;;  %v653_v3 = vpop.f32.mrf.mxu2 }
 0x286   : > { %v2448_v2 = vadd.f32 0.00028619796, %v2447_v11  ;;  %v2422_v24 = vmul.f32 %v2421_v35, %v6938_v21  ;;  %v2459_v44 = vadd.f32 0.001143296, %v2458_v38  ;;  %v6997_v0 = vmul.f32 0.70710677, %v6976_v1 }
 0x287   : > { %v2350_v34 = vsub.f32 1.0, %v2349_v39  ;;  %vm2354_vm6 = vweird.f32 %v5106_v56  ;;  %vm2393_vm7 = vweird.f32 %v6965_v8  ;;  %v4597_v52 = vor.u32 %v4883_v20, %v4596_v41 }
 0x288   : > { %v2449_v4 = vmul.f32 %v2448_v2, %v6961_v50  ;;  %v4601_v59 = vor.u32 %v4881_v43, %v4598_v55  ;;  %v5108_v37 = vpop.eup %5107  ;;  %v2423_v46 = vadd.f32 0.112945676, %v2422_v24  ;;  %v2460_v45 = vmul.f32 %v2459_v44, %v6961_v50  ;;  %vm2355_vm8 = vmor %vm2353_vm4, %vm2354_vm6 }
 0x289   : > { %v2351_v40 = vmul.f32 %v5106_v56, %v2350_v34  ;;  %v2485_v30 = vmul.f32 %v6997_v0, %v6997_v0  ;;  %v2389_v42 = vmul.f32 %v5108_v37, %v6965_v8  ;;  %v2397_v12 = vand.u32 2147483647, %v6965_v8  ;;  %4155 = vmatmul.bf16.vlgmr.msrb.gmra.mxu2 %v4597_v52 }
 0x28a   : > { %v2414_v23 = vadd.f32 0.18741608, %v2413_v28  ;;  %v2450_v49 = vadd.f32 0.0036580483, %v2449_v4  ;;  %4204 = vmatmul.bf16.vlgmr.msrb.gmra.mxu3 %v4601_v59  ;;  %v2424_v60 = vmul.f32 %v2423_v46, %v6938_v21  ;;  %v2461_v25 = vadd.f32 0.014752088, %v2460_v45 }
 0x28b   : > { %v2352_v16 = vadd.f32 %v5106_v56, %v2351_v40  ;;  %v7007_v10 = vmin.f32 %v2485_v30, 16.0  ;;  %v2390_v47 = vsub.f32 1.0, %v2389_v42  ;;  %vm2394_vm9 = vweird.f32 %v5108_v37 }
 0x28c   : > { %v2400_v7 = vor.u32 1.1754944e-38, %v2399_v31  ;;  %v2451_v22 = vmul.f32 %v2450_v49, %v6961_v50  ;;  %v2425_v62 = vadd.f32 0.4994258, %v2424_v60  ;;  %v2462_v36 = vmul.f32 %v2461_v25, %v6961_v50  ;;  %vm2395_vm10 = vmor %vm2393_vm7, %vm2394_vm9 }
 0x28d   : > { %v2356_v33 = vsel %vm2355_vm8, %v5106_v56, %v2352_v16  ;;  %v2487_v54 = vmul.f32 2.1237322e-06, %v7007_v10  ;;  %v2391_v17 = vmul.f32 %v5108_v37, %v2390_v47  ;;  %v2415_v11 = vmul.f32 %v2414_v23, %v6938_v21 }
 0x28e   : > { %v2361_v19 = vsel %vm6986_vm5, %v2360_v63, %v2356_v33  ;;  %v2452_v48 = vadd.f32 0.05243302, %v2451_v22  ;;  %v2426_v57 = vmul.f32 %v2425_v62, %v6938_v21  ;;  %v2463_v20 = vadd.f32 0.112945676, %v2462_v36 }
 0x28f   : > { %v2362_v38 = vmul.f32 %v2361_v19, %v2337_v26  ;;  %v2488_v39 = vadd.f32 0.00028619796, %v2487_v54  ;;  %v2392_v35 = vadd.f32 %v5108_v37, %v2391_v17  ;;  %v2498_v41 = vmul.f32 3.8918573e-05, %v7007_v10 }
 0x290   : > { %v2453_v56 = vmul.f32 %v2452_v48, %v6961_v50  ;;  %v654_v55 = vadd.f32 %v653_v3, %v5559_v13  ;;  %v7025_v32 = vadd.f32 1.0, %v2426_v57  ;;  %v2464_v26 = vmul.f32 %v2463_v20, %v6961_v50 }
 0x291   : > { %v4559_v31 = vclamps-f32 %v2362_v38, 1.0  ;;  %v2489_v21 = vmul.f32 %v2488_v39, %v7007_v10  ;;  %v2396_v63 = vsel %vm2395_vm10, %v5108_v37, %v2392_v35  ;;  %vm2398_vm11 = vcmp.eq.f32.partialorder %v2397_v12, 8.507059e+37 }
 0x292   : > { %v2454_v28 = vadd.f32 0.18741608, %v2453_v56  ;;  %v2499_v2 = vadd.f32 0.001143296, %v2498_v41  ;;  %v3505_v43 = vmul.f32 %v6983_v9, %v6971_v29  ;;  %v2401_v24 = vsel %vm2398_vm11, %v2400_v7, %v2396_v63  ;;  %v557_v7 = vpop.f32.mrf.mxu0 }
 0x293   : > { %v3442_v34 = vadd.f32 1.0, %v4559_v31  ;;  %5109 = vrcp.f32 %v7025_v32  ;;  %v2402_v8 = vmul.f32 %v2401_v24, %v6991_v58  ;;  %v2416_v44 = vadd.f32 1.1283791, %v2415_v11 }
 0x294   : > { %v7033_v4 = vmul.f32 0.70710677, %v654_v55  ;;  %v2465_v59 = vadd.f32 0.4994258, %v2464_v26  ;;  %v2490_v40 = vadd.f32 0.0036580483, %v2489_v21  ;;  %v2500_v37 = vmul.f32 %v2499_v2, %v7007_v10 }
 0x295   : > { %v3506_v52 = vmul.f32 %v3442_v34, %v6979_v61  ;;  %v755_v46 = vmul.f32 0.5, %v6855_v51  ;;  %v7039_v45 = vmul.f32 0.5, %v6885_v14  ;;  %v7042_v29 = vmul.f32 0.5, %v6893_v53  ;;  %v702_v14 = vpop.f32.mrf.mxu3 }
 0x296   : > { %v2455_v9 = vmul.f32 %v2454_v28, %v6961_v50  ;;  %v2466_v30 = vmul.f32 %v2465_v59, %v6961_v50  ;;  %v2491_v42 = vmul.f32 %v2490_v40, %v7007_v10  ;;  %v2501_v61 = vadd.f32 0.014752088, %v2500_v37 }
 0x297   : > { %v3551_v58 = vpack.c.bf16 %v3506_v52, %v3505_v43  ;;  %v4560_v12 = vclamps-f32 %v2402_v8, 1.0  ;;  %v2417_v23 = vmul.f32 %v2416_v44, %v6916_v18  ;;  %v7049_v49 = vmul.f32 0.5, %v6976_v1 }
 0x298   : > { %v2525_v51 = vmul.f32 %v7033_v4, %v7033_v4  ;;  %v2437_v16 = vand.u32 2147483647, %v7025_v32  ;;  %v7054_v60 = vadd.f32 1.0, %v2466_v30  ;;  %v2502_v50 = vmul.f32 %v2501_v61, %v7007_v10 }
 0x299   : > { %v5110_v53 = vpop.eup %5109  ;;  %3583 = vst [vmem:[#allocation2 + $0x90] sm:$0xff] %v3551_v58  ;;  %v7057_v25 = vmul.f32 0.5, %v654_v55  ;;  %vm2433_vm12 = vweird.f32 %v7025_v32  ;;  %v2492_v18 = vadd.f32 0.05243302, %v2491_v42  ;;  %v2439_v22 = vand.u32 2147483648, %v7025_v32 }
 0x29a   : > { %v2429_v47 = vmul.f32 %v5110_v53, %v7025_v32  ;;  %v7061_v1 = vmin.f32 %v2525_v51, 16.0  ;;  %v2456_v33 = vadd.f32 1.1283791, %v2455_v9  ;;  %5111 = vrcp.f32 %v7054_v60 }
 0x29b   : > { %v703_v62 = vadd.f32 %v702_v14, %v5563_v15  ;;  %v3443_v36 = vadd.f32 1.0, %v4560_v12  ;;  %v2503_v3 = vadd.f32 0.112945676, %v2502_v50  ;;  %vm2434_vm13 = vweird.f32 %v5110_v53 }
 0x29c   : > { %v2430_v54 = vsub.f32 1.0, %v2429_v47  ;;  %v2527_v19 = vmul.f32 2.1237322e-06, %v7061_v1  ;;  %vm7067_vm14 = vcmp.eq.f32.partialorder %v2437_v16, 8.507059e+37  ;;  %v2538_v11 = vmul.f32 3.8918573e-05, %v7061_v1  ;;  %vm2435_vm15 = vmor %vm2433_vm12, %vm2434_vm13 }
 0x29d   : > { %v7073_v48 = vadd.f32 %v557_v7, %v5543_v5  ;;  %v2493_v57 = vmul.f32 %v2492_v18, %v7007_v10  ;;  %v2504_v20 = vmul.f32 %v2503_v3, %v7007_v10  ;;  %v2440_v35 = vor.u32 1.1754944e-38, %v2439_v22 }
 0x29e   : > { %v2431_v38 = vmul.f32 %v5110_v53, %v2430_v54  ;;  %v2528_v39 = vadd.f32 0.00028619796, %v2527_v19  ;;  %v2457_v56 = vmul.f32 %v2456_v33, %v6941_v27  ;;  %v2539_v41 = vadd.f32 0.001143296, %v2538_v11 }
 0x29f   : > { %v7078_v55 = vmul.f32 0.70710677, %v703_v62  ;;  %v7080_v31 = vmul.f32 %v3443_v36, %v755_v46  ;;  %v2505_v21 = vadd.f32 0.4994258, %v2504_v20  ;;  %vm2473_vm0 = vweird.f32 %v7054_v60 }
 0x2a0   : > { %v2432_v26 = vadd.f32 %v5110_v53, %v2431_v38  ;;  %v2529_v63 = vmul.f32 %v2528_v39, %v7061_v1  ;;  %v5112_v28 = vpop.eup %5111  ;;  %v2477_v2 = vand.u32 2147483647, %v7054_v60  ;;  %v2540_v27 = vmul.f32 %v2539_v41, %v7061_v1  ;;  %v4886_v38 = vld [vmem:[#allocation2 + $0x2c] sm:$0xf0] }
 0x2a1   : > { %v2565_v43 = vmul.f32 %v7078_v55, %v7078_v55  ;;  %v2469_v24 = vmul.f32 %v5112_v28, %v7054_v60  ;;  %v2494_v8 = vadd.f32 0.18741608, %v2493_v57  ;;  %v7093_v44 = vmul.f32 0.70710677, %v7073_v48 }
 0x2a2   : > { %v2436_v34 = vsel %vm2435_vm15, %v5110_v53, %v2432_v26  ;;  %v2506_v52 = vmul.f32 %v2505_v21, %v7007_v10  ;;  %v2530_v59 = vadd.f32 0.0036580483, %v2529_v63  ;;  %v2541_v40 = vadd.f32 0.014752088, %v2540_v27  ;;  %v4604_v21 = vld [vmem:[#allocation2 + $0x20] sm:$0xf] }
 0x2a3   : > { %v2441_v32 = vsel %vm7067_vm14, %v2440_v35, %v2436_v34  ;;  %v2470_v46 = vsub.f32 1.0, %v2469_v24  ;;  %v2479_v9 = vand.u32 2147483648, %v7054_v60  ;;  %v7099_v58 = vmin.f32 %v2565_v43, 16.0 }
 0x2a4   : > { %v2442_v37 = vmul.f32 %v2441_v32, %v2417_v23  ;;  %vm2474_vm1 = vweird.f32 %v5112_v28  ;;  %v7101_v30 = vadd.f32 1.0, %v2506_v52  ;;  %v2531_v42 = vmul.f32 %v2530_v59, %v7061_v1 }
 0x2a5   : > { %v2542_v61 = vmul.f32 %v2541_v40, %v7061_v1  ;;  %v2471_v51 = vmul.f32 %v5112_v28, %v2470_v46  ;;  %v2567_v14 = vmul.f32 2.1237322e-06, %v7099_v58  ;;  %v2578_v53 = vmul.f32 3.8918573e-05, %v7099_v58  ;;  %vm2475_vm3 = vmor %vm2473_vm0, %vm2474_vm1 }
 0x2a6   : > { %v4561_v12 = vclamps-f32 %v2442_v37, 1.0  ;;  %vm7107_vm2 = vcmp.eq.f32.partialorder %v2477_v2, 8.507059e+37  ;;  %v2495_v16 = vmul.f32 %v2494_v8, %v7007_v10  ;;  %5113 = vrcp.f32 %v7101_v30 }
 0x2a7   : > { %v2605_v50 = vmul.f32 %v7093_v44, %v7093_v44  ;;  %v2472_v18 = vadd.f32 %v5112_v28, %v2471_v51  ;;  %v2532_v7 = vadd.f32 0.05243302, %v2531_v42  ;;  %v2543_v22 = vadd.f32 0.112945676, %v2542_v61 }
 0x2a8   : > { %v3444_v47 = vadd.f32 1.0, %v4561_v12  ;;  %v2480_v33 = vor.u32 1.1754944e-38, %v2479_v9  ;;  %v7118_v36 = vmul.f32 0.5, %v703_v62  ;;  %v2568_v54 = vadd.f32 0.00028619796, %v2567_v14  ;;  %v606_v62 = vpop.f32.mrf.mxu1 }
 0x2a9   : > { %v2579_v3 = vadd.f32 0.001143296, %v2578_v53  ;;  %v2476_v19 = vsel %vm2475_vm3, %v5112_v28, %v2472_v18  ;;  %v2533_v17 = vmul.f32 %v2532_v7, %v7061_v1  ;;  %v2544_v11 = vmul.f32 %v2543_v22, %v7061_v1 }
 0x2aa   : > { %v3508_v10 = vmul.f32 %v3444_v47, %v7039_v45  ;;  %v2481_v57 = vsel %vm7107_vm2, %v2480_v33, %v2476_v19  ;;  %v2569_v20 = vmul.f32 %v2568_v54, %v7099_v58  ;;  %v7127_v39 = vmin.f32 %v2605_v50, 16.0  ;;  %v4606_v33 = vld [vmem:[#allocation2 + $0x30] sm:$0xf0] }
 0x2ab   : > { %v2580_v60 = vmul.f32 %v2579_v3, %v7099_v58  ;;  %v2482_v41 = vmul.f32 %v2481_v57, %v2457_v56  ;;  %v2496_v45 = vadd.f32 1.1283791, %v2495_v16  ;;  %v2545_v26 = vadd.f32 0.4994258, %v2544_v11  ;;  %v4884_v11 = vld [vmem:[#allocation2 + $0x24] sm:$0xf] }
 0x2ac   : > { %v3552_v35 = vpack.c.bf16 %v3508_v10, %v7080_v31  ;;  %v5114_v63 = vpop.eup %5113  ;;  %v2570_v28 = vadd.f32 0.0036580483, %v2569_v20  ;;  %v2607_v27 = vmul.f32 2.1237322e-06, %v7127_v39  ;;  %v4605_v43 = vor.u32 %v4886_v38, %v4604_v21 }
 0x2ad   : > { %v2581_v2 = vadd.f32 0.014752088, %v2580_v60  ;;  %v2509_v34 = vmul.f32 %v5114_v63, %v7101_v30  ;;  %v2517_v24 = vand.u32 2147483647, %v7101_v30  ;;  %v2534_v8 = vadd.f32 0.18741608, %v2533_v17 }
 0x2ae   : > { %3584 = vst [vmem:[#allocation2 + $0x98] sm:$0xff] %v3552_v35  ;;  %v7134_v32 = vadd.f32 %v606_v62, %v5545_v6  ;;  %v2546_v56 = vmul.f32 %v2545_v26, %v7061_v1  ;;  %v2571_v31 = vmul.f32 %v2570_v28, %v7099_v58  ;;  %v2608_v59 = vadd.f32 0.00028619796, %v2607_v27  ;;  %4062 = vmatmul.bf16.gmra.mxu0 %v4605_v43 }
 0x2af   : > { %v2582_v52 = vmul.f32 %v2581_v2, %v7099_v58  ;;  %v4562_v40 = vclamps-f32 %v2482_v41, 1.0  ;;  %v2510_v37 = vsub.f32 1.0, %v2509_v34  ;;  %v2519_v46 = vand.u32 2147483648, %v7101_v30 }
 0x2b0   : > { %v2618_v9 = vmul.f32 3.8918573e-05, %v7127_v39  ;;  %v7141_v42 = vadd.f32 1.0, %v2546_v56  ;;  %v2572_v61 = vadd.f32 0.05243302, %v2571_v31  ;;  %v2609_v51 = vmul.f32 %v2608_v59, %v7127_v39 }
 0x2b1   : > { %v2583_v12 = vadd.f32 0.112945676, %v2582_v52  ;;  %v2511_v14 = vmul.f32 %v5114_v63, %v2510_v37  ;;  %vm2514_vm4 = vweird.f32 %v5114_v63  ;;  %v2535_v53 = vmul.f32 %v2534_v8, %v7061_v1  ;;  %v655_v8 = vpop.f32.mrf.mxu2 }
 0x2b2   : > { %v2619_v23 = vadd.f32 0.001143296, %v2618_v9  ;;  %v2497_v16 = vmul.f32 %v2496_v45, %v6997_v0  ;;  %vm2513_vm5 = vweird.f32 %v7101_v30  ;;  %vm7147_vm6 = vcmp.eq.f32.partialorder %v2517_v24, 8.507059e+37 }
 0x2b3   : > { %5115 = vrcp.f32 %v7141_v42  ;;  %v2512_v47 = vadd.f32 %v5114_v63, %v2511_v14  ;;  %v2520_v18 = vor.u32 1.1754944e-38, %v2519_v46  ;;  %v2584_v7 = vmul.f32 %v2583_v12, %v7099_v58  ;;  %vm2515_vm7 = vmor %vm2513_vm5, %vm2514_vm4  ;;  %v704_v14 = vpop.f32.mrf.mxu3 }
 0x2b4   : > { %v2610_v22 = vadd.f32 0.0036580483, %v2609_v51  ;;  %v3445_v54 = vadd.f32 1.0, %v4562_v40  ;;  %v2573_v1 = vmul.f32 %v2572_v61, %v7099_v58  ;;  %v2620_v0 = vmul.f32 %v2619_v23, %v7127_v39 }
 0x2b5   : > { %v7156_v30 = vmul.f32 0.70710677, %v7134_v32  ;;  %v2516_v3 = vsel %vm2515_vm7, %v5114_v63, %v2512_v47  ;;  %v2536_v10 = vadd.f32 1.1283791, %v2535_v53  ;;  %v2585_v19 = vadd.f32 0.4994258, %v2584_v7 }
 0x2b6   : > { %v2611_v17 = vmul.f32 %v2610_v22, %v7127_v39  ;;  %v2521_v38 = vsel %vm7147_vm6, %v2520_v18, %v2516_v3  ;;  %v2621_v57 = vadd.f32 0.014752088, %v2620_v0  ;;  %v4609_v60 = vor.u32 %v4884_v11, %v4606_v33 }
 0x2b7   : > { %v2645_v20 = vmul.f32 %v7156_v30, %v7156_v30  ;;  %v2522_v62 = vmul.f32 %v2521_v38, %v2497_v16  ;;  %v2586_v35 = vmul.f32 %v2585_v19, %v7099_v58  ;;  %v7165_v41 = vmul.f32 0.5, %v7073_v48 }
 0x2b8   : > { %v2612_v45 = vadd.f32 0.05243302, %v2611_v17  ;;  %v3509_v21 = vmul.f32 %v3445_v54, %v7042_v29  ;;  %v2574_v63 = vadd.f32 0.18741608, %v2573_v1  ;;  %v2622_v28 = vmul.f32 %v2621_v57, %v7127_v39  ;;  %4111 = vmatmul.bf16.gmra.mxu1 %v4609_v60 }
 0x2b9   : > { %v5116_v26 = vpop.eup %5115  ;;  %v7169_v2 = vmin.f32 %v2645_v20, 16.0  ;;  %v4563_v27 = vclamps-f32 %v2522_v62, 1.0  ;;  %v2537_v43 = vmul.f32 %v2536_v10, %v7033_v4  ;;  %v2557_v24 = vand.u32 2147483647, %v7141_v42 }
 0x2ba   : > { %v2549_v34 = vmul.f32 %v5116_v26, %v7141_v42  ;;  %v7174_v48 = vadd.f32 1.0, %v2586_v35  ;;  %v2613_v56 = vmul.f32 %v2612_v45, %v7127_v39  ;;  %v2623_v31 = vadd.f32 0.112945676, %v2622_v28 }
 0x2bb   : > { %v2647_v29 = vmul.f32 2.1237322e-06, %v7169_v2  ;;  %v3446_v52 = vadd.f32 1.0, %v4563_v27  ;;  %v2559_v40 = vand.u32 2147483648, %v7141_v42  ;;  %v2658_v37 = vmul.f32 3.8918573e-05, %v7169_v2 }
 0x2bc   : > { %v2550_v59 = vsub.f32 1.0, %v2549_v34  ;;  %vm2554_vm8 = vweird.f32 %v5116_v26  ;;  %v2575_v4 = vmul.f32 %v2574_v63, %v7099_v58  ;;  %5117 = vrcp.f32 %v7174_v48 }
 0x2bd   : > { %v7183_v46 = vadd.f32 %v655_v8, %v5559_v13  ;;  %v3510_v9 = vmul.f32 %v3446_v52, %v7049_v49  ;;  %v2614_v12 = vadd.f32 0.18741608, %v2613_v56  ;;  %v2624_v51 = vmul.f32 %v2623_v31, %v7127_v39  ;;  %v560_v56 = vpop.f32.mrf.mxu0 }
 0x2be   : > { %v2551_v61 = vmul.f32 %v5116_v26, %v2550_v59  ;;  %vm2553_vm9 = vweird.f32 %v7141_v42  ;;  %vm7188_vm10 = vcmp.eq.f32.partialorder %v2557_v24, 8.507059e+37  ;;  %v2648_v23 = vadd.f32 0.00028619796, %v2647_v29 }
 0x2bf   : > { %v2659_v58 = vadd.f32 0.001143296, %v2658_v37  ;;  %v3553_v16 = vpack.c.bf16 %v3510_v9, %v3509_v21  ;;  %v2560_v47 = vor.u32 1.1754944e-38, %v2559_v40  ;;  %v2625_v18 = vadd.f32 0.4994258, %v2624_v51  ;;  %vm2555_vm11 = vmor %vm2553_vm9, %vm2554_vm8 }
 0x2c0   : > { %v2552_v50 = vadd.f32 %v5116_v26, %v2551_v61  ;;  %v2649_v49 = vmul.f32 %v2648_v23, %v7169_v2  ;;  %v7196_v22 = vmul.f32 0.70710677, %v7183_v46  ;;  %v7199_v42 = vadd.f32 %v704_v14, %v5563_v15 }
 0x2c1   : > { %v2660_v7 = vmul.f32 %v2659_v58, %v7169_v2  ;;  %3585 = vst [vmem:[#allocation2 + $0xa0] sm:$0xff] %v3553_v16  ;;  %v2576_v54 = vadd.f32 1.1283791, %v2575_v4  ;;  %v2615_v1 = vmul.f32 %v2614_v12, %v7127_v39  ;;  %v2626_v0 = vmul.f32 %v2625_v18, %v7127_v39 }
 0x2c2   : > { %v2556_v33 = vsel %vm2555_vm11, %v5116_v26, %v2552_v50  ;;  %v5118_v3 = vpop.eup %5117  ;;  %v2650_v19 = vadd.f32 0.0036580483, %v2649_v49  ;;  %v2685_v11 = vmul.f32 %v7196_v22, %v7196_v22  ;;  %v2597_v20 = vand.u32 2147483647, %v7174_v48 }
 0x2c3   : > { %v2561_v10 = vsel %vm7188_vm10, %v2560_v47, %v2556_v33  ;;  %v2661_v17 = vadd.f32 0.014752088, %v2660_v7  ;;  %v2589_v57 = vmul.f32 %v5118_v3, %v7174_v48  ;;  %v2599_v60 = vand.u32 2147483648, %v7174_v48 }
 0x2c4   : > { %v2562_v38 = vmul.f32 %v2561_v10, %v2537_v43  ;;  %v7210_v62 = vadd.f32 1.0, %v2626_v0  ;;  %v2651_v39 = vmul.f32 %v2650_v19, %v7169_v2  ;;  %v7214_v45 = vmin.f32 %v2685_v11, 16.0 }
 0x2c5   : > { %v2662_v35 = vmul.f32 %v2661_v17, %v7169_v2  ;;  %v2590_v21 = vsub.f32 1.0, %v2589_v57  ;;  %v2616_v63 = vadd.f32 1.1283791, %v2615_v1  ;;  %v7217_v28 = vmul.f32 0.5, %v7134_v32 }
 0x2c6   : > { %v4564_v26 = vclamps-f32 %v2562_v38, 1.0  ;;  %v2577_v27 = vmul.f32 %v2576_v54, %v7078_v55  ;;  %vm2593_vm12 = vweird.f32 %v7174_v48  ;;  %5119 = vrcp.f32 %v7210_v62 }
 0x2c7   : > { %v7223_v43 = vmul.f32 0.70710677, %v7199_v42  ;;  %v2591_v34 = vmul.f32 %v5118_v3, %v2590_v21  ;;  %vm2594_vm13 = vweird.f32 %v5118_v3  ;;  %v2652_v24 = vadd.f32 0.05243302, %v2651_v39 }
 0x2c8   : > { %v2663_v8 = vadd.f32 0.112945676, %v2662_v35  ;;  %vm7225_vm14 = vcmp.eq.f32.partialorder %v2597_v20, 8.507059e+37  ;;  %v2600_v32 = vor.u32 1.1754944e-38, %v2599_v60  ;;  %v2687_v29 = vmul.f32 2.1237322e-06, %v7214_v45  ;;  %vm2595_vm15 = vmor %vm2593_vm12, %vm2594_vm13 }
 0x2c9   : > { %v2698_v55 = vmul.f32 3.8918573e-05, %v7214_v45  ;;  %v3447_v52 = vadd.f32 1.0, %v4564_v26  ;;  %v2592_v59 = vadd.f32 %v5118_v3, %v2591_v34  ;;  %v2617_v40 = vmul.f32 %v2616_v63, %v7093_v44 }
 0x2ca   : > { %v2664_v37 = vmul.f32 %v2663_v8, %v7169_v2  ;;  %v2688_v4 = vadd.f32 0.00028619796, %v2687_v29  ;;  %v2725_v61 = vmul.f32 %v7223_v43, %v7223_v43  ;;  %v7238_v12 = vadd.f32 %v560_v56, %v5543_v5 }
 0x2cb   : > { %v2699_v9 = vadd.f32 0.001143296, %v2698_v55  ;;  %v2596_v51 = vsel %vm2595_vm15, %v5118_v3, %v2592_v59  ;;  %v2637_v14 = vand.u32 2147483647, %v7210_v62  ;;  %v2653_v53 = vmul.f32 %v2652_v24, %v7169_v2 }
 0x2cc   : > { %v2665_v23 = vadd.f32 0.4994258, %v2664_v37  ;;  %v5120_v44 = vpop.eup %5119  ;;  %v2601_v58 = vsel %vm7225_vm14, %v2600_v32, %v2596_v51  ;;  %v2689_v48 = vmul.f32 %v2688_v4, %v7214_v45  ;;  %v7246_v50 = vmin.f32 %v2725_v61, 16.0 }
 0x2cd   : > { %v2700_v16 = vmul.f32 %v2699_v9, %v7214_v45  ;;  %v3511_v47 = vmul.f32 %v3447_v52, %v7057_v25  ;;  %v2602_v18 = vmul.f32 %v2601_v58, %v2577_v27  ;;  %v2629_v49 = vmul.f32 %v5120_v44, %v7210_v62  ;;  %v4887_v52 = vld [vmem:[#allocation2 + $0x34] sm:$0xf0] }
 0x2ce   : > { %v2639_v7 = vand.u32 2147483648, %v7210_v62  ;;  %v2666_v33 = vmul.f32 %v2665_v23, %v7169_v2  ;;  %v2690_v54 = vadd.f32 0.0036580483, %v2689_v48  ;;  %v2727_v0 = vmul.f32 2.1237322e-06, %v7246_v50 }
 0x2cf   : > { %v2701_v1 = vadd.f32 0.014752088, %v2700_v16  ;;  %v4565_v3 = vclamps-f32 %v2602_v18, 1.0  ;;  %v2630_v10 = vsub.f32 1.0, %v2629_v49  ;;  %v2654_v19 = vadd.f32 0.18741608, %v2653_v53 }
 0x2d0   : > { %v2738_v17 = vmul.f32 3.8918573e-05, %v7246_v50  ;;  %v7254_v11 = vadd.f32 1.0, %v2666_v33  ;;  %v2691_v25 = vmul.f32 %v2690_v54, %v7214_v45  ;;  %v2728_v57 = vadd.f32 0.00028619796, %v2727_v0 }
 0x2d1   : > { %v2702_v38 = vmul.f32 %v2701_v1, %v7214_v45  ;;  %v3448_v20 = vadd.f32 1.0, %v4565_v3  ;;  %v2631_v60 = vmul.f32 %v5120_v44, %v2630_v10  ;;  %vm2634_vm0 = vweird.f32 %v5120_v44  ;;  %v609_v10 = vpop.f32.mrf.mxu1 }
 0x2d2   : > { %v2739_v39 = vadd.f32 0.001143296, %v2738_v17  ;;  %vm2633_vm1 = vweird.f32 %v7210_v62  ;;  %vm7259_vm2 = vcmp.eq.f32.partialorder %v2637_v14, 8.507059e+37  ;;  %5121 = vrcp.f32 %v7254_v11 }
 0x2d3   : > { %v7265_v26 = vmul.f32 0.70710677, %v7238_v12  ;;  %v3512_v21 = vmul.f32 %v3448_v20, %v7118_v36  ;;  %v2632_v63 = vadd.f32 %v5120_v44, %v2631_v60  ;;  %v2692_v27 = vadd.f32 0.05243302, %v2691_v25  ;;  %vm2635_vm3 = vmor %vm2633_vm1, %vm2634_vm0 }
 0x2d4   : > { %v2703_v34 = vadd.f32 0.112945676, %v2702_v38  ;;  %v2640_v24 = vor.u32 1.1754944e-38, %v2639_v7  ;;  %v2655_v8 = vmul.f32 %v2654_v19, %v7169_v2  ;;  %v2729_v62 = vmul.f32 %v2728_v57, %v7246_v50  ;;  %v4612_v2 = vld [vmem:[#allocation2 + $0x28] sm:$0xf] }
 0x2d5   : > { %v2740_v56 = vmul.f32 %v2739_v39, %v7246_v50  ;;  %v3554_v31 = vpack.c.bf16 %v3512_v21, %v3511_v47  ;;  %v2636_v32 = vsel %vm2635_vm3, %v5120_v44, %v2632_v63  ;;  %v2693_v29 = vmul.f32 %v2692_v27, %v7214_v45 }
 0x2d6   : > { %v2704_v55 = vmul.f32 %v2703_v34, %v7214_v45  ;;  %v2641_v36 = vsel %vm7259_vm2, %v2640_v24, %v2636_v32  ;;  %v2730_v59 = vadd.f32 0.0036580483, %v2729_v62  ;;  %v2765_v4 = vmul.f32 %v7265_v26, %v7265_v26 }
 0x2d7   : > { %v2741_v37 = vadd.f32 0.014752088, %v2740_v56  ;;  %3586 = vst [vmem:[#allocation2 + $0xa8] sm:$0xff] %v3554_v31  ;;  %v2642_v9 = vmul.f32 %v2641_v36, %v2617_v40  ;;  %v7278_v61 = vmul.f32 0.5, %v7183_v46  ;;  %v2694_v51 = vadd.f32 0.18741608, %v2693_v29 }
 0x2d8   : > { %v2705_v14 = vadd.f32 0.4994258, %v2704_v55  ;;  %v5122_v53 = vpop.eup %5121  ;;  %v2731_v23 = vmul.f32 %v2730_v59, %v7246_v50  ;;  %v7282_v58 = vmin.f32 %v2765_v4, 16.0  ;;  %v4613_v48 = vor.u32 %v4887_v52, %v4612_v2  ;;  %v4885_v29 = vld [vmem:[#allocation2 + $0x2c] sm:$0xf] }
 0x2d9   : > { %v2742_v44 = vmul.f32 %v2741_v37, %v7246_v50  ;;  %v2656_v16 = vadd.f32 1.1283791, %v2655_v8  ;;  %v2669_v47 = vmul.f32 %v5122_v53, %v7254_v11  ;;  %v2677_v18 = vand.u32 2147483647, %v7254_v11 }
 0x2da   : > { %v2679_v40 = vand.u32 2147483648, %v7254_v11  ;;  %v2706_v46 = vmul.f32 %v2705_v14, %v7214_v45  ;;  %v2732_v49 = vadd.f32 0.05243302, %v2731_v23  ;;  %v2767_v33 = vmul.f32 2.1237322e-06, %v7282_v58  ;;  %4160 = vmatmul.bf16.gmra.mxu2 %v4613_v48 }
 0x2db   : > { %v2743_v7 = vadd.f32 0.112945676, %v2742_v44  ;;  %v4566_v54 = vclamps-f32 %v2642_v9, 1.0  ;;  %v2670_v1 = vsub.f32 1.0, %v2669_v47  ;;  %v2695_v0 = vmul.f32 %v2694_v51, %v7214_v45  ;;  %v658_v51 = vpop.f32.mrf.mxu2 }
 0x2dc   : > { %v2778_v3 = vmul.f32 3.8918573e-05, %v7282_v58  ;;  %v7291_v19 = vadd.f32 1.0, %v2706_v46  ;;  %v2733_v17 = vmul.f32 %v2732_v49, %v7246_v50  ;;  %v2768_v38 = vadd.f32 0.00028619796, %v2767_v33  ;;  %v707_v33 = vpop.f32.mrf.mxu3 }
 0x2dd   : > { %v2744_v25 = vmul.f32 %v2743_v7, %v7246_v50  ;;  %v2657_v57 = vmul.f32 %v2656_v16, %v7156_v30  ;;  %v2671_v20 = vmul.f32 %v5122_v53, %v2670_v1  ;;  %vm2674_vm4 = vweird.f32 %v5122_v53  ;;  %v4614_v30 = vld [vmem:[#allocation2 + $0x38] sm:$0xf0] }
 0x2de   : > { %v2779_v60 = vadd.f32 0.001143296, %v2778_v3  ;;  %vm2673_vm5 = vweird.f32 %v7254_v11  ;;  %vm7297_vm6 = vcmp.eq.f32.partialorder %v2677_v18, 8.507059e+37  ;;  %5123 = vrcp.f32 %v7291_v19 }
 0x2df   : > { %v7303_v45 = vadd.f32 %v609_v10, %v5545_v6  ;;  %v2672_v35 = vadd.f32 %v5122_v53, %v2671_v20  ;;  %v2680_v21 = vor.u32 1.1754944e-38, %v2679_v40  ;;  %v2745_v63 = vadd.f32 0.4994258, %v2744_v25  ;;  %vm2675_vm7 = vmor %vm2673_vm5, %vm2674_vm4 }
 0x2e0   : > { %v2769_v27 = vmul.f32 %v2768_v38, %v7282_v58  ;;  %v3449_v34 = vadd.f32 1.0, %v4566_v54  ;;  %v2696_v24 = vadd.f32 1.1283791, %v2695_v0  ;;  %v2734_v8 = vadd.f32 0.18741608, %v2733_v17 }
 0x2e1   : > { %v2780_v11 = vmul.f32 %v2779_v60, %v7282_v58  ;;  %v2676_v62 = vsel %vm2675_vm7, %v5122_v53, %v2672_v35  ;;  %v2717_v56 = vand.u32 2147483647, %v7291_v19  ;;  %v2746_v31 = vmul.f32 %v2745_v63, %v7246_v50 }
 0x2e2   : > { %v2770_v32 = vadd.f32 0.0036580483, %v2769_v27  ;;  %v2681_v55 = vsel %vm7297_vm6, %v2680_v21, %v2676_v62  ;;  %v7312_v36 = vmul.f32 0.70710677, %v7303_v45  ;;  %v4617_v59 = vor.u32 %v4885_v29, %v4614_v30 }
 0x2e3   : > { %v2781_v52 = vadd.f32 0.014752088, %v2780_v11  ;;  %v2682_v37 = vmul.f32 %v2681_v55, %v2657_v57  ;;  %v7315_v4 = vmul.f32 0.5, %v7199_v42  ;;  %v7317_v2 = vadd.f32 1.0, %v2746_v31 }
 0x2e4   : > { %v2771_v9 = vmul.f32 %v2770_v32, %v7282_v58  ;;  %v5124_v14 = vpop.eup %5123  ;;  %v2719_v53 = vand.u32 2147483648, %v7291_v19  ;;  %v2735_v23 = vmul.f32 %v2734_v8, %v7246_v50  ;;  %v2805_v48 = vmul.f32 %v7312_v36, %v7312_v36  ;;  %4209 = vmatmul.bf16.gmra.mxu3 %v4617_v59 }
 0x2e5   : > { %v2782_v44 = vmul.f32 %v2781_v52, %v7282_v58  ;;  %v3513_v16 = vmul.f32 %v3449_v34, %v7165_v41  ;;  %v4567_v42 = vclamps-f32 %v2682_v37, 1.0  ;;  %v2697_v47 = vmul.f32 %v2696_v24, %v7196_v22 }
 0x2e6   : > { %v2709_v18 = vmul.f32 %v5124_v14, %v7291_v19  ;;  %vm2713_vm8 = vweird.f32 %v7291_v19  ;;  %vm7329_vm9 = vcmp.eq.f32.partialorder %v2717_v56, 8.507059e+37  ;;  %5125 = vrcp.f32 %v7317_v2 }
 0x2e7   : > { %v7335_v50 = vadd.f32 %v658_v51, %v5559_v13  ;;  %v3450_v46 = vadd.f32 1.0, %v4567_v42  ;;  %v2772_v7 = vadd.f32 0.05243302, %v2771_v9  ;;  %v2783_v41 = vadd.f32 0.112945676, %v2782_v44 }
 0x2e8   : > { %v2710_v49 = vsub.f32 1.0, %v2709_v18  ;;  %vm2714_vm10 = vweird.f32 %v5124_v14  ;;  %v2720_v22 = vor.u32 1.1754944e-38, %v2719_v53  ;;  %v2736_v54 = vadd.f32 1.1283791, %v2735_v23  ;;  %v562_v53 = vpop.f32.mrf.mxu0 }
 0x2e9   : > { %v7337_v1 = vmin.f32 %v2805_v48, 16.0  ;;  %v3514_v0 = vmul.f32 %v3450_v46, %v7217_v28  ;;  %v2773_v10 = vmul.f32 %v2772_v7, %v7282_v58  ;;  %v2784_v17 = vmul.f32 %v2783_v41, %v7282_v58  ;;  %vm2715_vm11 = vmor %vm2713_vm8, %vm2714_vm10 }
 0x2ea   : > { %v2711_v3 = vmul.f32 %v5124_v14, %v2710_v49  ;;  %v7345_v57 = vmul.f32 0.70710677, %v7335_v50  ;;  %v7348_v20 = vadd.f32 %v707_v33, %v5563_v15  ;;  %v2757_v63 = vand.u32 2147483647, %v7317_v2 }
 0x2eb   : > { %v2807_v25 = vmul.f32 2.1237322e-06, %v7337_v1  ;;  %v2818_v38 = vmul.f32 3.8918573e-05, %v7337_v1  ;;  %v3555_v60 = vpack.c.bf16 %v3514_v0, %v3513_v16  ;;  %v2774_v35 = vadd.f32 0.18741608, %v2773_v10 }
 0x2ec   : > { %v2712_v39 = vadd.f32 %v5124_v14, %v2711_v3  ;;  %v2785_v21 = vadd.f32 0.4994258, %v2784_v17  ;;  %v5126_v28 = vpop.eup %5125  ;;  %v2845_v34 = vmul.f32 %v7345_v57, %v7345_v57  ;;  %v2759_v11 = vand.u32 2147483648, %v7317_v2 }
 0x2ed   : > { %v2808_v27 = vadd.f32 0.00028619796, %v2807_v25  ;;  %v2819_v30 = vadd.f32 0.001143296, %v2818_v38  ;;  %3587 = vst [vmem:[#allocation2 + $0xb0] sm:$0xff] %v3555_v60  ;;  %v2749_v8 = vmul.f32 %v5126_v28, %v7317_v2  ;;  %v2775_v62 = vmul.f32 %v2774_v35, %v7282_v58 }
 0x2ee   : > { %v2716_v24 = vsel %vm2715_vm11, %v5124_v14, %v2712_v39  ;;  %v2786_v19 = vmul.f32 %v2785_v21, %v7282_v58  ;;  %v7364_v59 = vmin.f32 %v2845_v34, 16.0  ;;  %v2737_v37 = vmul.f32 %v2736_v54, %v7223_v43 }
 0x2ef   : > { %v2721_v56 = vsel %vm7329_vm9, %v2720_v22, %v2716_v24  ;;  %v2809_v31 = vmul.f32 %v2808_v27, %v7337_v1  ;;  %v2820_v32 = vmul.f32 %v2819_v30, %v7337_v1  ;;  %v2750_v55 = vsub.f32 1.0, %v2749_v8 }
 0x2f0   : > { %v2722_v29 = vmul.f32 %v2721_v56, %v2697_v47  ;;  %v2776_v52 = vadd.f32 1.1283791, %v2775_v62  ;;  %v7367_v9 = vadd.f32 1.0, %v2786_v19  ;;  %vm2754_vm12 = vweird.f32 %v5126_v28 }
 0x2f1   : > { %v2810_v51 = vadd.f32 0.0036580483, %v2809_v31  ;;  %v2821_v14 = vadd.f32 0.014752088, %v2820_v32  ;;  %v2751_v44 = vmul.f32 %v5126_v28, %v2750_v55  ;;  %v2847_v58 = vmul.f32 2.1237322e-06, %v7364_v59 }
 0x2f2   : > { %v4568_v23 = vclamps-f32 %v2722_v29, 1.0  ;;  %vm2753_vm13 = vweird.f32 %v7317_v2  ;;  %vm7371_vm14 = vcmp.eq.f32.partialorder %v2757_v63, 8.507059e+37  ;;  %v2760_v16 = vor.u32 1.1754944e-38, %v2759_v11 }
 0x2f3   : > { %5127 = vrcp.f32 %v7367_v9  ;;  %v2752_v43 = vadd.f32 %v5126_v28, %v2751_v44  ;;  %v2811_v42 = vmul.f32 %v2810_v51, %v7337_v1  ;;  %v2822_v47 = vmul.f32 %v2821_v14, %v7337_v1  ;;  %vm2755_vm15 = vmor %vm2753_vm13, %vm2754_vm12  ;;  %v611_v14 = vpop.f32.mrf.mxu1 }
 0x2f4   : > { %v7379_v18 = vadd.f32 %v562_v53, %v5543_v5  ;;  %v7382_v40 = vmul.f32 %v2776_v52, %v7265_v26  ;;  %v2797_v2 = vand.u32 2147483647, %v7367_v9  ;;  %v2848_v46 = vadd.f32 0.00028619796, %v2847_v58 }
 0x2f5   : > { %v2858_v49 = vmul.f32 3.8918573e-05, %v7364_v59  ;;  %v3451_v7 = vadd.f32 1.0, %v4568_v23  ;;  %v2756_v41 = vsel %vm2755_vm15, %v5126_v28, %v2752_v43  ;;  %v2812_v33 = vadd.f32 0.05243302, %v2811_v42 }
 0x2f6   : > { %v2823_v22 = vadd.f32 0.112945676, %v2822_v47  ;;  %v2761_v54 = vsel %vm7371_vm14, %v2760_v16, %v2756_v41  ;;  %v2849_v0 = vmul.f32 %v2848_v46, %v7364_v59  ;;  %v7390_v10 = vmul.f32 0.70710677, %v7348_v20 }
 0x2f7   : > { %v2859_v3 = vadd.f32 0.001143296, %v2858_v49  ;;  %v2762_v26 = vmul.f32 %v2761_v54, %v2737_v37  ;;  %vm2793_vm0 = vweird.f32 %v7367_v9  ;;  %v2813_v17 = vmul.f32 %v2812_v33, %v7337_v1 }
 0x2f8   : > { %v2824_v25 = vmul.f32 %v2823_v22, %v7337_v1  ;;  %v2799_v60 = vand.u32 2147483648, %v7367_v9  ;;  %v2850_v39 = vadd.f32 0.0036580483, %v2849_v0  ;;  %v2885_v21 = vmul.f32 %v7390_v10, %v7390_v10 }
 0x2f9   : > { %v5128_v38 = vpop.eup %5127  ;;  %v2860_v35 = vmul.f32 %v2859_v3, %v7364_v59  ;;  %v3515_v28 = vmul.f32 %v3451_v7, %v7278_v61  ;;  %v4569_v63 = vclamps-f32 %v2762_v26, 1.0  ;;  %vm7401_vm1 = vcmp.eq.f32.partialorder %v2797_v2, 8.507059e+37 }
 0x2fa   : > { %v2789_v27 = vmul.f32 %v5128_v38, %v7367_v9  ;;  %v2825_v34 = vadd.f32 0.4994258, %v2824_v25  ;;  %v2851_v24 = vmul.f32 %v2850_v39, %v7364_v59  ;;  %v7406_v11 = vmin.f32 %v2885_v21, 16.0 }
 0x2fb   : > { %v2861_v8 = vadd.f32 0.014752088, %v2860_v35  ;;  %v3452_v62 = vadd.f32 1.0, %v4569_v63  ;;  %v2814_v19 = vadd.f32 0.18741608, %v2813_v17  ;;  %vm2794_vm2 = vweird.f32 %v5128_v38 }
 0x2fc   : > { %v2790_v56 = vsub.f32 1.0, %v2789_v27  ;;  %v7409_v31 = vmul.f32 0.70710677, %v7379_v18  ;;  %v2826_v61 = vmul.f32 %v2825_v34, %v7337_v1  ;;  %v2852_v32 = vadd.f32 0.05243302, %v2851_v24  ;;  %vm2795_vm3 = vmor %vm2793_vm0, %vm2794_vm2 }
 0x2fd   : > { %v2862_v29 = vmul.f32 %v2861_v8, %v7364_v59  ;;  %v2887_v55 = vmul.f32 2.1237322e-06, %v7406_v11  ;;  %v3516_v52 = vmul.f32 %v3452_v62, %v7315_v4  ;;  %v2898_v51 = vmul.f32 3.8918573e-05, %v7406_v11 }
 0x2fe   : > { %v2791_v37 = vmul.f32 %v5128_v38, %v2790_v56  ;;  %v7416_v53 = vadd.f32 1.0, %v2826_v61  ;;  %v2853_v23 = vmul.f32 %v2852_v32, %v7364_v59  ;;  %v2800_v43 = vor.u32 1.1754944e-38, %v2799_v60 }
 0x2ff   : > { %v2863_v44 = vadd.f32 0.112945676, %v2862_v29  ;;  %v2888_v58 = vadd.f32 0.00028619796, %v2887_v55  ;;  %v3556_v48 = vpack.c.bf16 %v3516_v52, %v3515_v28  ;;  %v2899_v42 = vadd.f32 0.001143296, %v2898_v51 }
 0x300   : > { %v2792_v16 = vadd.f32 %v5128_v38, %v2791_v37  ;;  %v2815_v4 = vmul.f32 %v2814_v19, %v7337_v1  ;;  %5129 = vrcp.f32 %v7416_v53  ;;  %v2925_v47 = vmul.f32 %v7409_v31, %v7409_v31 }
 0x301   : > { %v7426_v2 = vadd.f32 %v611_v14, %v5545_v6  ;;  %3588 = vst [vmem:[#allocation2 + $0xb8] sm:$0xff] %v3556_v48  ;;  %v2854_v49 = vadd.f32 0.18741608, %v2853_v23  ;;  %v2864_v7 = vmul.f32 %v2863_v44, %v7364_v59  ;;  %v2889_v41 = vmul.f32 %v2888_v58, %v7406_v11 }
 0x302   : > { %v2796_v46 = vsel %vm2795_vm3, %v5128_v38, %v2792_v16  ;;  %v7431_v9 = vmul.f32 0.5, %v7238_v12  ;;  %v2900_v33 = vmul.f32 %v2899_v42, %v7406_v11  ;;  %v7439_v26 = vmul.f32 0.5, %v7303_v45 }
 0x303   : > { %v2801_v1 = vsel %vm7401_vm1, %v2800_v43, %v2796_v46  ;;  %v2855_v54 = vmul.f32 %v2854_v49, %v7364_v59  ;;  %v2865_v0 = vadd.f32 0.4994258, %v2864_v7  ;;  %v2890_v3 = vadd.f32 0.0036580483, %v2889_v41 }
 0x304   : > { %v2802_v22 = vmul.f32 %v2801_v1, %v7382_v40  ;;  %v2901_v17 = vadd.f32 0.014752088, %v2900_v33  ;;  %v7441_v25 = vmin.f32 %v2925_v47, 16.0  ;;  %v7444_v12 = vmul.f32 0.70710677, %v7426_v2 }
 0x305   : > { %v2816_v38 = vadd.f32 1.1283791, %v2815_v4  ;;  %v2837_v60 = vand.u32 2147483647, %v7416_v53  ;;  %v2866_v39 = vmul.f32 %v2865_v0, %v7364_v59  ;;  %v2891_v40 = vmul.f32 %v2890_v3, %v7406_v11  ;;  %v4620_v47 = vld [vmem:[#allocation2 + $0x40] sm:$0xf] }
 0x306   : > { %v5130_v35 = vpop.eup %5129  ;;  %v2902_v21 = vmul.f32 %v2901_v17, %v7406_v11  ;;  %v2927_v28 = vmul.f32 2.1237322e-06, %v7441_v25  ;;  %v2938_v45 = vmul.f32 3.8918573e-05, %v7441_v25  ;;  %v2965_v63 = vmul.f32 %v7444_v12, %v7444_v12 }
 0x307   : > { %v4570_v27 = vclamps-f32 %v2802_v22, 1.0  ;;  %v2829_v30 = vmul.f32 %v5130_v35, %v7416_v53  ;;  %v2839_v34 = vand.u32 2147483648, %v7416_v53  ;;  %v2856_v24 = vadd.f32 1.1283791, %v2855_v54 }
 0x308   : > { %v7456_v8 = vadd.f32 1.0, %v2866_v39  ;;  %v2892_v59 = vadd.f32 0.05243302, %v2891_v40  ;;  %v2903_v62 = vadd.f32 0.112945676, %v2902_v21  ;;  %v7458_v56 = vmin.f32 %v2965_v63, 16.0 }
 0x309   : > { %v2817_v19 = vmul.f32 %v2816_v38, %v7312_v36  ;;  %v2830_v61 = vsub.f32 1.0, %v2829_v30  ;;  %v2928_v32 = vadd.f32 0.00028619796, %v2927_v28  ;;  %v2939_v29 = vadd.f32 0.001143296, %v2938_v45 }
 0x30a   : > { %vm2833_vm4 = vweird.f32 %v7416_v53  ;;  %vm2834_vm5 = vweird.f32 %v5130_v35  ;;  %vm7462_vm6 = vcmp.eq.f32.partialorder %v2837_v60, 8.507059e+37  ;;  %5131 = vrcp.f32 %v7456_v8  ;;  %v4890_v36 = vld [vmem:[#allocation2 + $0x4c] sm:$0xf0] }
 0x30b   : > { %v2831_v52 = vmul.f32 %v5130_v35, %v2830_v61  ;;  %v2893_v37 = vmul.f32 %v2892_v59, %v7406_v11  ;;  %v2904_v51 = vmul.f32 %v2903_v62, %v7406_v11  ;;  %v2929_v14 = vmul.f32 %v2928_v32, %v7441_v25  ;;  %vm2835_vm7 = vmor %vm2833_vm4, %vm2834_vm5  ;;  %v4622_v32 = vld [vmem:[#allocation2 + $0x50] sm:$0xf0] }
 0x30c   : > { %v3453_v23 = vadd.f32 1.0, %v4570_v27  ;;  %v2840_v44 = vor.u32 1.1754944e-38, %v2839_v34  ;;  %v2940_v58 = vmul.f32 %v2939_v29, %v7441_v25  ;;  %v2967_v48 = vmul.f32 2.1237322e-06, %v7458_v56  ;;  %v660_v29 = vpop.f32.mrf.mxu2 }
 0x30d   : > { %v2832_v16 = vadd.f32 %v5130_v35, %v2831_v52  ;;  %v7473_v43 = vmul.f32 %v2856_v24, %v7345_v57  ;;  %v2905_v42 = vadd.f32 0.4994258, %v2904_v51  ;;  %v2930_v4 = vadd.f32 0.0036580483, %v2929_v14 }
 0x30e   : > { %v2941_v46 = vadd.f32 0.014752088, %v2940_v58  ;;  %v2968_v49 = vadd.f32 0.00028619796, %v2967_v48  ;;  %v2978_v7 = vmul.f32 3.8918573e-05, %v7458_v56  ;;  %v4621_v41 = vor.u32 %v4890_v36, %v4620_v47 }
 0x30f   : > { %v2836_v1 = vsel %vm2835_vm7, %v5130_v35, %v2832_v16  ;;  %v2894_v33 = vadd.f32 0.18741608, %v2893_v37  ;;  %v2906_v22 = vmul.f32 %v2905_v42, %v7406_v11  ;;  %v2931_v54 = vmul.f32 %v2930_v4, %v7441_v25 }
 0x310   : > { %v5132_v57 = vpop.eup %5131  ;;  %v2841_v0 = vsel %vm7462_vm6, %v2840_v44, %v2836_v1  ;;  %v2942_v3 = vmul.f32 %v2941_v46, %v7441_v25  ;;  %v2969_v53 = vmul.f32 %v2968_v49, %v7458_v56  ;;  %v2979_v17 = vadd.f32 0.001143296, %v2978_v7  ;;  %4067 = vmatmul.bf16.gmra.mxu0 %v4621_v41 }
 0x311   : > { %v2842_v38 = vmul.f32 %v2841_v0, %v2817_v19  ;;  %v2869_v60 = vmul.f32 %v5132_v57, %v7456_v8  ;;  %v2877_v39 = vand.u32 2147483647, %v7456_v8  ;;  %v2879_v40 = vand.u32 2147483648, %v7456_v8 }
 0x312   : > { %v7488_v35 = vadd.f32 1.0, %v2906_v22  ;;  %v2932_v21 = vadd.f32 0.05243302, %v2931_v54  ;;  %v2943_v28 = vadd.f32 0.112945676, %v2942_v3  ;;  %v2980_v45 = vmul.f32 %v2979_v17, %v7458_v56 }
 0x313   : > { %v3517_v63 = vmul.f32 %v3453_v23, %v7431_v9  ;;  %v4571_v27 = vclamps-f32 %v2842_v38, 1.0  ;;  %v2870_v30 = vsub.f32 1.0, %v2869_v60  ;;  %v2970_v34 = vadd.f32 0.0036580483, %v2969_v53  ;;  %v4888_v23 = vld [vmem:[#allocation2 + $0x44] sm:$0xf] }
 0x314   : > { %vm2873_vm8 = vweird.f32 %v7456_v8  ;;  %vm2874_vm9 = vweird.f32 %v5132_v57  ;;  %v2895_v24 = vmul.f32 %v2894_v33, %v7406_v11  ;;  %5133 = vrcp.f32 %v7488_v35 }
 0x315   : > { %v3454_v59 = vadd.f32 1.0, %v4571_v27  ;;  %v2871_v62 = vmul.f32 %v5132_v57, %v2870_v30  ;;  %v2933_v19 = vmul.f32 %v2932_v21, %v7441_v25  ;;  %v2944_v61 = vmul.f32 %v2943_v28, %v7441_v25  ;;  %vm2875_vm11 = vmor %vm2873_vm8, %vm2874_vm9  ;;  %v4891_v27 = vld [vmem:[#allocation2 + $0x54] sm:$0xf0] }
 0x316   : > { %vm7497_vm10 = vcmp.eq.f32.partialorder %v2877_v39, 8.507059e+37  ;;  %v2880_v55 = vor.u32 1.1754944e-38, %v2879_v40  ;;  %v2971_v52 = vmul.f32 %v2970_v34, %v7458_v56  ;;  %v2981_v37 = vadd.f32 0.014752088, %v2980_v45 }
 0x317   : > { %v3518_v11 = vmul.f32 %v3454_v59, %v7439_v26  ;;  %v2872_v51 = vadd.f32 %v5132_v57, %v2871_v62  ;;  %v2934_v14 = vadd.f32 0.18741608, %v2933_v19  ;;  %v2945_v36 = vadd.f32 0.4994258, %v2944_v61 }
 0x318   : > { %v2972_v44 = vadd.f32 0.05243302, %v2971_v52  ;;  %v2982_v58 = vmul.f32 %v2981_v37, %v7458_v56  ;;  %v4625_v48 = vor.u32 %v4888_v23, %v4622_v32  ;;  %v7508_v16 = vadd.f32 %v660_v29, %v5559_v13  ;;  %v4628_v32 = vld [vmem:[#allocation2 + $0x48] sm:$0xf]  ;;  %v565_v52 = vpop.f32.mrf.mxu0  ;;  %v614_v37 = vpop.f32.mrf.mxu1 }
 0x319   : > { %v3557_v42 = vpack.c.bf16 %v3518_v11, %v3517_v63  ;;  %v2876_v4 = vsel %vm2875_vm11, %v5132_v57, %v2872_v51  ;;  %v2896_v47 = vadd.f32 1.1283791, %v2895_v24  ;;  %v2946_v26 = vmul.f32 %v2945_v36, %v7441_v25  ;;  %v709_v57 = vpop.f32.mrf.mxu3 }
 0x31a   : > { %v5134_v46 = vpop.eup %5133  ;;  %v2881_v49 = vsel %vm7497_vm10, %v2880_v55, %v2876_v4  ;;  %v2935_v7 = vmul.f32 %v2934_v14, %v7441_v25  ;;  %v2973_v8 = vmul.f32 %v2972_v44, %v7458_v56  ;;  %v2983_v41 = vadd.f32 0.112945676, %v2982_v58  ;;  %4116 = vmatmul.bf16.gmra.mxu1 %v4625_v48 }
 0x31b   : > { %3589 = vst [vmem:[#allocation2 + $0xc0] sm:$0xff] %v3557_v42  ;;  %v767_v1 = vmul.f32 0.5, %v7335_v50  ;;  %v2882_v33 = vmul.f32 %v2881_v49, %v7473_v43  ;;  %v2909_v22 = vmul.f32 %v5134_v46, %v7488_v35  ;;  %v2917_v54 = vand.u32 2147483647, %v7488_v35 }
 0x31c   : > { %v2919_v0 = vand.u32 2147483648, %v7488_v35  ;;  %v7520_v3 = vadd.f32 1.0, %v2946_v26  ;;  %v2984_v25 = vmul.f32 %v2983_v41, %v7458_v56  ;;  %v7524_v53 = vmul.f32 0.70710677, %v7508_v16 }
 0x31d   : > { %v4572_v17 = vclamps-f32 %v2882_v33, 1.0  ;;  %v7527_v38 = vmul.f32 0.5, %v7348_v20  ;;  %v2897_v50 = vmul.f32 %v2896_v47, %v7390_v10  ;;  %v2910_v43 = vsub.f32 1.0, %v2909_v22 }
 0x31e   : > { %v2936_v60 = vadd.f32 1.1283791, %v2935_v7  ;;  %5135 = vrcp.f32 %v7520_v3  ;;  %v2974_v39 = vadd.f32 0.18741608, %v2973_v8  ;;  %v7532_v40 = vadd.f32 %v709_v57, %v5563_v15 }
 0x31f   : > { %v2911_v21 = vmul.f32 %v5134_v46, %v2910_v43  ;;  %vm2914_vm12 = vweird.f32 %v5134_v46  ;;  %v2959_v28 = vand.u32 2147483648, %v7520_v3  ;;  %v2985_v45 = vadd.f32 0.4994258, %v2984_v25 }
 0x320   : > { %vm2913_vm13 = vweird.f32 %v7488_v35  ;;  %vm7536_vm14 = vcmp.eq.f32.partialorder %v2917_v54, 8.507059e+37  ;;  %v2920_v10 = vor.u32 1.1754944e-38, %v2919_v0  ;;  %v3005_v63 = vmul.f32 %v7524_v53, %v7524_v53 }
 0x321   : > { %v3455_v30 = vadd.f32 1.0, %v4572_v17  ;;  %v2912_v34 = vadd.f32 %v5134_v46, %v2911_v21  ;;  %v2957_v24 = vand.u32 2147483647, %v7520_v3  ;;  %v2986_v59 = vmul.f32 %v2985_v45, %v7458_v56  ;;  %vm2915_vm15 = vmor %vm2913_vm13, %vm2914_vm12  ;;  %v4889_v17 = vld [vmem:[#allocation2 + $0x4c] sm:$0xf] }
 0x322   : > { %v7545_v62 = vmul.f32 %v2936_v60, %v7409_v31  ;;  %v2975_v35 = vmul.f32 %v2974_v39, %v7458_v56  ;;  %v7548_v19 = vmin.f32 %v3005_v63, 16.0  ;;  %v7551_v61 = vmul.f32 0.70710677, %v7532_v40 }
 0x323   : > { %v2916_v29 = vsel %vm2915_vm15, %v5134_v46, %v2912_v34  ;;  %vm2953_vm0 = vweird.f32 %v7520_v3  ;;  %v2960_v9 = vor.u32 1.1754944e-38, %v2959_v28  ;;  %v7554_v55 = vadd.f32 1.0, %v2986_v59  ;;  %v4630_v46 = vld [vmem:[#allocation2 + $0x58] sm:$0xf0] }
 0x324   : > { %v4629_v11 = vor.u32 %v4891_v27, %v4628_v32  ;;  %v5136_v51 = vpop.eup %5135  ;;  %v2921_v31 = vsel %vm7536_vm14, %v2920_v10, %v2916_v29  ;;  %v3007_v56 = vmul.f32 2.1237322e-06, %v7548_v19  ;;  %v3018_v14 = vmul.f32 3.8918573e-05, %v7548_v19 }
 0x325   : > { %v3045_v36 = vmul.f32 %v7551_v61, %v7551_v61  ;;  %v3519_v23 = vmul.f32 %v3455_v30, %v767_v1  ;;  %v2922_v44 = vmul.f32 %v2921_v31, %v2897_v50  ;;  %v2949_v58 = vmul.f32 %v5136_v51, %v7520_v3 }
 0x326   : > { %vm7563_vm1 = vcmp.eq.f32.partialorder %v2957_v24, 8.507059e+37  ;;  %5137 = vrcp.f32 %v7554_v55  ;;  %4165 = vmatmul.bf16.gmra.mxu2 %v4629_v11  ;;  %v2976_v42 = vadd.f32 1.1283791, %v2975_v35  ;;  %v3008_v4 = vadd.f32 0.00028619796, %v3007_v56 }
 0x327   : > { %v7569_v47 = vadd.f32 %v565_v52, %v5543_v5  ;;  %v7572_v26 = vadd.f32 %v614_v37, %v5545_v6  ;;  %v4573_v49 = vclamps-f32 %v2922_v44, 1.0  ;;  %v2950_v7 = vsub.f32 1.0, %v2949_v58 }
 0x328   : > { %v3019_v8 = vadd.f32 0.001143296, %v3018_v14  ;;  %v7574_v41 = vmin.f32 %v3045_v36, 16.0  ;;  %vm2954_vm2 = vweird.f32 %v5136_v51  ;;  %v2997_v1 = vand.u32 2147483647, %v7554_v55 }
 0x329   : > { %v2999_v33 = vand.u32 2147483648, %v7554_v55  ;;  %v3009_v22 = vmul.f32 %v3008_v4, %v7548_v19  ;;  %v3456_v54 = vadd.f32 1.0, %v4573_v49  ;;  %v2951_v57 = vmul.f32 %v5136_v51, %v2950_v7  ;;  %vm2955_vm4 = vmor %vm2953_vm0, %vm2954_vm2 }
 0x32a   : > { %v3020_v0 = vmul.f32 %v3019_v8, %v7548_v19  ;;  %v3047_v25 = vmul.f32 2.1237322e-06, %v7574_v41  ;;  %vm2993_vm3 = vweird.f32 %v7554_v55  ;;  %v3058_v43 = vmul.f32 3.8918573e-05, %v7574_v41 }
 0x32b   : > { %v3010_v50 = vadd.f32 0.0036580483, %v3009_v22  ;;  %v7584_v60 = vmul.f32 0.70710677, %v7569_v47  ;;  %v4633_v39 = vor.u32 %v4889_v17, %v4630_v46  ;;  %v3520_v28 = vmul.f32 %v3456_v54, %v7527_v38 }
 0x32c   : > { %v5138_v21 = vpop.eup %5137  ;;  %v2952_v45 = vadd.f32 %v5136_v51, %v2951_v57  ;;  %v3021_v20 = vadd.f32 0.014752088, %v3020_v0  ;;  %v3048_v10 = vadd.f32 0.00028619796, %v3047_v25  ;;  %vm7591_vm5 = vcmp.eq.f32.partialorder %v2997_v1, 8.507059e+37 }
 0x32d   : > { %v2989_v63 = vmul.f32 %v5138_v21, %v7554_v55  ;;  %v3011_v30 = vmul.f32 %v3010_v50, %v7548_v19  ;;  %v3059_v34 = vadd.f32 0.001143296, %v3058_v43  ;;  %4214 = vmatmul.bf16.gmra.mxu3 %v4633_v39  ;;  %v3558_v24 = vpack.c.bf16 %v3520_v28, %v3519_v23 }
 0x32e   : > { %v2956_v59 = vsel %vm2955_vm4, %v5136_v51, %v2952_v45  ;;  %v3022_v38 = vmul.f32 %v3021_v20, %v7548_v19  ;;  %v3049_v35 = vmul.f32 %v3048_v10, %v7574_v41  ;;  %v3085_v56 = vmul.f32 %v7584_v60, %v7584_v60 }
 0x32f   : > { %v2961_v3 = vsel %vm7563_vm1, %v2960_v9, %v2956_v59  ;;  %v2990_v32 = vsub.f32 1.0, %v2989_v63  ;;  %v3012_v29 = vadd.f32 0.05243302, %v3011_v30  ;;  %v3060_v52 = vmul.f32 %v3059_v34, %v7574_v41  ;;  %3590 = vst [vmem:[#allocation2 + $0xc8] sm:$0xff] %v3558_v24 }
 0x330   : > { %v2962_v37 = vmul.f32 %v2961_v3, %v7545_v62  ;;  %v3023_v11 = vadd.f32 0.112945676, %v3022_v38  ;;  %v3050_v31 = vadd.f32 0.0036580483, %v3049_v35  ;;  %vm2994_vm6 = vweird.f32 %v5138_v21 }
 0x331   : > { %v2991_v51 = vmul.f32 %v5138_v21, %v2990_v32  ;;  %v3013_v14 = vmul.f32 %v3012_v29, %v7548_v19  ;;  %v3061_v36 = vadd.f32 0.014752088, %v3060_v52  ;;  %v7607_v58 = vmin.f32 %v3085_v56, 16.0  ;;  %vm2995_vm7 = vmor %vm2993_vm3, %vm2994_vm6  ;;  %v663_v32 = vpop.f32.mrf.mxu2 }
 0x332   : > { %v4574_v23 = vclamps-f32 %v2962_v37, 1.0  ;;  %v3024_v9 = vmul.f32 %v3023_v11, %v7548_v19  ;;  %v3051_v44 = vmul.f32 %v3050_v31, %v7574_v41  ;;  %v3000_v4 = vor.u32 1.1754944e-38, %v2999_v33  ;;  %v712_v11 = vpop.f32.mrf.mxu3 }
 0x333   : > { %v2992_v48 = vadd.f32 %v5138_v21, %v2991_v51  ;;  %v3014_v62 = vadd.f32 0.18741608, %v3013_v14  ;;  %v3062_v46 = vmul.f32 %v3061_v36, %v7574_v41  ;;  %v2977_v49 = vmul.f32 %v2976_v42, %v7444_v12 }
 0x334   : > { %v3025_v7 = vadd.f32 0.4994258, %v3024_v9  ;;  %v3052_v8 = vadd.f32 0.05243302, %v3051_v44  ;;  %v7614_v1 = vmul.f32 0.70710677, %v7572_v26  ;;  %v7646_v36 = vadd.f32 %v663_v32, %v5559_v13 }
 0x335   : > { %v3457_v22 = vadd.f32 1.0, %v4574_v23  ;;  %v2996_v54 = vsel %vm2995_vm7, %v5138_v21, %v2992_v48  ;;  %v3063_v57 = vadd.f32 0.112945676, %v3062_v46  ;;  %v3087_v0 = vmul.f32 2.1237322e-06, %v7607_v58 }
 0x336   : > { %v3001_v33 = vsel %vm7591_vm5, %v3000_v4, %v2996_v54  ;;  %v3015_v25 = vmul.f32 %v3014_v62, %v7548_v19  ;;  %v3026_v12 = vmul.f32 %v3025_v7, %v7548_v19  ;;  %v3053_v55 = vmul.f32 %v3052_v8, %v7574_v41 }
 0x337   : > { %v769_v42 = vmul.f32 0.5, %v7379_v18  ;;  %v3002_v17 = vmul.f32 %v3001_v33, %v2977_v49  ;;  %v3064_v50 = vmul.f32 %v3063_v57, %v7574_v41  ;;  %v3088_v43 = vadd.f32 0.00028619796, %v3087_v0 }
 0x338   : > { %v7624_v39 = vadd.f32 1.0, %v3026_v12  ;;  %v3054_v21 = vadd.f32 0.18741608, %v3053_v55  ;;  %v3098_v28 = vmul.f32 3.8918573e-05, %v7607_v58  ;;  %v3125_v45 = vmul.f32 %v7614_v1, %v7614_v1 }
 0x339   : > { %v4575_v20 = vclamps-f32 %v3002_v17, 1.0  ;;  %v3065_v10 = vadd.f32 0.4994258, %v3064_v50  ;;  %v3089_v19 = vmul.f32 %v3088_v43, %v7607_v58  ;;  %v3521_v63 = vmul.f32 %v3457_v22, %v769_v42 }
 0x33a   : > { %v770_v27 = vmul.f32 0.5, %v7426_v2  ;;  %v3016_v18 = vadd.f32 1.1283791, %v3015_v25  ;;  %5139 = vrcp.f32 %v7624_v39  ;;  %v3055_v34 = vmul.f32 %v3054_v21, %v7574_v41 }
 0x33b   : > { %v3458_v30 = vadd.f32 1.0, %v4575_v20  ;;  %v3066_v24 = vmul.f32 %v3065_v10, %v7574_v41  ;;  %v3090_v59 = vadd.f32 0.0036580483, %v3089_v19  ;;  %v3037_v38 = vand.u32 2147483647, %v7624_v39 }
 0x33c   : > { %v3099_v35 = vadd.f32 0.001143296, %v3098_v28  ;;  %v7635_v3 = vmin.f32 %v3125_v45, 16.0  ;;  %v3039_v52 = vand.u32 2147483648, %v7624_v39  ;;  %v3056_v31 = vadd.f32 1.1283791, %v3055_v34 }
 0x33d   : > { %v3522_v29 = vmul.f32 %v3458_v30, %v770_v27  ;;  %v7638_v37 = vadd.f32 1.0, %v3066_v24  ;;  %v3091_v2 = vmul.f32 %v3090_v59, %v7607_v58  ;;  %v3017_v9 = vmul.f32 %v3016_v18, %v7524_v53 }
 0x33e   : > { %v3100_v56 = vmul.f32 %v3099_v35, %v7607_v58  ;;  %v3127_v41 = vmul.f32 2.1237322e-06, %v7635_v3  ;;  %v3138_v51 = vmul.f32 3.8918573e-05, %v7635_v3  ;;  %vm3033_vm8 = vweird.f32 %v7624_v39 }
 0x33f   : > { %v3559_v14 = vpack.c.bf16 %v3522_v29, %v3521_v63  ;;  %5141 = vrcp.f32 %v7638_v37  ;;  %v3092_v44 = vadd.f32 0.05243302, %v3091_v2  ;;  %v7651_v48 = vadd.f32 %v712_v11, %v5563_v15 }
 0x340   : > { %v5140_v23 = vpop.eup %5139  ;;  %vm7654_vm9 = vcmp.eq.f32.partialorder %v3037_v38, 8.507059e+37  ;;  %v3101_v46 = vadd.f32 0.014752088, %v3100_v56  ;;  %v3128_v49 = vadd.f32 0.00028619796, %v3127_v41  ;;  %v3040_v7 = vor.u32 1.1754944e-38, %v3039_v52 }
 0x341   : > { %3591 = vst [vmem:[#allocation2 + $0xd0] sm:$0xff] %v3559_v14  ;;  %v3029_v4 = vmul.f32 %v5140_v23, %v7624_v39  ;;  %v3057_v8 = vmul.f32 %v3056_v31, %v7551_v61  ;;  %v3077_v53 = vand.u32 2147483647, %v7638_v37  ;;  %v3139_v22 = vadd.f32 0.001143296, %v3138_v51 }
 0x342   : > { %v3102_v57 = vmul.f32 %v3101_v46, %v7607_v58  ;;  %v3129_v0 = vmul.f32 %v3128_v49, %v7635_v3  ;;  %v7663_v33 = vmul.f32 0.70710677, %v7646_v36  ;;  %vm3034_vm10 = vweird.f32 %v5140_v23 }
 0x343   : > { %v3030_v54 = vsub.f32 1.0, %v3029_v4  ;;  %vm3073_vm11 = vweird.f32 %v7638_v37  ;;  %v3093_v25 = vmul.f32 %v3092_v44, %v7607_v58  ;;  %v3140_v12 = vmul.f32 %v3139_v22, %v7635_v3  ;;  %vm3035_vm13 = vmor %vm3033_vm8, %vm3034_vm10 }
 0x344   : > { %v7669_v61 = vmul.f32 0.70710677, %v7651_v48  ;;  %v3103_v17 = vadd.f32 0.112945676, %v3102_v57  ;;  %v3130_v50 = vadd.f32 0.0036580483, %v3129_v0  ;;  %v3165_v43 = vmul.f32 %v7663_v33, %v7663_v33 }
 0x345   : > { %v5142_v55 = vpop.eup %5141  ;;  %v3031_v42 = vmul.f32 %v5140_v23, %v3030_v54  ;;  %vm7674_vm12 = vcmp.eq.f32.partialorder %v3077_v53, 8.507059e+37  ;;  %v3079_v45 = vand.u32 2147483648, %v7638_v37  ;;  %v3141_v20 = vadd.f32 0.014752088, %v3140_v12 }
 0x346   : > { %v3069_v21 = vmul.f32 %v5142_v55, %v7638_v37  ;;  %v3104_v19 = vmul.f32 %v3103_v17, %v7607_v58  ;;  %v3131_v63 = vmul.f32 %v3130_v50, %v7635_v3  ;;  %v7681_v27 = vmin.f32 %v3165_v43, 16.0 }
 0x347   : > { %v3032_v10 = vadd.f32 %v5140_v23, %v3031_v42  ;;  %v3094_v30 = vadd.f32 0.18741608, %v3093_v25  ;;  %v3142_v34 = vmul.f32 %v3141_v20, %v7635_v3  ;;  %v3205_v24 = vmul.f32 %v7669_v61, %v7669_v61  ;;  %v567_v20 = vpop.f32.mrf.mxu0 }
 0x348   : > { %v3070_v18 = vsub.f32 1.0, %v3069_v21  ;;  %vm3074_vm14 = vweird.f32 %v5142_v55  ;;  %v3105_v38 = vadd.f32 0.4994258, %v3104_v19  ;;  %v3167_v35 = vmul.f32 2.1237322e-06, %v7681_v27 }
 0x349   : > { %v3036_v59 = vsel %vm3035_vm13, %v5140_v23, %v3032_v10  ;;  %v3132_v52 = vadd.f32 0.05243302, %v3131_v63  ;;  %v3143_v2 = vadd.f32 0.112945676, %v3142_v34  ;;  %v3080_v11 = vor.u32 1.1754944e-38, %v3079_v45  ;;  %vm3075_vm15 = vmor %vm3073_vm11, %vm3074_vm14 }
 0x34a   : > { %v3041_v32 = vsel %vm7654_vm9, %v3040_v7, %v3036_v59  ;;  %v3071_v29 = vmul.f32 %v5142_v55, %v3070_v18  ;;  %v3106_v31 = vmul.f32 %v3105_v38, %v7607_v58  ;;  %v3168_v56 = vadd.f32 0.00028619796, %v3167_v35 }
 0x34b   : > { %v3042_v39 = vmul.f32 %v3041_v32, %v3017_v9  ;;  %v3144_v51 = vmul.f32 %v3143_v2, %v7635_v3  ;;  %v3178_v14 = vmul.f32 3.8918573e-05, %v7681_v27  ;;  %v7695_v23 = vmin.f32 %v3205_v24, 16.0 }
 0x34c   : > { %v3072_v41 = vadd.f32 %v5142_v55, %v3071_v29  ;;  %v3095_v4 = vmul.f32 %v3094_v30, %v7607_v58  ;;  %v7701_v62 = vadd.f32 1.0, %v3106_v31  ;;  %v3169_v9 = vmul.f32 %v3168_v56, %v7681_v27 }
 0x34d   : > { %v4576_v44 = vclamps-f32 %v3042_v39, 1.0  ;;  %v3133_v49 = vmul.f32 %v3132_v52, %v7635_v3  ;;  %v3145_v7 = vadd.f32 0.4994258, %v3144_v51  ;;  %v3179_v53 = vadd.f32 0.001143296, %v3178_v14 }
 0x34e   : > { %v3076_v46 = vsel %vm3075_vm15, %v5142_v55, %v3072_v41  ;;  %5143 = vrcp.f32 %v7701_v62  ;;  %v3207_v54 = vmul.f32 2.1237322e-06, %v7695_v23  ;;  %v771_v37 = vmul.f32 0.5, %v7508_v16 }
 0x34f   : > { %v3081_v22 = vsel %vm7674_vm12, %v3080_v11, %v3076_v46  ;;  %v3459_v57 = vadd.f32 1.0, %v4576_v44  ;;  %v3096_v0 = vadd.f32 1.1283791, %v3095_v4  ;;  %v3146_v25 = vmul.f32 %v3145_v7, %v7635_v3 }
 0x350   : > { %v3082_v58 = vmul.f32 %v3081_v22, %v3057_v8  ;;  %v3170_v12 = vadd.f32 0.0036580483, %v3169_v9  ;;  %v3180_v55 = vmul.f32 %v3179_v53, %v7681_v27  ;;  %v772_v42 = vmul.f32 0.5, %v7532_v40 }
 0x351   : > { %v3117_v50 = vand.u32 2147483647, %v7701_v62  ;;  %v3134_v43 = vadd.f32 0.18741608, %v3133_v49  ;;  %v7714_v21 = vadd.f32 1.0, %v3146_v25  ;;  %v3523_v8 = vmul.f32 %v3459_v57, %v771_v37 }
 0x352   : > { %v4577_v17 = vclamps-f32 %v3082_v58, 1.0  ;;  %v3171_v28 = vmul.f32 %v3170_v12, %v7681_v27  ;;  %v3181_v45 = vadd.f32 0.014752088, %v3180_v55  ;;  %v3208_v16 = vadd.f32 0.00028619796, %v3207_v54 }
 0x353   : > { %v7718_v19 = vmul.f32 0.5, %v7569_v47  ;;  %v3218_v63 = vmul.f32 3.8918573e-05, %v7695_v23  ;;  %v3097_v40 = vmul.f32 %v3096_v0, %v7584_v60  ;;  %vm3113_vm0 = vweird.f32 %v7701_v62  ;;  %v616_v47 = vpop.f32.mrf.mxu1 }
 0x354   : > { %v3460_v10 = vadd.f32 1.0, %v4577_v17  ;;  %v5144_v18 = vpop.eup %5143  ;;  %v3119_v30 = vand.u32 2147483648, %v7701_v62  ;;  %5145 = vrcp.f32 %v7714_v21  ;;  %v3172_v59 = vadd.f32 0.05243302, %v3171_v28 }
 0x355   : > { %v3109_v24 = vmul.f32 %v5144_v18, %v7701_v62  ;;  %v7727_v38 = vadd.f32 %v567_v20, %v5543_v5  ;;  %vm7729_vm1 = vcmp.eq.f32.partialorder %v3117_v50, 8.507059e+37  ;;  %v3135_v60 = vmul.f32 %v3134_v43, %v7635_v3 }
 0x356   : > { %v3524_v34 = vmul.f32 %v3460_v10, %v772_v42  ;;  %v3182_v32 = vmul.f32 %v3181_v45, %v7681_v27  ;;  %v3209_v29 = vmul.f32 %v3208_v16, %v7695_v23  ;;  %v3173_v39 = vmul.f32 %v3172_v59, %v7681_v27 }
 0x357   : > { %v3110_v2 = vsub.f32 1.0, %v3109_v24  ;;  %v3219_v11 = vadd.f32 0.001143296, %v3218_v63  ;;  %vm3114_vm2 = vweird.f32 %v5144_v18  ;;  %v7738_v56 = vadd.f32 %v616_v47, %v5545_v6 }
 0x358   : > { %v3560_v52 = vpack.c.bf16 %v3524_v34, %v3523_v8  ;;  %v3183_v31 = vadd.f32 0.112945676, %v3182_v32  ;;  %v3210_v5 = vadd.f32 0.0036580483, %v3209_v29  ;;  %v3174_v51 = vadd.f32 0.18741608, %v3173_v39  ;;  %vm3115_vm3 = vmor %vm3113_vm0, %vm3114_vm2 }
 0x359   : > { %v3111_v41 = vmul.f32 %v5144_v18, %v3110_v2  ;;  %v3220_v3 = vmul.f32 %v3219_v11, %v7695_v23  ;;  %v7742_v14 = vmul.f32 0.70710677, %v7727_v38  ;;  %v3120_v4 = vor.u32 1.1754944e-38, %v3119_v30  ;;  %v4894_v32 = vld [vmem:[#allocation2 + $0x6c] sm:$0xf0] }
 0x35a   : > { %3592 = vst [vmem:[#allocation2 + $0xd8] sm:$0xff] %v3560_v52  ;;  %v5146_v44 = vpop.eup %5145  ;;  %v3136_v9 = vadd.f32 1.1283791, %v3135_v60  ;;  %v3184_v46 = vmul.f32 %v3183_v31, %v7681_v27  ;;  %v7746_v49 = vmul.f32 0.70710677, %v7738_v56  ;;  %v3211_v22 = vmul.f32 %v3210_v5, %v7695_v23 }
 0x35b   : > { %v3112_v7 = vadd.f32 %v5144_v18, %v3111_v41  ;;  %v3149_v6 = vmul.f32 %v5146_v44, %v7714_v21  ;;  %v3157_v53 = vand.u32 2147483647, %v7714_v21  ;;  %v3159_v54 = vand.u32 2147483648, %v7714_v21  ;;  %v4636_v11 = vld [vmem:[#allocation2 + $0x60] sm:$0xf] }
 0x35c   : > { %v3185_v37 = vadd.f32 0.4994258, %v3184_v46  ;;  %v3221_v57 = vadd.f32 0.014752088, %v3220_v3  ;;  %v3245_v58 = vmul.f32 %v7742_v14, %v7742_v14  ;;  %vm3154_vm4 = vweird.f32 %v5146_v44 }
 0x35d   : > { %v3116_v0 = vsel %vm3115_vm3, %v5144_v18, %v3112_v7  ;;  %v3150_v25 = vsub.f32 1.0, %v3149_v6  ;;  %v3175_v12 = vmul.f32 %v3174_v51, %v7681_v27  ;;  %v3285_v17 = vmul.f32 %v7746_v49, %v7746_v49 }
 0x35e   : > { %v3121_v55 = vsel %vm7729_vm1, %v3120_v4, %v3116_v0  ;;  %v3186_v42 = vmul.f32 %v3185_v37, %v7681_v27  ;;  %v3222_v62 = vmul.f32 %v3221_v57, %v7695_v23  ;;  %v3212_v28 = vadd.f32 0.05243302, %v3211_v22 }
 0x35f   : > { %v3122_v50 = vmul.f32 %v3121_v55, %v3097_v40  ;;  %v3151_v43 = vmul.f32 %v5146_v44, %v3150_v25  ;;  %v7764_v45 = vmin.f32 %v3245_v58, 16.0  ;;  %v3137_v16 = vmul.f32 %v3136_v9, %v7614_v1 }
 0x360   : > { %vm3153_vm5 = vweird.f32 %v7714_v21  ;;  %v7768_v20 = vadd.f32 1.0, %v3186_v42  ;;  %v3223_v8 = vadd.f32 0.112945676, %v3222_v62  ;;  %v3176_v27 = vadd.f32 1.1283791, %v3175_v12 }
 0x361   : > { %v4578_v10 = vclamps-f32 %v3122_v50, 1.0  ;;  %v3152_v63 = vadd.f32 %v5146_v44, %v3151_v43  ;;  %v3247_v18 = vmul.f32 2.1237322e-06, %v7764_v45  ;;  %vm3155_vm6 = vmor %vm3153_vm5, %vm3154_vm4  ;;  %v3160_v30 = vor.u32 1.1754944e-38, %v3159_v54 }
 0x362   : > { %5147 = vrcp.f32 %v7768_v20  ;;  %v3258_v40 = vmul.f32 3.8918573e-05, %v7764_v45  ;;  %v7774_v34 = vmin.f32 %v3285_v17, 16.0  ;;  %vm3158_vm7 = vcmp.eq.f32.partialorder %v3157_v53, 8.507059e+37  ;;  %v4638_v17 = vld [vmem:[#allocation2 + $0x70] sm:$0xf0] }
 0x363   : > { %v3156_v1 = vsel %vm3155_vm6, %v5146_v44, %v3152_v63  ;;  %v3213_v21 = vmul.f32 %v3212_v28, %v7695_v23  ;;  %v3224_v24 = vmul.f32 %v3223_v8, %v7695_v23  ;;  %v774_v59 = vmul.f32 0.5, %v7572_v26  ;;  %v665_v8 = vpop.f32.mrf.mxu2 }
 0x364   : > { %v3161_v47 = vsel %vm3158_vm7, %v3160_v30, %v3156_v1  ;;  %v7780_v35 = vmul.f32 0.5, %v7646_v36  ;;  %v3248_v60 = vadd.f32 0.00028619796, %v3247_v18  ;;  %v3461_v29 = vadd.f32 1.0, %v4578_v10  ;;  %v4892_v18 = vld [vmem:[#allocation2 + $0x64] sm:$0xf] }
 0x365   : > { %v3162_v52 = vmul.f32 %v3161_v47, %v3137_v16  ;;  %v7783_v2 = vmul.f32 %v3176_v27, %v7663_v33  ;;  %v3225_v39 = vadd.f32 0.4994258, %v3224_v24  ;;  %v3259_v5 = vadd.f32 0.001143296, %v3258_v40  ;;  %v4895_v30 = vld [vmem:[#allocation2 + $0x74] sm:$0xf0] }
 0x366   : > { %v3249_v31 = vmul.f32 %v3248_v60, %v7764_v45  ;;  %v3287_v41 = vmul.f32 2.1237322e-06, %v7774_v34  ;;  %v3298_v26 = vmul.f32 3.8918573e-05, %v7774_v34  ;;  %v3214_v3 = vadd.f32 0.18741608, %v3213_v21 }
 0x367   : > { %v4579_v51 = vclamps-f32 %v3162_v52, 1.0  ;;  %v3226_v36 = vmul.f32 %v3225_v39, %v7695_v23  ;;  %v4637_v44 = vor.u32 %v4894_v32, %v4636_v11  ;;  %v3260_v46 = vmul.f32 %v3259_v5, %v7764_v45  ;;  %v4644_v47 = vld [vmem:[#allocation2 + $0x68] sm:$0xf] }
 0x368   : > { %v5148_v4 = vpop.eup %5147  ;;  %v3250_v9 = vadd.f32 0.0036580483, %v3249_v31  ;;  %v3288_v33 = vadd.f32 0.00028619796, %v3287_v41  ;;  %v3299_v7 = vadd.f32 0.001143296, %v3298_v26  ;;  %v3525_v6 = vmul.f32 %v3461_v29, %v7718_v19  ;;  %v714_v26 = vpop.f32.mrf.mxu3 }
 0x369   : > { %v3462_v53 = vadd.f32 1.0, %v4579_v51  ;;  %v3189_v22 = vmul.f32 %v5148_v4, %v7768_v20  ;;  %v7792_v54 = vadd.f32 1.0, %v3226_v36  ;;  %4072 = vmatmul.bf16.gmra.mxu0 %v4637_v44  ;;  %v3261_v57 = vadd.f32 0.014752088, %v3260_v46 }
 0x36a   : > { %v3251_v37 = vmul.f32 %v3250_v9, %v7764_v45  ;;  %v3289_v58 = vmul.f32 %v3288_v33, %v7774_v34  ;;  %v3300_v0 = vmul.f32 %v3299_v7, %v7774_v34  ;;  %v3197_v55 = vand.u32 2147483647, %v7768_v20 }
 0x36b   : > { %v3526_v25 = vmul.f32 %v3462_v53, %v774_v59  ;;  %v3190_v12 = vsub.f32 1.0, %v3189_v22  ;;  %5149 = vrcp.f32 %v7792_v54  ;;  %vm3194_vm8 = vweird.f32 %v5148_v4 }
 0x36c   : > { %v3199_v19 = vand.u32 2147483648, %v7768_v20  ;;  %v3252_v42 = vadd.f32 0.05243302, %v3251_v37  ;;  %v3262_v62 = vmul.f32 %v3261_v57, %v7764_v45  ;;  %v3290_v28 = vadd.f32 0.0036580483, %v3289_v58 }
 0x36d   : > { %v3561_v50 = vpack.c.bf16 %v3526_v25, %v3525_v6  ;;  %v3191_v43 = vmul.f32 %v5148_v4, %v3190_v12  ;;  %v3301_v16 = vadd.f32 0.014752088, %v3300_v0  ;;  %vm3193_vm9 = vweird.f32 %v7768_v20  ;;  %v4646_v6 = vld [vmem:[#allocation2 + $0x78] sm:$0xf0]  ;;  %v4893_v12 = vld [vmem:[#allocation2 + $0x6c] sm:$0xf] }
 0x36e   : > { %v3215_v10 = vmul.f32 %v3214_v3, %v7695_v23  ;;  %v3253_v63 = vmul.f32 %v3252_v42, %v7764_v45  ;;  %v3263_v27 = vadd.f32 0.112945676, %v3262_v62  ;;  %v3291_v1 = vmul.f32 %v3290_v28, %v7774_v34  ;;  %vm3195_vm10 = vmor %vm3193_vm9, %vm3194_vm8  ;;  %v4898_v62 = vld [vmem:[#allocation2 + $0x8c] sm:$0xf0] }
 0x36f   : > { %3593 = vst [vmem:[#allocation2 + $0xe0] sm:$0xff] %v3561_v50  ;;  %v3192_v40 = vadd.f32 %v5148_v4, %v3191_v43  ;;  %v3302_v21 = vmul.f32 %v3301_v16, %v7774_v34  ;;  %v4641_v24 = vor.u32 %v4892_v18, %v4638_v17  ;;  %vm3198_vm11 = vcmp.eq.f32.partialorder %v3197_v55, 8.507059e+37  ;;  %v4654_v18 = vld [vmem:[#allocation2 + $0x90] sm:$0xf0] }
 0x370   : > { %v3200_v59 = vor.u32 1.1754944e-38, %v3199_v19  ;;  %v3264_v20 = vmul.f32 %v3263_v27, %v7764_v45  ;;  %v7809_v23 = vadd.f32 %v665_v8, %v5559_v13  ;;  %v3292_v29 = vadd.f32 0.05243302, %v3291_v1  ;;  %v4896_v27 = vld [vmem:[#allocation2 + $0x84] sm:$0xf] }
 0x371   : > { %v5150_v60 = vpop.eup %5149  ;;  %v3196_v32 = vsel %vm3195_vm10, %v5148_v4, %v3192_v40  ;;  %v3303_v52 = vadd.f32 0.112945676, %v3302_v21  ;;  %4121 = vmatmul.bf16.gmra.mxu1 %v4641_v24  ;;  %v4645_v39 = vor.u32 %v4895_v30, %v4644_v47  ;;  %v7812_v31 = vmul.f32 0.5, %v7651_v48 }
 0x372   : > { %v3201_v11 = vsel %vm3198_vm11, %v3200_v59, %v3196_v32  ;;  %v3229_v5 = vmul.f32 %v5150_v60, %v7792_v54  ;;  %v3254_v41 = vadd.f32 0.18741608, %v3253_v63  ;;  %v3216_v3 = vadd.f32 1.1283791, %v3215_v10  ;;  %v4652_v63 = vld [vmem:[#allocation2 + $0x80] sm:$0xf] }
 0x373   : > { %v3202_v51 = vmul.f32 %v3201_v11, %v7783_v2  ;;  %v3265_v13 = vadd.f32 0.4994258, %v3264_v20  ;;  %v3304_v36 = vmul.f32 %v3303_v52, %v7774_v34  ;;  %4170 = vmatmul.bf16.gmra.mxu2 %v4645_v39  ;;  %v3237_v4 = vand.u32 2147483647, %v7792_v54 }
 0x374   : > { %v3230_v44 = vsub.f32 1.0, %v3229_v5  ;;  %v3239_v9 = vand.u32 2147483648, %v7792_v54  ;;  %v7820_v46 = vmul.f32 0.70710677, %v7809_v23  ;;  %v3293_v33 = vmul.f32 %v3292_v29, %v7774_v34 }
 0x375   : > { %v3266_v48 = vmul.f32 %v3265_v13, %v7764_v45  ;;  %v3305_v7 = vadd.f32 0.4994258, %v3304_v36  ;;  %v7825_v2 = vadd.f32 %v714_v26, %v5563_v15  ;;  %vm3234_vm12 = vweird.f32 %v5150_v60  ;;  %v4660_v26 = vld [vmem:[#allocation2 + $0x88] sm:$0xf] }
 0x376   : > { %v3231_v53 = vmul.f32 %v5150_v60, %v3230_v44  ;;  %v3255_v22 = vmul.f32 %v3254_v41, %v7764_v45  ;;  %v3325_v37 = vmul.f32 %v7820_v46, %v7820_v46  ;;  %v4580_v57 = vclamps-f32 %v3202_v51, 1.0  ;;  %v4676_v51 = vld [vmem:[#allocation2 + $0xa8] sm:$0xf] }
 0x377   : > { %v3217_v58 = vmul.f32 %v3216_v3, %v7669_v61  ;;  %v7831_v0 = vadd.f32 1.0, %v3266_v48  ;;  %v3306_v25 = vmul.f32 %v3305_v7, %v7774_v34  ;;  %vm3233_vm13 = vweird.f32 %v7792_v54 }
 0x378   : > { %v3232_v55 = vadd.f32 %v5150_v60, %v3231_v53  ;;  %v7835_v15 = vmin.f32 %v3325_v37, 16.0  ;;  %v4649_v19 = vor.u32 %v4893_v12, %v4646_v6  ;;  %vm3235_vm14 = vmor %vm3233_vm13, %vm3234_vm12  ;;  %vm3238_vm15 = vcmp.eq.f32.partialorder %v3237_v4, 8.507059e+37  ;;  %v4662_v6 = vld [vmem:[#allocation2 + $0x98] sm:$0xf0] }
 0x379   : > { %v3240_v45 = vor.u32 1.1754944e-38, %v3239_v9  ;;  %5151 = vrcp.f32 %v7831_v0  ;;  %v3294_v42 = vadd.f32 0.18741608, %v3293_v33  ;;  %v3256_v61 = vadd.f32 1.1283791, %v3255_v22 }
 0x37a   : > { %v3236_v17 = vsel %vm3235_vm14, %v5150_v60, %v3232_v55  ;;  %v7838_v50 = vadd.f32 1.0, %v3306_v25  ;;  %v7841_v43 = vmul.f32 0.70710677, %v7825_v2  ;;  %4219 = vmatmul.bf16.gmra.mxu3 %v4649_v19  ;;  %v3463_v28 = vadd.f32 1.0, %v4580_v57  ;;  %v4899_v60 = vld [vmem:[#allocation2 + $0x94] sm:$0xf0] }
 0x37b   : > { %v3241_v54 = vsel %vm3238_vm15, %v3240_v45, %v3236_v17  ;;  %v3327_v16 = vmul.f32 2.1237322e-06, %v7835_v15  ;;  %v3338_v8 = vmul.f32 3.8918573e-05, %v7835_v15  ;;  %v3277_v30 = vand.u32 2147483647, %v7831_v0 }
 0x37c   : > { %v3242_v10 = vmul.f32 %v3241_v54, %v3217_v58  ;;  %5153 = vrcp.f32 %v7838_v50  ;;  %v3279_v40 = vand.u32 2147483648, %v7831_v0  ;;  %v3295_v1 = vmul.f32 %v3294_v42, %v7774_v34  ;;  %v4897_v58 = vld [vmem:[#allocation2 + $0x8c] sm:$0xf] }
 0x37d   : > { %v3328_v21 = vadd.f32 0.00028619796, %v3327_v16  ;;  %v3339_v59 = vadd.f32 0.001143296, %v3338_v8  ;;  %v3365_v20 = vmul.f32 %v7841_v43, %v7841_v43  ;;  %v4653_v47 = vor.u32 %v4898_v62, %v4652_v63  ;;  %v4902_v63 = vld [vmem:[#allocation2 + $0xac] sm:$0xf0] }
 0x37e   : > { %v4581_v24 = vclamps-f32 %v3242_v10, 1.0  ;;  %v3527_v29 = vmul.f32 %v3463_v28, %v7780_v35  ;;  %v3257_v52 = vmul.f32 %v3256_v61, %v7742_v14  ;;  %v4657_v11 = vor.u32 %v4896_v27, %v4654_v18 }
 0x37f   : > { %v5152_v32 = vpop.eup %5151  ;;  %v3329_v39 = vmul.f32 %v3328_v21, %v7835_v15  ;;  %vm3273_vm0 = vweird.f32 %v7831_v0  ;;  %v3340_v34 = vmul.f32 %v3339_v59, %v7835_v15  ;;  %4077 = vmatmul.bf16.gmra.mxu0 %v4653_v47  ;;  %vm7857_vm1 = vcmp.eq.f32.partialorder %v3277_v30, 8.507059e+37  ;;  %v4670_v30 = vld [vmem:[#allocation2 + $0xb0] sm:$0xf0] }
 0x380   : > { %v3464_v5 = vadd.f32 1.0, %v4581_v24  ;;  %v3269_v41 = vmul.f32 %v5152_v32, %v7831_v0  ;;  %v3296_v3 = vadd.f32 1.1283791, %v3295_v1  ;;  %v7861_v35 = vmin.f32 %v3365_v20, 16.0  ;;  %v4668_v0 = vld [vmem:[#allocation2 + $0xa0] sm:$0xf] }
 0x381   : > { %4126 = vmatmul.bf16.gmra.mxu1 %v4657_v11  ;;  %v4661_v14 = vor.u32 %v4899_v60, %v4660_v26  ;;  %v3280_v4 = vor.u32 1.1754944e-38, %v3279_v40  ;;  %v3341_v9 = vadd.f32 0.014752088, %v3340_v34  ;;  %vm3274_vm2 = vweird.f32 %v5152_v32  ;;  %v4903_v11 = vld [vmem:[#allocation2 + $0xb4] sm:$0xf0] }
 0x382   : > { %v5154_v13 = vpop.eup %5153  ;;  %v3528_v36 = vmul.f32 %v3464_v5, %v7812_v31  ;;  %v3270_v44 = vsub.f32 1.0, %v3269_v41  ;;  %v3330_v33 = vadd.f32 0.0036580483, %v3329_v39  ;;  %v3367_v7 = vmul.f32 2.1237322e-06, %v7861_v35  ;;  %vm3275_vm3 = vmor %vm3273_vm0, %vm3274_vm2 }
 0x383   : > { %v3309_v48 = vmul.f32 %v5154_v13, %v7838_v50  ;;  %4175 = vmatmul.bf16.gmra.mxu2 %v4661_v14  ;;  %v3342_v37 = vmul.f32 %v3341_v9, %v7835_v15  ;;  %v3378_v57 = vmul.f32 3.8918573e-05, %v7861_v35  ;;  %v3317_v31 = vand.u32 2147483647, %v7838_v50  ;;  %v4900_v39 = vld [vmem:[#allocation2 + $0xa4] sm:$0xf] }
 0x384   : > { %v3562_v53 = vpack.c.bf16 %v3528_v36, %v3527_v29  ;;  %v3271_v22 = vmul.f32 %v5152_v32, %v3270_v44  ;;  %v3319_v12 = vand.u32 2147483648, %v7838_v50  ;;  %v3368_v55 = vadd.f32 0.00028619796, %v3367_v7 }
 0x385   : > { %v3310_v25 = vsub.f32 1.0, %v3309_v48  ;;  %v3343_v45 = vadd.f32 0.112945676, %v3342_v37  ;;  %v3379_v42 = vadd.f32 0.001143296, %v3378_v57  ;;  %v4665_v62 = vor.u32 %v4897_v58, %v4662_v6 }
 0x386   : > { %3594 = vst [vmem:[#allocation2 + $0xe8] sm:$0xff] %v3562_v53  ;;  %v3272_v19 = vadd.f32 %v5152_v32, %v3271_v22  ;;  %vm3314_vm4 = vweird.f32 %v5154_v13  ;;  %v3331_v61 = vmul.f32 %v3330_v33, %v7835_v15  ;;  %v3369_v28 = vmul.f32 %v3368_v55, %v7861_v35  ;;  %v4901_v58 = vld [vmem:[#allocation2 + $0xac] sm:$0xf] }
 0x387   : > { %v3311_v17 = vmul.f32 %v5154_v13, %v3310_v25  ;;  %v3297_v16 = vmul.f32 %v3296_v3, %v7746_v49  ;;  %v3344_v8 = vmul.f32 %v3343_v45, %v7835_v15  ;;  %v3380_v10 = vmul.f32 %v3379_v42, %v7861_v35  ;;  %v4906_v42 = vld [vmem:[#allocation2 + $0xcc] sm:$0xf0] }
 0x388   : > { %v3276_v54 = vsel %vm3275_vm3, %v5152_v32, %v3272_v19  ;;  %vm3313_vm5 = vweird.f32 %v7838_v50  ;;  %vm3318_vm6 = vcmp.eq.f32.partialorder %v3317_v31, 8.507059e+37  ;;  %v3320_v1 = vor.u32 1.1754944e-38, %v3319_v12 }
 0x389   : > { %v3281_v27 = vsel %vm7857_vm1, %v3280_v4, %v3276_v54  ;;  %v3312_v18 = vadd.f32 %v5154_v13, %v3311_v17  ;;  %vm3315_vm7 = vmor %vm3313_vm5, %vm3314_vm4  ;;  %v3345_v21 = vadd.f32 0.4994258, %v3344_v8  ;;  %v3381_v49 = vadd.f32 0.014752088, %v3380_v10  ;;  %v4686_v17 = vld [vmem:[#allocation2 + $0xd0] sm:$0xf0] }
 0x38a   : > { %v3282_v40 = vmul.f32 %v3281_v27, %v3257_v52  ;;  %4224 = vmatmul.bf16.gmra.mxu3 %v4665_v62  ;;  %v3332_v59 = vadd.f32 0.05243302, %v3331_v61  ;;  %v3370_v20 = vadd.f32 0.0036580483, %v3369_v28  ;;  %v4669_v47 = vor.u32 %v4902_v63, %v4668_v0  ;;  %v4904_v63 = vld [vmem:[#allocation2 + $0xc4] sm:$0xf] }
 0x38b   : > { %v3316_v24 = vsel %vm3315_vm7, %v5154_v13, %v3312_v18  ;;  %v3346_v29 = vmul.f32 %v3345_v21, %v7835_v15  ;;  %v3382_v50 = vmul.f32 %v3381_v49, %v7861_v35  ;;  %v4673_v52 = vor.u32 %v4900_v39, %v4670_v30  ;;  %v4907_v27 = vld [vmem:[#allocation2 + $0xd4] sm:$0xf0]  ;;  %v4692_v30 = vld [vmem:[#allocation2 + $0xc8] sm:$0xf]  ;;  %v4107_v21 = vpop.f32.mrf.mxu1 }
 0x38c   : > { %v4582_v60 = vclamps-f32 %v3282_v40, 1.0  ;;  %v3321_v32 = vsel %vm3318_vm6, %v3320_v1, %v3316_v24  ;;  %v777_v3 = vmul.f32 0.5, %v7727_v38  ;;  %v3371_v13 = vmul.f32 %v3370_v20, %v7861_v35  ;;  %v4678_v38 = vld [vmem:[#allocation2 + $0xb8] sm:$0xf0]  ;;  %v7898_v40 = vld [vmem:[%s7983_s4] ss:$0 sm:$0xff]  ;;  %v4058_v1 = vpop.f32.mrf.mxu0 }
 0x38d   : > { %v3322_v5 = vmul.f32 %v3321_v32, %v3297_v16  ;;  %v3347_v34 = vadd.f32 1.0, %v3346_v29  ;;  %v3383_v26 = vadd.f32 0.112945676, %v3382_v50  ;;  %v4677_v36 = vor.u32 %v4903_v11, %v4676_v51  ;;  %v4684_v16 = vld [vmem:[#allocation2 + $0xc0] sm:$0xf] }
 0x38e   : > { %v3465_v41 = vadd.f32 1.0, %v4582_v60  ;;  %v3333_v44 = vmul.f32 %v3332_v59, %v7835_v15  ;;  %v778_v9 = vmul.f32 0.5, %v7738_v56  ;;  %v3372_v6 = vadd.f32 0.05243302, %v3371_v13  ;;  %v4205_v60 = vpop.f32.mrf.mxu3 }
 0x38f   : > { %v4583_v14 = vclamps-f32 %v3322_v5, 1.0  ;;  %5155 = vrcp.f32 %v3347_v34  ;;  %4082 = vmatmul.bf16.gmra.mxu0 %v4669_v47  ;;  %v3384_v33 = vmul.f32 %v3383_v26, %v7861_v35  ;;  %v4681_v31 = vor.u32 %v4901_v58, %v4678_v38  ;;  %v4156_v47 = vpop.f32.mrf.mxu2 }
 0x390   : > { %v3529_v4 = vmul.f32 %v3465_v41, %v777_v3  ;;  %v3334_v22 = vadd.f32 0.18741608, %v3333_v44  ;;  %v3373_v56 = vmul.f32 %v3372_v6, %v7861_v35  ;;  %v3359_v62 = vand.u32 2147483648, %v3347_v34 }
 0x391   : > { %v3466_v48 = vadd.f32 1.0, %v4583_v14  ;;  %4131 = vmatmul.bf16.gmra.mxu1 %v4673_v52  ;;  %v3385_v53 = vadd.f32 0.4994258, %v3384_v33  ;;  %v3357_v28 = vand.u32 2147483647, %v3347_v34  ;;  %v4685_v10 = vor.u32 %v4906_v42, %v4684_v16 }
 0x392   : > { %v3335_v19 = vmul.f32 %v3334_v22, %v7835_v15  ;;  %v3374_v54 = vadd.f32 0.18741608, %v3373_v56  ;;  %vm3353_vm9 = vweird.f32 %v3347_v34  ;;  %v4689_v0 = vor.u32 %v4904_v63, %v4686_v17  ;;  %v4694_v52 = vld [vmem:[#allocation2 + $0xd8] sm:$0xf0] }
 0x393   : > { %v3530_v7 = vmul.f32 %v3466_v48, %v778_v9  ;;  %4180 = vmatmul.bf16.gmra.mxu2 %v4677_v36  ;;  %v3386_v57 = vmul.f32 %v3385_v53, %v7861_v35  ;;  %v3360_v15 = vor.u32 1.1754944e-38, %v3359_v62  ;;  %vm3358_vm11 = vcmp.eq.f32.partialorder %v3357_v28, 8.507059e+37 }
 0x394   : > { %v3336_v8 = vadd.f32 1.1283791, %v3335_v19  ;;  %v3375_v59 = vmul.f32 %v3374_v54, %v7861_v35  ;;  %v4693_v20 = vor.u32 %v4907_v27, %v4692_v30  ;;  %v4059_v39 = vadd.f32 %v7898_v40, %v4058_v1  ;;  %v4060_v44 = vpop.f32.mrf.mxu0 }
 0x395   : > { %v3563_v37 = vpack.c.bf16 %v3530_v7, %v3529_v4  ;;  %v5156_v25 = vpop.eup %5155  ;;  %v7891_v55 = vadd.f32 1.0, %v3386_v57  ;;  %v4109_v4 = vpop.f32.mrf.mxu1  ;;  %v4061_v33 = vadd.f32 %v7898_v40, %v4060_v44 }
 0x396   : > { %v3349_v12 = vmul.f32 %v5156_v25, %v3347_v34  ;;  %vm3354_vm8 = vweird.f32 %v5156_v25  ;;  %v3337_v32 = vmul.f32 %v3336_v8, %v7820_v46  ;;  %v4108_v41 = vadd.f32 %v4107_v21, %v4059_v39  ;;  %v4905_v46 = vld [vmem:[#allocation2 + $0xcc] sm:$0xf]  ;;  %v4207_v6 = vpop.f32.mrf.mxu3 }
 0x397   : > { %3595 = vst [vmem:[#allocation2 + $0xf0] sm:$0xff] %v3563_v37  ;;  %5157 = vrcp.f32 %v7891_v55  ;;  %vm3355_vm10 = vmor %vm3353_vm9, %vm3354_vm8  ;;  %v3376_v34 = vadd.f32 1.1283791, %v3375_v59  ;;  %v3399_v26 = vand.u32 2147483648, %v7891_v55  ;;  %v3397_v51 = vand.u32 2147483647, %v7891_v55  ;;  %v4158_v7 = vpop.f32.mrf.mxu2 }
 0x398   : > { %v3350_v45 = vsub.f32 1.0, %v3349_v12  ;;  %v4157_v3 = vadd.f32 %v4156_v47, %v4108_v41  ;;  %v4697_v14 = vor.u32 %v4905_v46, %v4694_v52  ;;  %vm3393_vm13 = vweird.f32 %v7891_v55  ;;  %v4700_v12 = vld [vmem:[#allocation2 + $0xe0] sm:$0xf]  ;;  %v4909_v47 = vld [vmem:[#allocation2 + $0xec] sm:$0xf] }
 0x399   : > { %v3400_v48 = vor.u32 1.1754944e-38, %v3399_v26  ;;  %v3377_v53 = vmul.f32 %v3376_v34, %v7841_v43  ;;  %vm3398_vm15 = vcmp.eq.f32.partialorder %v3397_v51, 8.507059e+37  ;;  %v4110_v57 = vadd.f32 %v4109_v4, %v4061_v33 }
 0x39a   : > { %4229 = vmatmul.bf16.gmra.mxu3 %v4681_v31  ;;  %v3351_v61 = vmul.f32 %v5156_v25, %v3350_v45  ;;  %v4206_v9 = vadd.f32 %v4205_v60, %v4157_v3  ;;  %v4908_v45 = vld [vmem:[#allocation2 + $0xe4] sm:$0xf] }
 0x39b   : > { %v4159_v56 = vadd.f32 %v4158_v7, %v4110_v57 }
 0x39c   : > { %v3352_v18 = vadd.f32 %v5156_v25, %v3351_v61  ;;  %4245 = vst [vmem:[%s7911_s16] sm:$0xff] %v4206_v9  ;;  %v780_v61 = vmul.f32 0.5, %v7825_v2  ;;  %v4063_v54 = vpop.f32.mrf.mxu0 }
 0x39d   : > { %v5158_v49 = vpop.eup %5157  ;;  %v4208_v62 = vadd.f32 %v4207_v6, %v4159_v56  ;;  %v4112_v16 = vpop.f32.mrf.mxu1  ;;  %v4064_v8 = vadd.f32 %v7898_v40, %v4063_v54 }
 0x39e   : > { %v3356_v24 = vsel %vm3355_vm10, %v5156_v25, %v3352_v18  ;;  %v3389_v50 = vmul.f32 %v5158_v49, %v7891_v55  ;;  %vm3394_vm12 = vweird.f32 %v5158_v49  ;;  %v4910_v37 = vld [vmem:[#allocation2 + $0xec] sm:$0xf0]  ;;  %v4702_v31 = vld [vmem:[#allocation2 + $0xf0] sm:$0xf0]  ;;  %v779_v55 = vmul.f32 0.5, %v7809_v23  ;;  %v4210_v27 = vpop.f32.mrf.mxu3 }
 0x39f   : > { %v3361_v29 = vsel %vm3358_vm11, %v3360_v15, %v3356_v24  ;;  %4087 = vmatmul.bf16.gmra.mxu0 %v4685_v10  ;;  %vm3395_vm14 = vmor %vm3393_vm13, %vm3394_vm12  ;;  %v4701_v19 = vor.u32 %v4910_v37, %v4700_v12  ;;  %v4705_v42 = vor.u32 %v4908_v45, %v4702_v31  ;;  %4246 = vst [vmem:[%s7911_s16 + $0x8] sm:$0xff] %v4208_v62  ;;  %v4161_v10 = vpop.f32.mrf.mxu2  ;;  %v4708_v24 = vld [vmem:[#allocation2 + $0xe8] sm:$0xf] }
 0x3a0   : > { %v3362_v11 = vmul.f32 %v3361_v29, %v3337_v32  ;;  %v3390_v5 = vsub.f32 1.0, %v3389_v50  ;;  %v4113_v23 = vadd.f32 %v4112_v16, %v4064_v8 }
 0x3a1   : > { %4136 = vmatmul.bf16.gmra.mxu1 %v4689_v0 }
 0x3a2   : > { %v3391_v35 = vmul.f32 %v5158_v49, %v3390_v5  ;;  %v4584_v13 = vclamps-f32 %v3362_v11, 1.0  ;;  %v4162_v0 = vadd.f32 %v4161_v10, %v4113_v23 }
 0x3a3   : > { %4185 = vmatmul.bf16.gmra.mxu2 %v4693_v20 }
 0x3a4   : > { %v3392_v36 = vadd.f32 %v5158_v49, %v3391_v35  ;;  %v3467_v58 = vadd.f32 1.0, %v4584_v13  ;;  %v4211_v15 = vadd.f32 %v4210_v27, %v4162_v0  ;;  %v4065_v30 = vpop.f32.mrf.mxu0 }
 0x3a5   : > { %v4114_v1 = vpop.f32.mrf.mxu1  ;;  %v4066_v2 = vadd.f32 %v7898_v40, %v4065_v30 }
 0x3a6   : > { %v3396_v38 = vsel %vm3395_vm14, %v5158_v49, %v3392_v36  ;;  %v3531_v17 = vmul.f32 %v3467_v58, %v779_v55  ;;  %4247 = vst [vmem:[%s7911_s16 + $0x10] sm:$0xff] %v4211_v15  ;;  %v4212_v59 = vpop.f32.mrf.mxu3 }
 0x3a7   : > { %v3401_v22 = vsel %vm3398_vm15, %v3400_v48, %v3396_v38  ;;  %v4163_v21 = vpop.f32.mrf.mxu2  ;;  %v4115_v49 = vadd.f32 %v4114_v1, %v4066_v2 }
 0x3a8   : > { %v3402_v25 = vmul.f32 %v3401_v22, %v3377_v53 }
 0x3a9   : > { %v4164_v32 = vadd.f32 %v4163_v21, %v4115_v49 }
 0x3aa   : > { %4234 = vmatmul.bf16.gmra.mxu3 %v4697_v14  ;;  %v4585_v43 = vclamps-f32 %v3402_v25, 1.0 }
 0x3ab   : > { %v4213_v39 = vadd.f32 %v4212_v59, %v4164_v32 }
 0x3ac   : > { %v3468_v28 = vadd.f32 1.0, %v4585_v43  ;;  %v4068_v11 = vpop.f32.mrf.mxu0 }
 0x3ad   : > { %v4069_v5 = vadd.f32 %v7898_v40, %v4068_v11  ;;  %4248 = vst [vmem:[%s7911_s16 + $0x18] sm:$0xff] %v4213_v39  ;;  %v4117_v52 = vpop.f32.mrf.mxu1 }
 0x3ae   : > { %v3532_v63 = vmul.f32 %v3468_v28, %v780_v61 }
 0x3af   : > { %4092 = vmatmul.bf16.gmra.mxu0 %v4701_v19  ;;  %v4166_v41 = vpop.f32.mrf.mxu2  ;;  %v4118_v34 = vadd.f32 %v4117_v52, %v4069_v5 }
 0x3b0   : > { %v3564_v18 = vpack.c.bf16 %v3532_v63, %v3531_v17  ;;  %v4215_v35 = vpop.f32.mrf.mxu3 }
 0x3b1   : > { %4141 = vmatmul.bf16.gmra.mxu1 %v4705_v42  ;;  %v4167_v26 = vadd.f32 %v4166_v41, %v4118_v34 }
 0x3b2   : > { %3596 = vst [vmem:[#allocation2 + $0xf8] sm:$0xff] %v3564_v18 }
 0x3b3   : > { %v4216_v51 = vadd.f32 %v4215_v35, %v4167_v26 }
 0x3b4   : > { %v4070_v46 = vpop.f32.mrf.mxu0 }
 0x3b5   : > { %4249 = vst [vmem:[%s7911_s16 + $0x20] sm:$0xff] %v4216_v51  ;;  %v4071_v3 = vadd.f32 %v7898_v40, %v4070_v46  ;;  %v4119_v14 = vpop.f32.mrf.mxu1 }
 0x3b7   : > { %v4120_v13 = vadd.f32 %v4119_v14, %v4071_v3  ;;  %v4168_v36 = vpop.f32.mrf.mxu2 }
 0x3b8   : > { %v4217_v4 = vpop.f32.mrf.mxu3 }
 0x3b9   : > { %v4911_v20 = vld [vmem:[#allocation2 + $0xf4] sm:$0xf0]  ;;  %v4710_v60 = vld [vmem:[#allocation2 + $0xf8] sm:$0xf0]  ;;  %v4169_v44 = vadd.f32 %v4168_v36, %v4120_v13 }
 0x3ba   : > { %v4709_v29 = vor.u32 %v4911_v20, %v4708_v24  ;;  %v4713_v50 = vor.u32 %v4909_v47, %v4710_v60 }
 0x3bb   : > { %v4218_v9 = vadd.f32 %v4217_v4, %v4169_v44 }
 0x3bc   : > { %4190 = vmatmul.bf16.gmra.mxu2 %v4709_v29  ;;  %4239 = vmatmul.bf16.gmra.mxu3 %v4713_v50 }
 0x3bd   : > { %4250 = vst [vmem:[%s7911_s16 + $0x28] sm:$0xff] %v4218_v9 }
 0x3e6   : > { %v4073_v48 = vpop.f32.mrf.mxu0 }
 0x3e7   : > { %v4074_v6 = vadd.f32 %v7898_v40, %v4073_v48 }
 0x3ee   : > { %v4122_v33 = vpop.f32.mrf.mxu1  ;;  %v4075_v7 = vpop.f32.mrf.mxu0 }
 0x3ef   : > { %v4123_v22 = vadd.f32 %v4122_v33, %v4074_v6  ;;  %v4076_v57 = vadd.f32 %v7898_v40, %v4075_v7 }
 0x3f6   : > { %v4124_v53 = vpop.f32.mrf.mxu1  ;;  %v4171_v38 = vpop.f32.mrf.mxu2 }
 0x3f7   : > { %v4172_v37 = vadd.f32 %v4171_v38, %v4123_v22  ;;  %v4125_v55 = vadd.f32 %v4124_v53, %v4076_v57 }
 0x3fc   : > { %v4078_v25 = vpop.f32.mrf.mxu0 }
 0x3fd   : > { %v4220_v58 = vpop.f32.mrf.mxu3  ;;  %v4079_v19 = vadd.f32 %v7898_v40, %v4078_v25 }
 0x3fe   : > { %v4221_v31 = vadd.f32 %v4220_v58, %v4172_v37  ;;  %v4127_v12 = vpop.f32.mrf.mxu1  ;;  %v4173_v56 = vpop.f32.mrf.mxu2 }
 0x3ff   : > { %v4174_v43 = vadd.f32 %v4173_v56, %v4125_v55  ;;  %v4128_v28 = vadd.f32 %v4127_v12, %v4079_v19 }
 0x400   : > { %4251 = vst [vmem:[%s7911_s16 + $0x30] sm:$0xff] %v4221_v31 }
 0x404   : > { %v4080_v42 = vpop.f32.mrf.mxu0 }
 0x405   : > { %v4222_v45 = vpop.f32.mrf.mxu3  ;;  %v4081_v16 = vadd.f32 %v7898_v40, %v4080_v42 }
 0x406   : > { %v4223_v62 = vadd.f32 %v4222_v45, %v4174_v43  ;;  %v4176_v17 = vpop.f32.mrf.mxu2  ;;  %v4129_v61 = vpop.f32.mrf.mxu1 }
 0x407   : > { %v4177_v54 = vadd.f32 %v4176_v17, %v4128_v28  ;;  %v4130_v23 = vadd.f32 %v4129_v61, %v4081_v16 }
 0x408   : > { %4252 = vst [vmem:[%s7911_s16 + $0x38] sm:$0xff] %v4223_v62 }
 0x40c   : > { %v4083_v10 = vpop.f32.mrf.mxu0 }
 0x40d   : > { %v4225_v8 = vpop.f32.mrf.mxu3  ;;  %v4084_v15 = vadd.f32 %v7898_v40, %v4083_v10 }
 0x40e   : > { %v4226_v63 = vadd.f32 %v4225_v8, %v4177_v54  ;;  %v4178_v27 = vpop.f32.mrf.mxu2  ;;  %v4132_v18 = vpop.f32.mrf.mxu1 }
 0x40f   : > { %v4179_v0 = vadd.f32 %v4178_v27, %v4130_v23  ;;  %v4133_v49 = vadd.f32 %v4132_v18, %v4084_v15 }
 0x410   : > { %4253 = vst [vmem:[%s7911_s16 + $0x40] sm:$0xff] %v4226_v63 }
 0x414   : > { %v4085_v1 = vpop.f32.mrf.mxu0 }
 0x415   : > { %v4227_v30 = vpop.f32.mrf.mxu3  ;;  %v4086_v20 = vadd.f32 %v7898_v40, %v4085_v1 }
 0x416   : > { %v4228_v2 = vadd.f32 %v4227_v30, %v4179_v0  ;;  %v4181_v21 = vpop.f32.mrf.mxu2  ;;  %v4134_v59 = vpop.f32.mrf.mxu1 }
 0x417   : > { %v4182_v24 = vadd.f32 %v4181_v21, %v4133_v49  ;;  %v4135_v50 = vadd.f32 %v4134_v59, %v4086_v20 }
 0x418   : > { %4254 = vst [vmem:[%s7911_s16 + $0x48] sm:$0xff] %v4228_v2 }
 0x41c   : > { %v4088_v29 = vpop.f32.mrf.mxu0 }
 0x41d   : > { %v4230_v47 = vpop.f32.mrf.mxu3  ;;  %v4089_v11 = vadd.f32 %v7898_v40, %v4088_v29 }
 0x41e   : > { %v4231_v60 = vadd.f32 %v4230_v47, %v4182_v24  ;;  %v4183_v32 = vpop.f32.mrf.mxu2  ;;  %v4137_v5 = vpop.f32.mrf.mxu1 }
 0x41f   : > { %v4184_v39 = vadd.f32 %v4183_v32, %v4135_v50  ;;  %v4138_v26 = vadd.f32 %v4137_v5, %v4089_v11 }
 0x420   : > { %4255 = vst [vmem:[%s7911_s16 + $0x50] sm:$0xff] %v4231_v60 }
 0x424   : > { %v4090_v35 = vpop.f32.mrf.mxu0 }
 0x425   : > { %v4232_v52 = vpop.f32.mrf.mxu3  ;;  %v4091_v46 = vadd.f32 %v7898_v40, %v4090_v35 }
 0x426   : > { %v4233_v41 = vadd.f32 %v4232_v52, %v4184_v39  ;;  %v4186_v34 = vpop.f32.mrf.mxu2  ;;  %v4139_v13 = vpop.f32.mrf.mxu1 }
 0x427   : > { %v4187_v51 = vadd.f32 %v4186_v34, %v4138_v26  ;;  %v4140_v44 = vadd.f32 %v4139_v13, %v4091_v46 }
 0x428   : > { %4256 = vst [vmem:[%s7911_s16 + $0x58] sm:$0xff] %v4233_v41 }
 0x42c   : > { %v4093_v48 = vpop.f32.mrf.mxu0 }
 0x42d   : > { %v4235_v3 = vpop.f32.mrf.mxu3  ;;  %v4094_v7 = vadd.f32 %v7898_v40, %v4093_v48 }
 0x42e   : > { %v4236_v14 = vadd.f32 %v4235_v3, %v4187_v51  ;;  %v4188_v36 = vpop.f32.mrf.mxu2  ;;  %v4142_v6 = vpop.f32.mrf.mxu1 }
 0x42f   : > { %v4189_v4 = vadd.f32 %v4188_v36, %v4140_v44  ;;  %v4143_v53 = vadd.f32 %v4142_v6, %v4094_v7 }
 0x430   : > { %4257 = vst [vmem:[%s7911_s16 + $0x60] sm:$0xff] %v4236_v14 }
 0x434   : > { %v4095_v38 = vpop.f32.mrf.mxu0 }
 0x435   : > { %v4237_v9 = vpop.f32.mrf.mxu3  ;;  %v4096_v58 = vadd.f32 %v7898_v40, %v4095_v38 }
 0x436   : > { %v4238_v33 = vadd.f32 %v4237_v9, %v4189_v4  ;;  %v4144_v31 = vpop.f32.mrf.mxu1 }
 0x437   : > { %v4145_v12 = vadd.f32 %v4144_v31, %v4096_v58 }
 0x438   : > { %4258 = vst [vmem:[%s7911_s16 + $0x68] sm:$0xff] %v4238_v33 }
 0x43f   : > { %v4191_v22 = vpop.f32.mrf.mxu2  ;;  %v4240_v37 = vpop.f32.mrf.mxu3 }
 0x440   : > { %v4192_v57 = vadd.f32 %v4191_v22, %v4143_v53 }
 0x442   : > { %v4241_v25 = vadd.f32 %v4240_v37, %v4192_v57 }
 0x444   : > { %4259 = vst [vmem:[%s7911_s16 + $0x70] sm:$0xff] %v4241_v25 }
 0x447   : > { %v4193_v56 = vpop.f32.mrf.mxu2  ;;  %v4242_v43 = vpop.f32.mrf.mxu3 }
 0x448   : > { %v4194_v55 = vadd.f32 %v4193_v56, %v4145_v12 }
 0x44a   : > { %v4243_v19 = vadd.f32 %v4242_v43, %v4194_v55 }
 0x44c   : > { %4260 = vst [vmem:[%s7911_s16 + $0x78] sm:$0xff] %v4243_v19 }
 0x44d   : > { %5306 = shalt.err (!%p5303_p10)
}
 0x44e   : > { %s5364_s17 = smov 128   ;;  %s5365_s29 = smov 8  }
 0x44f   : > { %4959 = dma.vmem_to_hbm [thread:$0]  (%p5479_p7), %s4275_s12, 2048, %s4277_s13, %s4262_s22, %s5364_s17, %s5364_s17, %s5365_s29  }
 0x450 PF: > { %s4291_s16 = sand.u32 1, %s5341_s18   ;;  %p8075_p12 = scmp.ge.s32.totalorder %s5353_s21, 2 }
 0x451   : > { %s4292_s23 = scalar_lea.sflag [#allocation5], %s4291_s16 }
 0x452   : > { %p4976_p13 = pnand %p8075_p12, %p5431_p6 }
 0x454   : > { %p4977_p0 = pneg %p4976_p13 }
 0x456   : > { %5336 = dma.done.wait (%p4977_p0), %s4292_s23, 2048  }
 0x457   : > { %5338 = vsyncadd (%p4977_p0), %s4292_s23, 4294965248  ;;  %p20_p3 = scmp.ge.s32.totalorder %s5465_s30, 4   ;;  %s8076_s18 = smov %s5345_s19 }
 0x458   : > { %s8077_s19 = smov %s5349_s20  ;;  %s8078_s20 = smov %s5475_s9 }
 0x459   : > { %s8079_s21 = smov %s5465_s30  ;;  %22 = sbr.rel (!%p20_p3) target bundleno = 7 (0x7), region = 97 }
 0x45e   :  { %4298 = vsyncpa [#allocation4], 1 }
 0x45f   :  { %4300 = vsyncpa [#allocation4 + $0x1], 1 }
 0x460   :  { %4301 = vsyncpa [#allocation7], 1 }
 0x461   :  { %4302 = vsyncpa [#allocation10], 1 }
 0x462   :  { %4303 = vsyncpa [#allocation5], 1 }
 0x463   :  { %4305 = vsyncpa [#allocation5 + $0x1], 1 }

</bundles_post_ra>
